<compile_context>
chip_gen: v7x
topology: tpu7x:2x2x1
jax: 0.10.0
libtpu: 0.0.40
codegen_flags: <defaults>
</compile_context>

<pallas_src>
import functools
import math

import jax
import jax.numpy as jnp
from jax import lax
from jax.experimental import pallas as pl
from jax.experimental.pallas import tpu as pltpu


_SQRT_HALF = 0.7071067811865476


def _fast_reciprocal(x):
    # EUP vrcp seed (frees the VALU) + one Newton-Raphson refinement so the
    # ~1e-4 seed error does not leak into the output (x >= 1 here, so safe).
    r = pl.reciprocal(x, approx=True)
    return r * (2.0 - x * r)


def _erf_approx(z):
    # Abramowitz & Stegun 7.1.26 rational approximation of erf, |err| < 1.5e-7.
    az = jnp.abs(z)
    t = _fast_reciprocal(1.0 + 0.3275911 * az)
    poly = t * (0.254829592
                + t * (-0.284496736
                       + t * (1.421413741
                              + t * (-1.453152027 + t * 1.061405429))))
    e = 1.0 - poly * jnp.exp(-(az * az))
    return jnp.where(z < 0.0, -e, e)


def _gelu_exact(x):
    # nn.GELU() default (erf form): x * 0.5 * (1 + erf(x / sqrt(2)))
    return 0.5 * x * (1.0 + _erf_approx(x * _SQRT_HALF))


def _mixmlp_kernel(x_ref, w1_ref, b1_ref, wd_ref, bd_ref, w2_ref, b2_ref,
                   o_ref, *, h, w, c_in, c_out, group, n_groups):
    """One block of (group * n_groups) samples per grid step.

    Layout: (samples*channels, H*W) with HW on lanes, channels on sublanes.
    """
    hw = h * w

    # ---------------- loop-invariant hoists (once per grid step) ----------------
    w1 = w1_ref[...]                  # (c_hid, c_in)
    b1 = b1_ref[...]                  # (c_hid, 1)
    wd = wd_ref[...]                  # (c_hid, 9)
    bd = bd_ref[...]                  # (c_hid, 1)
    w2 = w2_ref[...]                  # (c_out, c_hid)
    b2 = b2_ref[...]                  # (c_out, 1)

    # Boundary masks at (1, hw); jnp.where broadcasts them across sublanes.
    lane = lax.broadcasted_iota(jnp.int32, (1, hw), 1)
    if w & (w - 1) == 0:              # power-of-two width: cheap bit op
        col = jnp.bitwise_and(lane, w - 1)
    else:
        col = lane % w
    ok_up = lane >= w                 # row-1 in range
    ok_down = lane < (h - 1) * w      # row+1 in range
    ok_left = col >= 1                # col-1 in range
    ok_right = col < (w - 1)          # col+1 in range

    taps, masks, shifts = [], [], []
    for kh in range(3):
        for kw in range(3):
            dh, dw = kh - 1, kw - 1
            m = None
            if dh == -1:
                m = ok_up
            elif dh == 1:
                m = ok_down
            if dw == -1:
                m = ok_left if m is None else jnp.logical_and(m, ok_left)
            elif dw == 1:
                m = ok_right if m is None else jnp.logical_and(m, ok_right)
            masks.append(m)
            taps.append(wd[:, kh * 3 + kw:kh * 3 + kw + 1])   # (c_hid, 1)
            shifts.append((-(dh * w + dw)) % hw)

    def sample_fwd(xs):               # xs: (c_in, hw)
        # fc1: 1x1 conv == (c_hid, c_in) @ (c_in, hw) on the MXU, f32 accumulate.
        y = jnp.dot(w1, xs, preferred_element_type=jnp.float32) + b1
        # Depthwise 3x3, pad=1: 9 rolled + masked + per-channel-scaled adds.
        acc = jnp.zeros_like(y)
        for k in range(9):
            s = pltpu.roll(y, shift=shifts[k], axis=1) if shifts[k] else y
            if masks[k] is not None:
                s = jnp.where(masks[k], s, 0.0)   # zero-padding semantics
            acc = acc + s * taps[k]
        z = _gelu_exact(acc + bd)                 # Dropout(p=0.0) == identity
        # fc2: 1x1 conv == (c_out, c_hid) @ (c_hid, hw).
        return jnp.dot(w2, z, preferred_element_type=jnp.float32) + b2

    gi = group * c_in                 # 8-sublane-aligned group strides
    go = group * c_out

    def process_group(xg):            # xg: (group*c_in, hw)
        outs = [sample_fwd(xg[s * c_in:(s + 1) * c_in, :]) for s in range(group)]
        return outs[0] if group == 1 else jnp.concatenate(outs, axis=0)

    if n_groups == 1:
        o_ref[...] = process_group(x_ref[...]).astype(o_ref.dtype)
    else:
        def body(g, carry):
            off_i = pl.multiple_of(g * gi, gi)
            off_o = pl.multiple_of(g * go, go)
            og = process_group(x_ref[pl.ds(off_i, gi), :])
            o_ref[pl.ds(off_o, go), :] = og.astype(o_ref.dtype)
            return carry
        lax.fori_loop(0, n_groups, body, 0, unroll=n_groups <= 8)


def _choose_block_samples(n, c_in, c_out, hw, group):
    """Samples per grid step: a multiple of `group`, a divisor of n, within a
    conservative VMEM budget, preferring >= 2 grid steps (v7x has 2 TCs that
    share a "parallel" grid axis)."""
    if group >= n:
        return n
    io_bytes = 4 * hw * (c_in + c_out) * 2            # per-sample, double-buffered I/O
    cap = max(group, (8 << 20) // max(io_bytes, 1))   # ~8 MiB of I/O blocks
    cands = [d for d in range(group, n + 1, group) if n % d == 0 and d <= cap]
    if not cands:
        return group
    pref = [d for d in cands if n // d >= 2]
    return max(pref) if pref else max(cands)


def mixmlp_forward(x_nchw, params):
    """MixMlp forward. Public layout NCHW (PyTorch); internal (N*C, H*W)."""
    w1, b1, wd, bd, w2, b2 = params
    n, c_in, h, w = x_nchw.shape
    c_hid = w1.shape[0]
    c_out = w2.shape[0]
    hw = h * w

    # Smallest #samples whose channels fill whole 8-row sublane tiles for both
    # the input and output streams (fully dense, unmasked I/O).
    group = max(8 // math.gcd(8, c_in), 8 // math.gcd(8, c_out))
    if n % group != 0:
        group = n          # fallback: single full block, static in-kernel loop
    nb = _choose_block_samples(n, c_in, c_out, hw, group)
    n_groups = nb // group
    grid = (n // nb,)

    # Sublane-dense flattening (free reshape, no transpose on either side).
    x_flat = x_nchw.reshape(n * c_in, hw)
    w1_2d = w1.reshape(c_hid, c_in)
    wd_2d = wd.reshape(c_hid, 9)
    w2_2d = w2.reshape(c_out, c_hid)
    b1_2d = b1.reshape(c_hid, 1)
    bd_2d = bd.reshape(c_hid, 1)
    b2_2d = b2.reshape(c_out, 1)

    # Explicit VMEM budget: double-buffered I/O blocks + weights + working set.
    block_bytes = 4 * hw * nb * (c_in + c_out) * 2
    weight_bytes = 4 * (c_hid * (c_in + 9 + 2) + c_out * (c_hid + 1))
    work_bytes = 4 * hw * c_hid * 4
    vmem_limit = int(min(32 << 20,
                         max(16 << 20, 2 * (block_bytes + weight_bytes + work_bytes))))

    kernel = functools.partial(_mixmlp_kernel, h=h, w=w, c_in=c_in, c_out=c_out,
                               group=group, n_groups=n_groups)
    out = pl.pallas_call(
        kernel,
        out_shape=jax.ShapeDtypeStruct((n * c_out, hw), jnp.float32),
        grid_spec=pl.GridSpec(
            grid=grid,
            in_specs=[
                pl.BlockSpec((nb * c_in, hw), lambda i: (i, 0)),
                pl.BlockSpec((c_hid, c_in), lambda i: (0, 0)),
                pl.BlockSpec((c_hid, 1), lambda i: (0, 0)),
                pl.BlockSpec((c_hid, 9), lambda i: (0, 0)),
                pl.BlockSpec((c_hid, 1), lambda i: (0, 0)),
                pl.BlockSpec((c_out, c_hid), lambda i: (0, 0)),
                pl.BlockSpec((c_out, 1), lambda i: (0, 0)),
            ],
            out_specs=pl.BlockSpec((nb * c_out, hw), lambda i: (i, 0)),
        ),
        compiler_params=pltpu.CompilerParams(
            dimension_semantics=("parallel",),
            vmem_limit_bytes=vmem_limit),
    )(x_flat, w1_2d, b1_2d, wd_2d, bd_2d, w2_2d, b2_2d)
    return out.reshape(n, c_out, h, w)


def init_mixmlp_params(key, c_in, c_hid, c_out):
    # Matches MixMlp._init_weights for nn.Conv2d:
    #   weight ~ N(0, sqrt(2 / fan_out)), fan_out = kh*kw*out_ch / groups; bias = 0.
    k1, k2, k3 = jax.random.split(key, 3)
    w1 = jax.random.normal(k1, (c_hid, c_in, 1, 1), jnp.float32) * math.sqrt(2.0 / c_hid)
    b1 = jnp.zeros((c_hid,), jnp.float32)
    wd = jax.random.normal(k2, (c_hid, 1, 3, 3), jnp.float32) * math.sqrt(2.0 / 9.0)
    bd = jnp.zeros((c_hid,), jnp.float32)
    w2 = jax.random.normal(k3, (c_out, c_hid, 1, 1), jnp.float32) * math.sqrt(2.0 / c_out)
    b2 = jnp.zeros((c_out,), jnp.float32)
    return (w1, b1, wd, bd, w2, b2)


def mixmlp_ref(x, params):
    # Pure-JAX (XLA) reference, f32-precision convs.
    w1, b1, wd, bd, w2, b2 = params
    dn = ("NCHW", "OIHW", "NCHW")
    hp = lax.Precision.HIGHEST
    y = lax.conv_general_dilated(x, w1, (1, 1), "VALID",
                                 dimension_numbers=dn, precision=hp)
    y = y + b1[None, :, None, None]
    y = lax.conv_general_dilated(y, wd, (1, 1), ((1, 1), (1, 1)),
                                 dimension_numbers=dn,
                                 feature_group_count=y.shape[1], precision=hp)
    y = y + bd[None, :, None, None]
    y = jax.nn.gelu(y, approximate=False)
    y = lax.conv_general_dilated(y, w2, (1, 1), "VALID",
                                 dimension_numbers=dn, precision=hp)
    y = y + b2[None, :, None, None]
    return y


if __name__ == "__main__":
    key = jax.random.PRNGKey(0)
    kx, kp = jax.random.split(key)
    # Small shapes consistent with the module: x (N=2, C_in=4, H=W=16),
    # hidden_features=32, out_features defaults to in_features.
    N, C_in, H, W = 2, 4, 16, 16
    C_hid = 32
    C_out = C_in

    x = jax.random.normal(kx, (N, C_in, H, W), jnp.float32)
    params = init_mixmlp_params(kp, C_in, C_hid, C_out)

    fwd = jax.jit(lambda xx: mixmlp_forward(xx, params))
    out = fwd(x)
    jax.block_until_ready(out)
    assert out.shape == (N, C_out, H, W), out.shape

    ref = mixmlp_ref(x, params)
    max_err = float(jnp.max(jnp.abs(out - ref)))
    assert max_err < 2e-3, f"max abs err vs reference = {max_err}"

    print("KERNEL_OK")
</pallas_src>

<mosaic_0001>
module attributes {stable_mosaic.version = 11 : i64} {
  func.func @_mixmlp_kernel(%arg0: i32, %arg1: memref<8x256xf32, #tpu.memory_space<vmem>>, %arg2: memref<32x4xf32, #tpu.memory_space<vmem>>, %arg3: memref<32x1xf32, #tpu.memory_space<vmem>>, %arg4: memref<32x9xf32, #tpu.memory_space<vmem>>, %arg5: memref<32x1xf32, #tpu.memory_space<vmem>>, %arg6: memref<4x32xf32, #tpu.memory_space<vmem>>, %arg7: memref<4x1xf32, #tpu.memory_space<vmem>>, %arg8: memref<8x256xf32, #tpu.memory_space<vmem>>) attributes {dimension_semantics = [#tpu.dimension_semantics<parallel>], iteration_bounds = array<i64: 1>, scalar_prefetch = 0 : i64, scratch_operands = 0 : i64, tpu.core_type = #tpu.core_type<tc>, window_params = [{transform_indices = @transform_0, window_bounds = array<i64: 8, 256>}, {pipeline_mode = #tpu.pipeline_mode<synchronous>, transform_indices = @transform_1, window_bounds = array<i64: 32, 4>}, {pipeline_mode = #tpu.pipeline_mode<synchronous>, transform_indices = @transform_2, window_bounds = array<i64: 32, 1>}, {pipeline_mode = #tpu.pipeline_mode<synchronous>, transform_indices = @transform_3, window_bounds = array<i64: 32, 9>}, {pipeline_mode = #tpu.pipeline_mode<synchronous>, transform_indices = @transform_4, window_bounds = array<i64: 32, 1>}, {pipeline_mode = #tpu.pipeline_mode<synchronous>, transform_indices = @transform_5, window_bounds = array<i64: 4, 32>}, {pipeline_mode = #tpu.pipeline_mode<synchronous>, transform_indices = @transform_6, window_bounds = array<i64: 4, 1>}, {transform_indices = @transform_7, window_bounds = array<i64: 8, 256>}]} {
    %c0 = arith.constant 0 : index
    %c0_0 = arith.constant 0 : index
    %0 = vector.load %arg2[%c0, %c0_0] : memref<32x4xf32, #tpu.memory_space<vmem>>, vector<32x4xf32>
    %c0_1 = arith.constant 0 : index
    %c0_2 = arith.constant 0 : index
    %1 = vector.load %arg3[%c0_1, %c0_2] : memref<32x1xf32, #tpu.memory_space<vmem>>, vector<32x1xf32>
    %c0_3 = arith.constant 0 : index
    %c0_4 = arith.constant 0 : index
    %2 = vector.load %arg4[%c0_3, %c0_4] : memref<32x9xf32, #tpu.memory_space<vmem>>, vector<32x9xf32>
    %c0_5 = arith.constant 0 : index
    %c0_6 = arith.constant 0 : index
    %3 = vector.load %arg5[%c0_5, %c0_6] : memref<32x1xf32, #tpu.memory_space<vmem>>, vector<32x1xf32>
    %c0_7 = arith.constant 0 : index
    %c0_8 = arith.constant 0 : index
    %4 = vector.load %arg6[%c0_7, %c0_8] : memref<4x32xf32, #tpu.memory_space<vmem>>, vector<4x32xf32>
    %c0_9 = arith.constant 0 : index
    %c0_10 = arith.constant 0 : index
    %5 = vector.load %arg7[%c0_9, %c0_10] : memref<4x1xf32, #tpu.memory_space<vmem>>, vector<4x1xf32>
    %6 = tpu.iota {dimensions = array<i32: 1>} : vector<1x256xi32>
    %c15_i32 = arith.constant 15 : i32
    %7 = vector.broadcast %c15_i32 : i32 to vector<1x256xi32>
    %8 = arith.andi %6, %7 : vector<1x256xi32>
    %c16_i32 = arith.constant 16 : i32
    %9 = vector.broadcast %c16_i32 : i32 to vector<1x256xi32>
    %10 = arith.cmpi sge, %6, %9 : vector<1x256xi32>
    %c240_i32 = arith.constant 240 : i32
    %11 = vector.broadcast %c240_i32 : i32 to vector<1x256xi32>
    %12 = arith.cmpi slt, %6, %11 : vector<1x256xi32>
    %c1_i32 = arith.constant 1 : i32
    %13 = vector.broadcast %c1_i32 : i32 to vector<1x256xi32>
    %14 = arith.cmpi sge, %8, %13 : vector<1x256xi32>
    %c15_i32_11 = arith.constant 15 : i32
    %15 = vector.broadcast %c15_i32_11 : i32 to vector<1x256xi32>
    %16 = arith.cmpi slt, %8, %15 : vector<1x256xi32>
    %17 = arith.andi %10, %14 : vector<1x256xi1>
    %18 = vector.extract_strided_slice %2 {offsets = [0, 0], sizes = [32, 1], strides = [1, 1]} : vector<32x9xf32> to vector<32x1xf32>
    %19 = vector.extract_strided_slice %2 {offsets = [0, 1], sizes = [32, 1], strides = [1, 1]} : vector<32x9xf32> to vector<32x1xf32>
    %20 = arith.andi %10, %16 : vector<1x256xi1>
    %21 = vector.extract_strided_slice %2 {offsets = [0, 2], sizes = [32, 1], strides = [1, 1]} : vector<32x9xf32> to vector<32x1xf32>
    %22 = vector.extract_strided_slice %2 {offsets = [0, 3], sizes = [32, 1], strides = [1, 1]} : vector<32x9xf32> to vector<32x1xf32>
    %23 = vector.extract_strided_slice %2 {offsets = [0, 4], sizes = [32, 1], strides = [1, 1]} : vector<32x9xf32> to vector<32x1xf32>
    %24 = vector.extract_strided_slice %2 {offsets = [0, 5], sizes = [32, 1], strides = [1, 1]} : vector<32x9xf32> to vector<32x1xf32>
    %25 = arith.andi %12, %14 : vector<1x256xi1>
    %26 = vector.extract_strided_slice %2 {offsets = [0, 6], sizes = [32, 1], strides = [1, 1]} : vector<32x9xf32> to vector<32x1xf32>
    %27 = vector.extract_strided_slice %2 {offsets = [0, 7], sizes = [32, 1], strides = [1, 1]} : vector<32x9xf32> to vector<32x1xf32>
    %28 = arith.andi %12, %16 : vector<1x256xi1>
    %29 = vector.extract_strided_slice %2 {offsets = [0, 8], sizes = [32, 1], strides = [1, 1]} : vector<32x9xf32> to vector<32x1xf32>
    %c0_12 = arith.constant 0 : index
    %c0_13 = arith.constant 0 : index
    %30 = vector.load %arg1[%c0_12, %c0_13] : memref<8x256xf32, #tpu.memory_space<vmem>>, vector<8x256xf32>
    %31 = vector.extract_strided_slice %30 {offsets = [0, 0], sizes = [4, 256], strides = [1, 1]} : vector<8x256xf32> to vector<4x256xf32>
    %cst = arith.constant dense<0.000000e+00> : vector<32x256xf32>
    %32 = tpu.matmul %0, %31, %cst {dimension_numbers = #tpu.dot_dimension_numbers<[1], [0], [0], [1], [0, 0, 1, 1], [], []>} : vector<32x4xf32>, vector<4x256xf32>, vector<32x256xf32> -> vector<32x256xf32>
    %33 = vector.broadcast %1 : vector<32x1xf32> to vector<32x256xf32>
    %34 = arith.addf %32, %33 : vector<32x256xf32>
    %cst_14 = arith.constant 0.000000e+00 : f32
    %35 = vector.broadcast %cst_14 : f32 to vector<32x256xf32>
    %c17_i32 = arith.constant 17 : i32
    %36 = tpu.dynamic_rotate %34 by %c17_i32 dim 1 : vector<32x256xf32>, i32 -> vector<32x256xf32>
    %cst_15 = arith.constant 0.000000e+00 : f32
    %37 = vector.shape_cast %17 : vector<1x256xi1> to vector<1x256xi1>
    %38 = vector.broadcast %37 : vector<1x256xi1> to vector<32x256xi1>
    %39 = vector.broadcast %cst_15 : f32 to vector<32x256xf32>
    %40 = arith.select %38, %36, %39 : vector<32x256xi1>, vector<32x256xf32>
    %41 = vector.broadcast %18 : vector<32x1xf32> to vector<32x256xf32>
    %42 = arith.mulf %40, %41 : vector<32x256xf32>
    %43 = arith.addf %35, %42 : vector<32x256xf32>
    %c16_i32_16 = arith.constant 16 : i32
    %44 = tpu.dynamic_rotate %34 by %c16_i32_16 dim 1 : vector<32x256xf32>, i32 -> vector<32x256xf32>
    %cst_17 = arith.constant 0.000000e+00 : f32
    %45 = vector.shape_cast %10 : vector<1x256xi1> to vector<1x256xi1>
    %46 = vector.broadcast %45 : vector<1x256xi1> to vector<32x256xi1>
    %47 = vector.broadcast %cst_17 : f32 to vector<32x256xf32>
    %48 = arith.select %46, %44, %47 : vector<32x256xi1>, vector<32x256xf32>
    %49 = vector.broadcast %19 : vector<32x1xf32> to vector<32x256xf32>
    %50 = arith.mulf %48, %49 : vector<32x256xf32>
    %51 = arith.addf %43, %50 : vector<32x256xf32>
    %c15_i32_18 = arith.constant 15 : i32
    %52 = tpu.dynamic_rotate %34 by %c15_i32_18 dim 1 : vector<32x256xf32>, i32 -> vector<32x256xf32>
    %cst_19 = arith.constant 0.000000e+00 : f32
    %53 = vector.shape_cast %20 : vector<1x256xi1> to vector<1x256xi1>
    %54 = vector.broadcast %53 : vector<1x256xi1> to vector<32x256xi1>
    %55 = vector.broadcast %cst_19 : f32 to vector<32x256xf32>
    %56 = arith.select %54, %52, %55 : vector<32x256xi1>, vector<32x256xf32>
    %57 = vector.broadcast %21 : vector<32x1xf32> to vector<32x256xf32>
    %58 = arith.mulf %56, %57 : vector<32x256xf32>
    %59 = arith.addf %51, %58 : vector<32x256xf32>
    %c1_i32_20 = arith.constant 1 : i32
    %60 = tpu.dynamic_rotate %34 by %c1_i32_20 dim 1 : vector<32x256xf32>, i32 -> vector<32x256xf32>
    %cst_21 = arith.constant 0.000000e+00 : f32
    %61 = vector.shape_cast %14 : vector<1x256xi1> to vector<1x256xi1>
    %62 = vector.broadcast %61 : vector<1x256xi1> to vector<32x256xi1>
    %63 = vector.broadcast %cst_21 : f32 to vector<32x256xf32>
    %64 = arith.select %62, %60, %63 : vector<32x256xi1>, vector<32x256xf32>
    %65 = vector.broadcast %22 : vector<32x1xf32> to vector<32x256xf32>
    %66 = arith.mulf %64, %65 : vector<32x256xf32>
    %67 = arith.addf %59, %66 : vector<32x256xf32>
    %68 = vector.broadcast %23 : vector<32x1xf32> to vector<32x256xf32>
    %69 = arith.mulf %34, %68 : vector<32x256xf32>
    %70 = arith.addf %67, %69 : vector<32x256xf32>
    %c255_i32 = arith.constant 255 : i32
    %71 = tpu.dynamic_rotate %34 by %c255_i32 dim 1 : vector<32x256xf32>, i32 -> vector<32x256xf32>
    %cst_22 = arith.constant 0.000000e+00 : f32
    %72 = vector.shape_cast %16 : vector<1x256xi1> to vector<1x256xi1>
    %73 = vector.broadcast %72 : vector<1x256xi1> to vector<32x256xi1>
    %74 = vector.broadcast %cst_22 : f32 to vector<32x256xf32>
    %75 = arith.select %73, %71, %74 : vector<32x256xi1>, vector<32x256xf32>
    %76 = vector.broadcast %24 : vector<32x1xf32> to vector<32x256xf32>
    %77 = arith.mulf %75, %76 : vector<32x256xf32>
    %78 = arith.addf %70, %77 : vector<32x256xf32>
    %c241_i32 = arith.constant 241 : i32
    %79 = tpu.dynamic_rotate %34 by %c241_i32 dim 1 : vector<32x256xf32>, i32 -> vector<32x256xf32>
    %cst_23 = arith.constant 0.000000e+00 : f32
    %80 = vector.shape_cast %25 : vector<1x256xi1> to vector<1x256xi1>
    %81 = vector.broadcast %80 : vector<1x256xi1> to vector<32x256xi1>
    %82 = vector.broadcast %cst_23 : f32 to vector<32x256xf32>
    %83 = arith.select %81, %79, %82 : vector<32x256xi1>, vector<32x256xf32>
    %84 = vector.broadcast %26 : vector<32x1xf32> to vector<32x256xf32>
    %85 = arith.mulf %83, %84 : vector<32x256xf32>
    %86 = arith.addf %78, %85 : vector<32x256xf32>
    %c240_i32_24 = arith.constant 240 : i32
    %87 = tpu.dynamic_rotate %34 by %c240_i32_24 dim 1 : vector<32x256xf32>, i32 -> vector<32x256xf32>
    %cst_25 = arith.constant 0.000000e+00 : f32
    %88 = vector.shape_cast %12 : vector<1x256xi1> to vector<1x256xi1>
    %89 = vector.broadcast %88 : vector<1x256xi1> to vector<32x256xi1>
    %90 = vector.broadcast %cst_25 : f32 to vector<32x256xf32>
    %91 = arith.select %89, %87, %90 : vector<32x256xi1>, vector<32x256xf32>
    %92 = vector.broadcast %27 : vector<32x1xf32> to vector<32x256xf32>
    %93 = arith.mulf %91, %92 : vector<32x256xf32>
    %94 = arith.addf %86, %93 : vector<32x256xf32>
    %c239_i32 = arith.constant 239 : i32
    %95 = tpu.dynamic_rotate %34 by %c239_i32 dim 1 : vector<32x256xf32>, i32 -> vector<32x256xf32>
    %cst_26 = arith.constant 0.000000e+00 : f32
    %96 = vector.shape_cast %28 : vector<1x256xi1> to vector<1x256xi1>
    %97 = vector.broadcast %96 : vector<1x256xi1> to vector<32x256xi1>
    %98 = vector.broadcast %cst_26 : f32 to vector<32x256xf32>
    %99 = arith.select %97, %95, %98 : vector<32x256xi1>, vector<32x256xf32>
    %100 = vector.broadcast %29 : vector<32x1xf32> to vector<32x256xf32>
    %101 = arith.mulf %99, %100 : vector<32x256xf32>
    %102 = arith.addf %94, %101 : vector<32x256xf32>
    %103 = vector.broadcast %3 : vector<32x1xf32> to vector<32x256xf32>
    %104 = arith.addf %102, %103 : vector<32x256xf32>
    %cst_27 = arith.constant 5.000000e-01 : f32
    %105 = vector.broadcast %cst_27 : f32 to vector<32x256xf32>
    %106 = arith.mulf %105, %104 : vector<32x256xf32>
    %cst_28 = arith.constant 0.707106769 : f32
    %107 = vector.broadcast %cst_28 : f32 to vector<32x256xf32>
    %108 = arith.mulf %104, %107 : vector<32x256xf32>
    %109 = math.absf %108 : vector<32x256xf32>
    %cst_29 = arith.constant 0.327591091 : f32
    %110 = vector.broadcast %cst_29 : f32 to vector<32x256xf32>
    %111 = arith.mulf %110, %109 : vector<32x256xf32>
    %cst_30 = arith.constant 1.000000e+00 : f32
    %112 = vector.broadcast %cst_30 : f32 to vector<32x256xf32>
    %113 = arith.addf %112, %111 : vector<32x256xf32>
    %114 = tpu.reciprocal %113 {approx = true} : vector<32x256xf32> -> vector<32x256xf32>
    %115 = arith.mulf %113, %114 : vector<32x256xf32>
    %cst_31 = arith.constant 2.000000e+00 : f32
    %116 = vector.broadcast %cst_31 : f32 to vector<32x256xf32>
    %117 = arith.subf %116, %115 : vector<32x256xf32>
    %118 = arith.mulf %114, %117 : vector<32x256xf32>
    %cst_32 = arith.constant 1.06140542 : f32
    %119 = vector.broadcast %cst_32 : f32 to vector<32x256xf32>
    %120 = arith.mulf %118, %119 : vector<32x256xf32>
    %cst_33 = arith.constant -1.45315206 : f32
    %121 = vector.broadcast %cst_33 : f32 to vector<32x256xf32>
    %122 = arith.addf %121, %120 : vector<32x256xf32>
    %123 = arith.mulf %118, %122 : vector<32x256xf32>
    %cst_34 = arith.constant 1.42141378 : f32
    %124 = vector.broadcast %cst_34 : f32 to vector<32x256xf32>
    %125 = arith.addf %124, %123 : vector<32x256xf32>
    %126 = arith.mulf %118, %125 : vector<32x256xf32>
    %cst_35 = arith.constant -0.284496725 : f32
    %127 = vector.broadcast %cst_35 : f32 to vector<32x256xf32>
    %128 = arith.addf %127, %126 : vector<32x256xf32>
    %129 = arith.mulf %118, %128 : vector<32x256xf32>
    %cst_36 = arith.constant 0.254829586 : f32
    %130 = vector.broadcast %cst_36 : f32 to vector<32x256xf32>
    %131 = arith.addf %130, %129 : vector<32x256xf32>
    %132 = arith.mulf %118, %131 : vector<32x256xf32>
    %133 = arith.mulf %109, %109 : vector<32x256xf32>
    %cst_37 = arith.constant 0.000000e+00 : f32
    %134 = vector.broadcast %cst_37 : f32 to vector<32x256xf32>
    %135 = arith.subf %134, %133 : vector<32x256xf32>
    %136 = math.exp %135 : vector<32x256xf32>
    %137 = arith.mulf %132, %136 : vector<32x256xf32>
    %cst_38 = arith.constant 1.000000e+00 : f32
    %138 = vector.broadcast %cst_38 : f32 to vector<32x256xf32>
    %139 = arith.subf %138, %137 : vector<32x256xf32>
    %cst_39 = arith.constant 0.000000e+00 : f32
    %140 = vector.broadcast %cst_39 : f32 to vector<32x256xf32>
    %141 = arith.cmpf olt, %108, %140 : vector<32x256xf32>
    %cst_40 = arith.constant 0.000000e+00 : f32
    %142 = vector.broadcast %cst_40 : f32 to vector<32x256xf32>
    %143 = arith.subf %142, %139 : vector<32x256xf32>
    %144 = arith.select %141, %143, %139 : vector<32x256xi1>, vector<32x256xf32>
    %cst_41 = arith.constant 1.000000e+00 : f32
    %145 = vector.broadcast %cst_41 : f32 to vector<32x256xf32>
    %146 = arith.addf %145, %144 : vector<32x256xf32>
    %147 = arith.mulf %106, %146 : vector<32x256xf32>
    %cst_42 = arith.constant dense<0.000000e+00> : vector<4x256xf32>
    %148 = tpu.matmul %4, %147, %cst_42 {dimension_numbers = #tpu.dot_dimension_numbers<[1], [0], [0], [1], [0, 0, 1, 1], [], []>} : vector<4x32xf32>, vector<32x256xf32>, vector<4x256xf32> -> vector<4x256xf32>
    %149 = vector.broadcast %5 : vector<4x1xf32> to vector<4x256xf32>
    %150 = arith.addf %148, %149 : vector<4x256xf32>
    %151 = vector.extract_strided_slice %30 {offsets = [4, 0], sizes = [4, 256], strides = [1, 1]} : vector<8x256xf32> to vector<4x256xf32>
    %cst_43 = arith.constant dense<0.000000e+00> : vector<32x256xf32>
    %152 = tpu.matmul %0, %151, %cst_43 {dimension_numbers = #tpu.dot_dimension_numbers<[1], [0], [0], [1], [0, 0, 1, 1], [], []>} : vector<32x4xf32>, vector<4x256xf32>, vector<32x256xf32> -> vector<32x256xf32>
    %153 = vector.broadcast %1 : vector<32x1xf32> to vector<32x256xf32>
    %154 = arith.addf %152, %153 : vector<32x256xf32>
    %cst_44 = arith.constant 0.000000e+00 : f32
    %155 = vector.broadcast %cst_44 : f32 to vector<32x256xf32>
    %c17_i32_45 = arith.constant 17 : i32
    %156 = tpu.dynamic_rotate %154 by %c17_i32_45 dim 1 : vector<32x256xf32>, i32 -> vector<32x256xf32>
    %cst_46 = arith.constant 0.000000e+00 : f32
    %157 = vector.shape_cast %17 : vector<1x256xi1> to vector<1x256xi1>
    %158 = vector.broadcast %157 : vector<1x256xi1> to vector<32x256xi1>
    %159 = vector.broadcast %cst_46 : f32 to vector<32x256xf32>
    %160 = arith.select %158, %156, %159 : vector<32x256xi1>, vector<32x256xf32>
    %161 = vector.broadcast %18 : vector<32x1xf32> to vector<32x256xf32>
    %162 = arith.mulf %160, %161 : vector<32x256xf32>
    %163 = arith.addf %155, %162 : vector<32x256xf32>
    %c16_i32_47 = arith.constant 16 : i32
    %164 = tpu.dynamic_rotate %154 by %c16_i32_47 dim 1 : vector<32x256xf32>, i32 -> vector<32x256xf32>
    %cst_48 = arith.constant 0.000000e+00 : f32
    %165 = vector.shape_cast %10 : vector<1x256xi1> to vector<1x256xi1>
    %166 = vector.broadcast %165 : vector<1x256xi1> to vector<32x256xi1>
    %167 = vector.broadcast %cst_48 : f32 to vector<32x256xf32>
    %168 = arith.select %166, %164, %167 : vector<32x256xi1>, vector<32x256xf32>
    %169 = vector.broadcast %19 : vector<32x1xf32> to vector<32x256xf32>
    %170 = arith.mulf %168, %169 : vector<32x256xf32>
    %171 = arith.addf %163, %170 : vector<32x256xf32>
    %c15_i32_49 = arith.constant 15 : i32
    %172 = tpu.dynamic_rotate %154 by %c15_i32_49 dim 1 : vector<32x256xf32>, i32 -> vector<32x256xf32>
    %cst_50 = arith.constant 0.000000e+00 : f32
    %173 = vector.shape_cast %20 : vector<1x256xi1> to vector<1x256xi1>
    %174 = vector.broadcast %173 : vector<1x256xi1> to vector<32x256xi1>
    %175 = vector.broadcast %cst_50 : f32 to vector<32x256xf32>
    %176 = arith.select %174, %172, %175 : vector<32x256xi1>, vector<32x256xf32>
    %177 = vector.broadcast %21 : vector<32x1xf32> to vector<32x256xf32>
    %178 = arith.mulf %176, %177 : vector<32x256xf32>
    %179 = arith.addf %171, %178 : vector<32x256xf32>
    %c1_i32_51 = arith.constant 1 : i32
    %180 = tpu.dynamic_rotate %154 by %c1_i32_51 dim 1 : vector<32x256xf32>, i32 -> vector<32x256xf32>
    %cst_52 = arith.constant 0.000000e+00 : f32
    %181 = vector.shape_cast %14 : vector<1x256xi1> to vector<1x256xi1>
    %182 = vector.broadcast %181 : vector<1x256xi1> to vector<32x256xi1>
    %183 = vector.broadcast %cst_52 : f32 to vector<32x256xf32>
    %184 = arith.select %182, %180, %183 : vector<32x256xi1>, vector<32x256xf32>
    %185 = vector.broadcast %22 : vector<32x1xf32> to vector<32x256xf32>
    %186 = arith.mulf %184, %185 : vector<32x256xf32>
    %187 = arith.addf %179, %186 : vector<32x256xf32>
    %188 = vector.broadcast %23 : vector<32x1xf32> to vector<32x256xf32>
    %189 = arith.mulf %154, %188 : vector<32x256xf32>
    %190 = arith.addf %187, %189 : vector<32x256xf32>
    %c255_i32_53 = arith.constant 255 : i32
    %191 = tpu.dynamic_rotate %154 by %c255_i32_53 dim 1 : vector<32x256xf32>, i32 -> vector<32x256xf32>
    %cst_54 = arith.constant 0.000000e+00 : f32
    %192 = vector.shape_cast %16 : vector<1x256xi1> to vector<1x256xi1>
    %193 = vector.broadcast %192 : vector<1x256xi1> to vector<32x256xi1>
    %194 = vector.broadcast %cst_54 : f32 to vector<32x256xf32>
    %195 = arith.select %193, %191, %194 : vector<32x256xi1>, vector<32x256xf32>
    %196 = vector.broadcast %24 : vector<32x1xf32> to vector<32x256xf32>
    %197 = arith.mulf %195, %196 : vector<32x256xf32>
    %198 = arith.addf %190, %197 : vector<32x256xf32>
    %c241_i32_55 = arith.constant 241 : i32
    %199 = tpu.dynamic_rotate %154 by %c241_i32_55 dim 1 : vector<32x256xf32>, i32 -> vector<32x256xf32>
    %cst_56 = arith.constant 0.000000e+00 : f32
    %200 = vector.shape_cast %25 : vector<1x256xi1> to vector<1x256xi1>
    %201 = vector.broadcast %200 : vector<1x256xi1> to vector<32x256xi1>
    %202 = vector.broadcast %cst_56 : f32 to vector<32x256xf32>
    %203 = arith.select %201, %199, %202 : vector<32x256xi1>, vector<32x256xf32>
    %204 = vector.broadcast %26 : vector<32x1xf32> to vector<32x256xf32>
    %205 = arith.mulf %203, %204 : vector<32x256xf32>
    %206 = arith.addf %198, %205 : vector<32x256xf32>
    %c240_i32_57 = arith.constant 240 : i32
    %207 = tpu.dynamic_rotate %154 by %c240_i32_57 dim 1 : vector<32x256xf32>, i32 -> vector<32x256xf32>
    %cst_58 = arith.constant 0.000000e+00 : f32
    %208 = vector.shape_cast %12 : vector<1x256xi1> to vector<1x256xi1>
    %209 = vector.broadcast %208 : vector<1x256xi1> to vector<32x256xi1>
    %210 = vector.broadcast %cst_58 : f32 to vector<32x256xf32>
    %211 = arith.select %209, %207, %210 : vector<32x256xi1>, vector<32x256xf32>
    %212 = vector.broadcast %27 : vector<32x1xf32> to vector<32x256xf32>
    %213 = arith.mulf %211, %212 : vector<32x256xf32>
    %214 = arith.addf %206, %213 : vector<32x256xf32>
    %c239_i32_59 = arith.constant 239 : i32
    %215 = tpu.dynamic_rotate %154 by %c239_i32_59 dim 1 : vector<32x256xf32>, i32 -> vector<32x256xf32>
    %cst_60 = arith.constant 0.000000e+00 : f32
    %216 = vector.shape_cast %28 : vector<1x256xi1> to vector<1x256xi1>
    %217 = vector.broadcast %216 : vector<1x256xi1> to vector<32x256xi1>
    %218 = vector.broadcast %cst_60 : f32 to vector<32x256xf32>
    %219 = arith.select %217, %215, %218 : vector<32x256xi1>, vector<32x256xf32>
    %220 = vector.broadcast %29 : vector<32x1xf32> to vector<32x256xf32>
    %221 = arith.mulf %219, %220 : vector<32x256xf32>
    %222 = arith.addf %214, %221 : vector<32x256xf32>
    %223 = vector.broadcast %3 : vector<32x1xf32> to vector<32x256xf32>
    %224 = arith.addf %222, %223 : vector<32x256xf32>
    %cst_61 = arith.constant 5.000000e-01 : f32
    %225 = vector.broadcast %cst_61 : f32 to vector<32x256xf32>
    %226 = arith.mulf %225, %224 : vector<32x256xf32>
    %cst_62 = arith.constant 0.707106769 : f32
    %227 = vector.broadcast %cst_62 : f32 to vector<32x256xf32>
    %228 = arith.mulf %224, %227 : vector<32x256xf32>
    %229 = math.absf %228 : vector<32x256xf32>
    %cst_63 = arith.constant 0.327591091 : f32
    %230 = vector.broadcast %cst_63 : f32 to vector<32x256xf32>
    %231 = arith.mulf %230, %229 : vector<32x256xf32>
    %cst_64 = arith.constant 1.000000e+00 : f32
    %232 = vector.broadcast %cst_64 : f32 to vector<32x256xf32>
    %233 = arith.addf %232, %231 : vector<32x256xf32>
    %234 = tpu.reciprocal %233 {approx = true} : vector<32x256xf32> -> vector<32x256xf32>
    %235 = arith.mulf %233, %234 : vector<32x256xf32>
    %cst_65 = arith.constant 2.000000e+00 : f32
    %236 = vector.broadcast %cst_65 : f32 to vector<32x256xf32>
    %237 = arith.subf %236, %235 : vector<32x256xf32>
    %238 = arith.mulf %234, %237 : vector<32x256xf32>
    %cst_66 = arith.constant 1.06140542 : f32
    %239 = vector.broadcast %cst_66 : f32 to vector<32x256xf32>
    %240 = arith.mulf %238, %239 : vector<32x256xf32>
    %cst_67 = arith.constant -1.45315206 : f32
    %241 = vector.broadcast %cst_67 : f32 to vector<32x256xf32>
    %242 = arith.addf %241, %240 : vector<32x256xf32>
    %243 = arith.mulf %238, %242 : vector<32x256xf32>
    %cst_68 = arith.constant 1.42141378 : f32
    %244 = vector.broadcast %cst_68 : f32 to vector<32x256xf32>
    %245 = arith.addf %244, %243 : vector<32x256xf32>
    %246 = arith.mulf %238, %245 : vector<32x256xf32>
    %cst_69 = arith.constant -0.284496725 : f32
    %247 = vector.broadcast %cst_69 : f32 to vector<32x256xf32>
    %248 = arith.addf %247, %246 : vector<32x256xf32>
    %249 = arith.mulf %238, %248 : vector<32x256xf32>
    %cst_70 = arith.constant 0.254829586 : f32
    %250 = vector.broadcast %cst_70 : f32 to vector<32x256xf32>
    %251 = arith.addf %250, %249 : vector<32x256xf32>
    %252 = arith.mulf %238, %251 : vector<32x256xf32>
    %253 = arith.mulf %229, %229 : vector<32x256xf32>
    %cst_71 = arith.constant 0.000000e+00 : f32
    %254 = vector.broadcast %cst_71 : f32 to vector<32x256xf32>
    %255 = arith.subf %254, %253 : vector<32x256xf32>
    %256 = math.exp %255 : vector<32x256xf32>
    %257 = arith.mulf %252, %256 : vector<32x256xf32>
    %cst_72 = arith.constant 1.000000e+00 : f32
    %258 = vector.broadcast %cst_72 : f32 to vector<32x256xf32>
    %259 = arith.subf %258, %257 : vector<32x256xf32>
    %cst_73 = arith.constant 0.000000e+00 : f32
    %260 = vector.broadcast %cst_73 : f32 to vector<32x256xf32>
    %261 = arith.cmpf olt, %228, %260 : vector<32x256xf32>
    %cst_74 = arith.constant 0.000000e+00 : f32
    %262 = vector.broadcast %cst_74 : f32 to vector<32x256xf32>
    %263 = arith.subf %262, %259 : vector<32x256xf32>
    %264 = arith.select %261, %263, %259 : vector<32x256xi1>, vector<32x256xf32>
    %cst_75 = arith.constant 1.000000e+00 : f32
    %265 = vector.broadcast %cst_75 : f32 to vector<32x256xf32>
    %266 = arith.addf %265, %264 : vector<32x256xf32>
    %267 = arith.mulf %226, %266 : vector<32x256xf32>
    %cst_76 = arith.constant dense<0.000000e+00> : vector<4x256xf32>
    %268 = tpu.matmul %4, %267, %cst_76 {dimension_numbers = #tpu.dot_dimension_numbers<[1], [0], [0], [1], [0, 0, 1, 1], [], []>} : vector<4x32xf32>, vector<32x256xf32>, vector<4x256xf32> -> vector<4x256xf32>
    %269 = vector.broadcast %5 : vector<4x1xf32> to vector<4x256xf32>
    %270 = arith.addf %268, %269 : vector<4x256xf32>
    %271 = tpu.concatenate %150, %270 in 0 : vector<4x256xf32>, vector<4x256xf32> -> vector<8x256xf32>
    %c0_77 = arith.constant 0 : index
    %c0_78 = arith.constant 0 : index
    %272 = vector.load %arg8[%c0_77, %c0_78] : memref<8x256xf32, #tpu.memory_space<vmem>>, vector<8x256xf32>
    tpu.vector_store %arg8[%c0_77, %c0_78], %271 {strides = array<i32>} : memref<8x256xf32, #tpu.memory_space<vmem>>, vector<8x256xf32>,
    return
  }
  func.func @transform_0(%arg0: i32) -> (i32, i32) {
    %c0_i32 = arith.constant 0 : i32
    %c0_i32_0 = arith.constant 0 : i32
    return %arg0, %c0_i32 : i32, i32
  }
  func.func @transform_1(%arg0: i32) -> (i32, i32) {
    %c0_i32 = arith.constant 0 : i32
    %c0_i32_0 = arith.constant 0 : i32
    %c0_i32_1 = arith.constant 0 : i32
    return %c0_i32, %c0_i32_0 : i32, i32
  }
  func.func @transform_2(%arg0: i32) -> (i32, i32) {
    %c0_i32 = arith.constant 0 : i32
    %c0_i32_0 = arith.constant 0 : i32
    %c0_i32_1 = arith.constant 0 : i32
    return %c0_i32, %c0_i32_0 : i32, i32
  }
  func.func @transform_3(%arg0: i32) -> (i32, i32) {
    %c0_i32 = arith.constant 0 : i32
    %c0_i32_0 = arith.constant 0 : i32
    %c0_i32_1 = arith.constant 0 : i32
    return %c0_i32, %c0_i32_0 : i32, i32
  }
  func.func @transform_4(%arg0: i32) -> (i32, i32) {
    %c0_i32 = arith.constant 0 : i32
    %c0_i32_0 = arith.constant 0 : i32
    %c0_i32_1 = arith.constant 0 : i32
    return %c0_i32, %c0_i32_0 : i32, i32
  }
  func.func @transform_5(%arg0: i32) -> (i32, i32) {
    %c0_i32 = arith.constant 0 : i32
    %c0_i32_0 = arith.constant 0 : i32
    %c0_i32_1 = arith.constant 0 : i32
    return %c0_i32, %c0_i32_0 : i32, i32
  }
  func.func @transform_6(%arg0: i32) -> (i32, i32) {
    %c0_i32 = arith.constant 0 : i32
    %c0_i32_0 = arith.constant 0 : i32
    %c0_i32_1 = arith.constant 0 : i32
    return %c0_i32, %c0_i32_0 : i32, i32
  }
  func.func @transform_7(%arg0: i32) -> (i32, i32) {
    %c0_i32 = arith.constant 0 : i32
    %c0_i32_0 = arith.constant 0 : i32
    return %arg0, %c0_i32 : i32, i32
  }
}

</mosaic_0001>

<bundles_post_ra>
// kernel: _lambda_.1
= control target key start
LH: loop header
LB: loop body
LE: loop exit
PB: predicated region body
PF: predicated region fallthrough
CT: control target
= control target key end

     0   :  { %vm3954_vm0 = vcmask 1043456   ;;  %v3928_v2 = vmov 0.0   ;;  %vm3953_vm1 = vcmask 31744   ;;  %v2092_v4 = vmov 1   ;;  %s2101_s8 = smov 16   ;;  %s2102_s9 = smov 17   ;;  %s3920_s0 = inlined_call_operand.vmem [shape: f32[8,256], index: 0, kind: input, shape index: {}]   ;;  %s3921_s1 = inlined_call_operand.vmem [shape: f32[32,4], index: 1, kind: input, shape index: {}]   ;;  %s3922_s3 = inlined_call_operand.vmem [shape: f32[32,9], index: 3, kind: input, shape index: {}]   ;;  %s3923_s2 = inlined_call_operand.vmem [shape: f32[32,1], index: 2, kind: input, shape index: {}, may-alias: {2,4}]   ;;  %s3924_s4 = inlined_call_operand.vmem [shape: f32[32,1], index: 4, kind: input, shape index: {}, may-alias: {2,4}]   ;;  %s3925_s5 = inlined_call_operand.vmem [shape: f32[4,32], index: 5, kind: input, shape index: {}]   ;;  %s3926_s6 = inlined_call_operand.vmem [shape: f32[4,1], index: 6, kind: input, shape index: {}]   ;;  %s3927_s7 = inlined_call_operand.vmem [shape: f32[8,256], index: 7, kind: output, shape index: {}]  }
   0x1   :  { %v66_v0 = vld [vmem:[%s3920_s0 + $0x8] sm:$0xff]  ;;  %v65_v1 = vld [vmem:[%s3920_s0] sm:$0xff]  ;;  %171 = vmatprep.mubr.f32.mxu0 %v3928_v2  ;;  %1993 = vset.pattern.permute.xlu0 %v2092_v4  ;;  %v2172_v6 = vld [vmem:[%s3922_s3 + $0x10] sm:$0xff]  ;;  %v2093_v7 = vmov 0   ;;  %v2094_v13 = vmov 2   ;;  %v2095_v15 = vmov 3  }
   0x2   :  { %v26_v3 = vld [vmem:[%s3921_s1] sm:$0xff]  ;;  %1944 = vmatprep.subr.msk.mxu0 %vm3954_vm0, %v66_v0  ;;  %1117 = vmatprep.mubr.f32.mxu1 %v3928_v2  ;;  %v32_v8 = vld [vmem:[%s3923_s2 + $0x10] sm:$0xff]  ;;  %v27_v9 = vld [vmem:[%s3921_s1 + $0x8] sm:$0xff]  ;;  %v2096_v16 = vmov 4   ;;  %v2097_v18 = vmov 5   ;;  %v2098_v19 = vmov 6  }
   0x3   :  { %v2163_v5 = vld [vmem:[%s3922_s3] sm:$0xff]  ;;  %1945 = vmatpush1.msk.msra.mxu0 %vm3954_vm0, %v65_v1  ;;  %1992 = vset.pattern.permute.xlu1 %v2093_v7  ;;  %v33_v10 = vld [vmem:[%s3923_s2 + $0x18] sm:$0xff]  ;;  %v28_v11 = vld [vmem:[%s3921_s1 + $0x10] sm:$0xff]  ;;  %v2099_v20 = vmov 7   ;;  %v2100_v21 = vmov 8   ;;  %s2103_s10 = smov 1  }
   0x4   :  { %307 = vperm.xlu0 %1993, %v2163_v5   ;;  %1946 = vmatmul.mubr.msk.f32.vlgmr.msra.gmra.mrb[0].mxu0 %vm3953_vm1, %v26_v3  ;;  %v35_v12 = vld [vmem:[%s3922_s3 + $0x8] sm:$0xff]  ;;  %v29_v14 = vld [vmem:[%s3921_s1 + $0x18] sm:$0xff]  ;;  %v30_v22 = vld [vmem:[%s3923_s2] sm:$0xff]  ;;  %s2104_s11 = smov 15   ;;  %s2105_s12 = smov 127  }
   0x5   :  { %177 = vmatprep.mubr.f32.mxu0 %v3928_v2  ;;  %79 = vperm.xlu1 %1992, %v32_v8   ;;  %v37_v17 = vld [vmem:[%s3922_s3 + $0x18] sm:$0xff]  ;;  %v31_v23 = vld [vmem:[%s3923_s2 + $0x8] sm:$0xff]  ;;  %v38_v24 = vld [vmem:[%s3924_s4] sm:$0xff]  ;;  %s2106_s13 = smov 113   ;;  %s2107_s14 = smov 111  }
   0x6   :  { %v39_v25 = vld [vmem:[%s3924_s4 + $0x8] sm:$0xff]  ;;  %s2108_s15 = smov 112  }
   0x8   :  { %315 = vperm.xlu0 %1993, %v2172_v6   ;;  %1947 = vmatmul.mubr.msk.f32.gmra.mrb[2].mxu0 %vm3953_vm1, %v27_v9 }
   0x9   :  { %183 = vmatprep.mubr.f32.mxu0 %v3928_v2  ;;  %84 = vperm.xlu1 %1992, %v33_v10  }
   0xc   :  { %1997 = vset.pattern.permute.xlu0 %v2094_v13  ;;  %1948 = vmatmul.mubr.msk.f32.gmra.mrb[4].mxu0 %vm3953_vm1, %v28_v11 }
   0xd   :  { %380 = vperm.xlu0 %1997, %v35_v12   ;;  %189 = vmatprep.mubr.f32.mxu0 %v3928_v2 }
   0xe   :  { %240 = vperm.xlu1 %1992, %v35_v12  }
  0x10   :  { %1949 = vmatmul.mubr.msk.f32.gmra.mrb[6].mxu0 %vm3953_vm1, %v29_v14 }
  0x11   :  { %384 = vperm.xlu0 %1997, %v2172_v6   ;;  %1923 = vmatprep.mubr.f32.mxu0 %v3928_v2 }
  0x12   :  { %1994 = vset.pattern.permute.xlu1 %v2092_v4 }
  0x13   :  { %311 = vperm.xlu1 %1994, %v35_v12  }
  0x15   :  { %2000 = vset.pattern.permute.xlu0 %v2095_v15 }
  0x16   :  { %449 = vperm.xlu0 %2000, %v35_v12  }
  0x17   :  { %1995 = vset.pattern.permute.xlu1 %v2094_v13 }
  0x18   :  { %376 = vperm.xlu1 %1995, %v2163_v5  }
  0x1a   :  { %453 = vperm.xlu0 %2000, %v2172_v6  }
  0x1c   :  { %1996 = vset.pattern.permute.xlu1 %v2093_v7 }
  0x1d   :  { %245 = vperm.xlu1 %1996, %v2172_v6  }
  0x1e   :  { %2003 = vset.pattern.permute.xlu0 %v2096_v16 }
  0x1f   :  { %481 = vperm.xlu0 %2003, %v35_v12  }
  0x21   :  { %250 = vperm.xlu1 %1996, %v37_v17  }
  0x23   :  { %485 = vperm.xlu0 %2003, %v2172_v6  }
  0x25   :  { %1998 = vset.pattern.permute.xlu1 %v2092_v4 }
  0x26   :  { %319 = vperm.xlu1 %1998, %v37_v17  }
  0x27   :  { %2006 = vset.pattern.permute.xlu0 %v2097_v18 }
  0x28   :  { %550 = vperm.xlu0 %2006, %v35_v12  }
  0x2a   :  { %1999 = vset.pattern.permute.xlu1 %v2095_v15 }
  0x2b   :  { %445 = vperm.xlu1 %1999, %v2163_v5  }
  0x2c   :  { %554 = vperm.xlu0 %2006, %v2172_v6  }
  0x2f   :  { %2001 = vset.pattern.permute.xlu1 %v2094_v13 }
  0x30   :  { %2009 = vset.pattern.permute.xlu0 %v2098_v19  ;;  %388 = vperm.xlu1 %2001, %v37_v17  }
  0x31   :  { %619 = vperm.xlu0 %2009, %v35_v12  }
  0x34   :  { %2002 = vset.pattern.permute.xlu1 %v2096_v16 }
  0x35   :  { %623 = vperm.xlu0 %2009, %v2172_v6   ;;  %477 = vperm.xlu1 %2002, %v2163_v5  }
  0x39   :  { %2012 = vset.pattern.permute.xlu0 %v2099_v20  ;;  %2004 = vset.pattern.permute.xlu1 %v2095_v15 }
  0x3a   :  { %688 = vperm.xlu0 %2012, %v35_v12   ;;  %457 = vperm.xlu1 %2004, %v37_v17  }
  0x3e   :  { %692 = vperm.xlu0 %2012, %v2172_v6   ;;  %2005 = vset.pattern.permute.xlu1 %v2097_v18 }
  0x3f   :  { %546 = vperm.xlu1 %2005, %v2163_v5  }
  0x42   :  { %2015 = vset.pattern.permute.xlu0 %v2100_v21 }
  0x43   :  { %757 = vperm.xlu0 %2015, %v35_v12   ;;  %2007 = vset.pattern.permute.xlu1 %v2096_v16 }
  0x44   :  { %489 = vperm.xlu1 %2007, %v37_v17  }
  0x47   :  { %765 = vperm.xlu0 %2015, %v37_v17  }
  0x48   :  { %2008 = vset.pattern.permute.xlu1 %v2098_v19 }
  0x49   :  { %615 = vperm.xlu1 %2008, %v2163_v5  }
  0x4b   :  { %2018 = vset.pattern.permute.xlu0 %v2093_v7 }
  0x4c   :  { %69 = vperm.xlu0 %2018, %v30_v22  }
  0x4d   :  { %2010 = vset.pattern.permute.xlu1 %v2097_v18 }
  0x4e   :  { %558 = vperm.xlu1 %2010, %v37_v17  }
  0x50   :  { %74 = vperm.xlu0 %2018, %v31_v23  }
  0x52   :  { %2011 = vset.pattern.permute.xlu1 %v2099_v20 }
  0x53   :  { %684 = vperm.xlu1 %2011, %v2163_v5  }
  0x54   :  { %235 = vperm.xlu0 %2018, %v2163_v5  }
  0x57   :  { %2013 = vset.pattern.permute.xlu1 %v2098_v19 }
  0x58   :  { %627 = vperm.xlu1 %2013, %v37_v17  }
  0x5c   :  { %2014 = vset.pattern.permute.xlu1 %v2100_v21 }
  0x5d   :  { %753 = vperm.xlu1 %2014, %v2163_v5  }
  0x61   :  { %2016 = vset.pattern.permute.xlu1 %v2099_v20 }
  0x62   :  { %696 = vperm.xlu1 %2016, %v37_v17   ;;  %v40_v17 = vld [vmem:[%s3924_s4 + $0x10] sm:$0xff] }
  0x66   :  { %2017 = vset.pattern.permute.xlu1 %v2100_v21 }
  0x67   :  { %761 = vperm.xlu1 %2017, %v2172_v6  }
  0x6b   :  { %2019 = vset.pattern.permute.xlu1 %v2093_v7 }
  0x6c   :  { %786 = vperm.xlu1 %2019, %v38_v24  }
  0x70   :  { %791 = vperm.xlu1 %2019, %v39_v25  }
  0x83   :  { %v2235_v26 = vpop.permute.xlu0 %307 }
  0x84   :  { %4032 = vst [vmem:[#allocation2_spill] sm:$0xff] %v2235_v26  ;;  %v2263_v40 = vpop.permute.xlu1 %79 }
  0x85   :  { %4046 = vst [vmem:[#allocation16_spill] sm:$0xff] %v2263_v40 }
  0x87   :  { %v2237_v27 = vpop.permute.xlu0 %315 }
  0x88   :  { %4033 = vst [vmem:[#allocation3_spill] sm:$0xff] %v2237_v27  ;;  %v2267_v42 = vpop.permute.xlu1 %84 }
  0x89   :  { %4048 = vst [vmem:[#allocation18_spill] sm:$0xff] %v2267_v42 }
  0x8c   :  { %v2239_v28 = vpop.permute.xlu0 %380 }
  0x8d   :  { %4034 = vst [vmem:[#allocation4_spill] sm:$0xff] %v2239_v28  ;;  %v2271_v44 = vpop.permute.xlu1 %240 }
  0x8e   :  { %4050 = vst [vmem:[#allocation20_spill] sm:$0xff] %v2271_v44 }
  0x90   :  { %v2241_v29 = vpop.permute.xlu0 %384 }
  0x91   :  { %4035 = vst [vmem:[#allocation5_spill] sm:$0xff] %v2241_v29 }
  0x92   :  { %v2275_v47 = vpop.permute.xlu1 %311 }
  0x93   :  { %4052 = vst [vmem:[#allocation22_spill] sm:$0xff] %v2275_v47 }
  0x95   :  { %v2243_v30 = vpop.permute.xlu0 %449 }
  0x96   :  { %4036 = vst [vmem:[#allocation6_spill] sm:$0xff] %v2243_v30 }
  0x97   :  { %v2284_v52 = vpop.permute.xlu1 %376 }
  0x98   :  { %4053 = vst [vmem:[#allocation23_spill] sm:$0xff] %v2284_v52 }
  0x99   :  { %v2245_v31 = vpop.permute.xlu0 %453 }
  0x9a   :  { %4037 = vst [vmem:[#allocation7_spill] sm:$0xff] %v2245_v31 }
  0x9c   :  { %v2294_v56 = vpop.permute.xlu1 %245 }
  0x9e   :  { %v2247_v32 = vpop.permute.xlu0 %481 }
  0x9f   :  { %4038 = vst [vmem:[#allocation8_spill] sm:$0xff] %v2247_v32 }
  0xa0   :  { %v2303_v59 = vpop.permute.xlu1 %250 }
  0xa2   :  { %v2249_v33 = vpop.permute.xlu0 %485 }
  0xa3   :  { %4039 = vst [vmem:[#allocation9_spill] sm:$0xff] %v2249_v33 }
  0xa5   :  { %v2318_v62 = vpop.permute.xlu1 %319 }
  0xa6   :  { %4055 = vst [vmem:[#allocation25_spill] sm:$0xff] %v2318_v62 }
  0xa7   :  { %v2251_v34 = vpop.permute.xlu0 %550 }
  0xa8   :  { %4040 = vst [vmem:[#allocation10_spill] sm:$0xff] %v2251_v34 }
  0xaa   :  { %v2324_v63 = vpop.permute.xlu1 %445 }
  0xab   :  { %v2253_v35 = vpop.permute.xlu0 %554  ;;  %4056 = vst [vmem:[#allocation26_spill] sm:$0xff] %v2324_v63 }
  0xac   :  { %4041 = vst [vmem:[#allocation11_spill] sm:$0xff] %v2253_v35 }
  0xaf   :  { %v2334_v0 = vpop.permute.xlu1 %388 }
  0xb0   :  { %v2255_v36 = vpop.permute.xlu0 %619  ;;  %4057 = vst [vmem:[#allocation27_spill] sm:$0xff] %v2334_v0 }
  0xb1   :  { %4042 = vst [vmem:[#allocation12_spill] sm:$0xff] %v2255_v36 }
  0xb4   :  { %v2257_v37 = vpop.permute.xlu0 %623  ;;  %v2340_v1 = vpop.permute.xlu1 %477 }
  0xb5   :  { %4043 = vst [vmem:[#allocation13_spill] sm:$0xff] %v2257_v37  ;;  %4058 = vst [vmem:[#allocation28_spill] sm:$0xff] %v2340_v1 }
  0xb9   :  { %v2259_v38 = vpop.permute.xlu0 %688  ;;  %v2346_v3 = vpop.permute.xlu1 %457 }
  0xba   :  { %4044 = vst [vmem:[#allocation14_spill] sm:$0xff] %v2259_v38  ;;  %4059 = vst [vmem:[#allocation29_spill] sm:$0xff] %v2346_v3 }
  0xbd   :  { %v2261_v39 = vpop.permute.xlu0 %692 }
  0xbe   :  { %4045 = vst [vmem:[#allocation15_spill] sm:$0xff] %v2261_v39  ;;  %v2362_v6 = vpop.permute.xlu1 %546  ;;  %v4080_v39 = vmov 0 }
  0xbf   :  { %4061 = vst [vmem:[#allocation31_spill] sm:$0xff] %v2362_v6 }
  0xc2   :  { %v2265_v41 = vpop.permute.xlu0 %757 }
  0xc3   :  { %4047 = vst [vmem:[#allocation17_spill] sm:$0xff] %v2265_v41  ;;  %v2368_v7 = vpop.permute.xlu1 %489 }
  0xc4   :  { %4062 = vst [vmem:[#allocation32_spill] sm:$0xff] %v2368_v7 }
  0xc6   :  { %v2269_v43 = vpop.permute.xlu0 %765 }
  0xc7   :  { %4049 = vst [vmem:[#allocation19_spill] sm:$0xff] %v2269_v43 }
  0xc8   :  { %v2378_v8 = vpop.permute.xlu1 %615 }
  0xc9   :  { %4063 = vst [vmem:[#allocation33_spill] sm:$0xff] %v2378_v8 }
  0xcb   :  { %v2273_v45 = vpop.permute.xlu0 %69 }
  0xcc   :  { %4051 = vst [vmem:[#allocation21_spill] sm:$0xff] %v2273_v45 }
  0xcd   :  { %v2387_v10 = vpop.permute.xlu1 %558 }
  0xce   :  { %4065 = vst [vmem:[#allocation35_spill] sm:$0xff] %v2387_v10 }
  0xcf   :  { %v2309_v60 = vpop.permute.xlu0 %74 }
  0xd0   :  { %4054 = vst [vmem:[#allocation24_spill] sm:$0xff] %v2309_v60 }
  0xd2   :  { %v2397_v11 = vpop.permute.xlu1 %684 }
  0xd3   :  { %4066 = vst [vmem:[#allocation36_spill] sm:$0xff] %v2397_v11  ;;  %v2452_v21 = vpop.permute.xlu0 %235 }
  0xd4   :  { %4073 = vst [vmem:[#allocation43_spill] sm:$0xff] %v2452_v21 }
  0xd7   :  { %v173_v46 = vpop.f32.mrb[0].mxu0  ;;  %v2403_v12 = vpop.permute.xlu1 %627 }
  0xd8   :  { %v2278_v48 = vadd.f32 %v173_v46, %v2273_v45  ;;  %v175_v49 = vpop.f32.mrb[1].mxu0  ;;  %4067 = vst [vmem:[#allocation37_spill] sm:$0xff] %v2403_v12  ;;  %v44_v46 = vlaneseq }
  0xd9   :  { %v2301_v58 = vadd.f32 %v175_v49, %v2273_v45 }
  0xda   :  { %269 = vrot.lane.b32.xlu0 %v2278_v48, %s2101_s8  ;;  %196 = vrot.lane.b32.xlu1 %v2278_v48, %s2102_s9 }
  0xdb   :  { %v179_v50 = vpop.f32.mrb[2].mxu0 }
  0xdc   :  { %v181_v51 = vpop.f32.mrb[3].mxu0  ;;  %v2312_v61 = vadd.f32 %v179_v50, %v2309_v60  ;;  %v2416_v14 = vpop.permute.xlu1 %753 }
  0xdd   :  { %v2353_v4 = vadd.f32 %v181_v51, %v2309_v60  ;;  %4068 = vst [vmem:[#allocation38_spill] sm:$0xff] %v2416_v14  ;;  %v2464_v51 = vand.u32 127, %v44_v46 }
  0xde   :  { %407 = vrot.lane.b32.xlu0 %v2278_v48, %s2103_s10  ;;  %338 = vrot.lane.b32.xlu1 %v2278_v48, %s2104_s11 }
  0xdf   :  { %v185_v53 = vpop.f32.mrb[4].mxu0  ;;  %vm4002_vm2 = vcmp.ge.s32.totalorder %v2464_v51, 16  ;;  %vm212_vm4 = vcmp.lt.s32.totalorder %v2464_v51, 17  ;;  %vm4003_vm5 = vcmp.lt.s32.totalorder %v2464_v51, 16  ;;  %vm3972_vm9 = vcmp.lt.s32.totalorder %v2464_v51, 15 }
  0xe0   :  { %v187_v54 = vpop.f32.mrb[5].mxu0  ;;  %v2360_v5 = vadd.f32 %v185_v53, %v2263_v40  ;;  %vm3971_vm12 = vcmp.lt.s32.totalorder %v2464_v51, 1  ;;  %vm3955_vm13 = vcmp.lt.s32.totalorder %v2464_v51, 112  ;;  %vm524_vm14 = vcmp.lt.s32.totalorder %v2464_v51, 127 }
  0xe1   :  { %v2381_v9 = vadd.f32 %v187_v54, %v2263_v40  ;;  %v2425_v16 = vpop.permute.xlu1 %696  ;;  %vm3956_vm1 = vcmp.lt.s32.totalorder %v2464_v51, 113 }
  0xe2   :  { %508 = vrot.lane.b32.xlu0 %v2278_v48, %s2105_s12  ;;  %577 = vrot.lane.b32.xlu1 %v2278_v48, %s2106_s13  ;;  %4060 = vst [vmem:[#allocation30_spill] sm:$0xff] %v2360_v5  ;;  %4069 = vst [vmem:[#allocation39_spill] sm:$0xff] %v2425_v16 }
  0xe3   :  { %v191_v55 = vpop.f32.mrb[6].mxu0  ;;  %4064 = vst [vmem:[#allocation34_spill] sm:$0xff] %v2381_v9 }
  0xe4   :  { %v193_v57 = vpop.f32.mrb[7].mxu0  ;;  %v2410_v13 = vadd.f32 %v191_v55, %v2267_v42  ;;  %v2473_v55 = vadd.s32 128, %v2464_v51 }
  0xe5   :  { %v2419_v15 = vadd.f32 %v193_v57, %v2267_v42  ;;  %v47_v57 = vand.u32 15, %v2464_v51  ;;  %v4224_v42 = vld [vmem:[#allocation15_spill] sm:$0xff] }
  0xe6   :  { %715 = vrot.lane.b32.xlu0 %v2278_v48, %s2107_s14  ;;  %646 = vrot.lane.b32.xlu1 %v2278_v48, %s2108_s15  ;;  %v2436_v18 = vpop.permute.xlu1 %761  ;;  %v48_v46 = vand.u32 15, %v2473_v55  ;;  %vm52_vm15 = vcmp.lt.s32.totalorder %v2473_v55, 240 }
  0xe7   :  { %4070 = vst [vmem:[#allocation40_spill] sm:$0xff] %v2436_v18  ;;  %vm2482_vm3 = vcmp.ge.s32.totalorder %v47_v57, 1  ;;  %vm2492_vm6 = vcmp.lt.s32.totalorder %v47_v57, 15 }
  0xe8   :  { %vm2496_vm7 = vcmp.ge.s32.totalorder %v48_v46, 1  ;;  %vm2504_vm8 = vmand %vm4002_vm2, %vm2482_vm3  ;;  %vm2521_vm10 = vcmp.lt.s32.totalorder %v48_v46, 15 }
  0xe9   :  { %v4081_v39 = vsel %vm2504_vm8, 4294967295, %v4080_v39  ;;  %vm2529_vm11 = vmand %vm4002_vm2, %vm2492_vm6 }
  0xea   :  { %204 = vrot.lane.b32.xlu0 %v2301_v58, %s2102_s9  ;;  %654 = vrot.lane.b32.xlu1 %v2301_v58, %s2108_s15  ;;  %4082 = vst [vmem:[#allocation44_spill] sm:$0xff] %v4081_v39  ;;  %vm2603_vm0 = vmand %vm52_vm15, %vm2496_vm7 }
  0xeb   :  { %v2442_v19 = vpop.permute.xlu1 %786 }
  0xec   :  { %4071 = vst [vmem:[#allocation41_spill] sm:$0xff] %v2442_v19 }
  0xee   :  { %277 = vrot.lane.b32.xlu0 %v2301_v58, %s2101_s8  ;;  %198 = vrot.lane.b32.xlu1 %v2312_v61, %s2102_s9 }
  0xef   :  { %v2450_v20 = vpop.permute.xlu1 %791 }
  0xf0   :  { %4072 = vst [vmem:[#allocation42_spill] sm:$0xff] %v2450_v20 }
  0xf2   :  { %346 = vrot.lane.b32.xlu0 %v2301_v58, %s2104_s11  ;;  %271 = vrot.lane.b32.xlu1 %v2312_v61, %s2101_s8 }
  0xf6   :  { %415 = vrot.lane.b32.xlu0 %v2301_v58, %s2103_s10  ;;  %340 = vrot.lane.b32.xlu1 %v2312_v61, %s2104_s11 }
  0xfa   :  { %516 = vrot.lane.b32.xlu0 %v2301_v58, %s2105_s12  ;;  %409 = vrot.lane.b32.xlu1 %v2312_v61, %s2103_s10 }
  0xfe   :  { %585 = vrot.lane.b32.xlu0 %v2301_v58, %s2106_s13  ;;  %510 = vrot.lane.b32.xlu1 %v2312_v61, %s2105_s12 }
 0x102   :  { %723 = vrot.lane.b32.xlu0 %v2301_v58, %s2107_s14  ;;  %579 = vrot.lane.b32.xlu1 %v2312_v61, %s2106_s13 }
 0x106   :  { %648 = vrot.lane.b32.xlu0 %v2312_v61, %s2108_s15  ;;  %717 = vrot.lane.b32.xlu1 %v2312_v61, %s2107_s14 }
 0x10a   :  { %656 = vrot.lane.b32.xlu0 %v2353_v4, %s2108_s15  ;;  %206 = vrot.lane.b32.xlu1 %v2353_v4, %s2102_s9 }
 0x10e   :  { %273 = vrot.lane.b32.xlu0 %v2360_v5, %s2101_s8  ;;  %279 = vrot.lane.b32.xlu1 %v2353_v4, %s2101_s8 }
 0x112   :  { %581 = vrot.lane.b32.xlu0 %v2360_v5, %s2106_s13  ;;  %348 = vrot.lane.b32.xlu1 %v2353_v4, %s2104_s11 }
 0x116   :  { %650 = vrot.lane.b32.xlu0 %v2360_v5, %s2108_s15  ;;  %417 = vrot.lane.b32.xlu1 %v2353_v4, %s2103_s10 }
 0x11a   :  { %208 = vrot.lane.b32.xlu0 %v2381_v9, %s2102_s9  ;;  %518 = vrot.lane.b32.xlu1 %v2353_v4, %s2105_s12 }
 0x11e   :  { %281 = vrot.lane.b32.xlu0 %v2381_v9, %s2101_s8  ;;  %587 = vrot.lane.b32.xlu1 %v2353_v4, %s2106_s13 }
 0x122   :  { %350 = vrot.lane.b32.xlu0 %v2381_v9, %s2104_s11  ;;  %725 = vrot.lane.b32.xlu1 %v2353_v4, %s2107_s14 }
 0x126   :  { %419 = vrot.lane.b32.xlu0 %v2381_v9, %s2103_s10  ;;  %200 = vrot.lane.b32.xlu1 %v2360_v5, %s2102_s9 }
 0x12a   :  { %589 = vrot.lane.b32.xlu0 %v2381_v9, %s2106_s13  ;;  %342 = vrot.lane.b32.xlu1 %v2360_v5, %s2104_s11 }
 0x12e   :  { %514 = vrot.lane.b32.xlu0 %v2410_v13, %s2105_s12  ;;  %411 = vrot.lane.b32.xlu1 %v2360_v5, %s2103_s10 }
 0x132   :  { %522 = vrot.lane.b32.xlu0 %v2419_v15, %s2105_s12  ;;  %512 = vrot.lane.b32.xlu1 %v2360_v5, %s2105_s12 }
 0x136   :  { %658 = vrot.lane.b32.xlu0 %v2381_v9, %s2108_s15  ;;  %520 = vrot.lane.b32.xlu1 %v2381_v9, %s2105_s12 }
 0x13a   :  { %796 = vperm.xlu0 %2018, %v40_v17   ;;  %202 = vrot.lane.b32.xlu1 %v2410_v13, %s2102_s9 }
 0x13e   :  { %721 = vrot.lane.b32.xlu0 %v2410_v13, %s2107_s14  ;;  %275 = vrot.lane.b32.xlu1 %v2410_v13, %s2101_s8 }
 0x142   :  { %729 = vrot.lane.b32.xlu0 %v2419_v15, %s2107_s14  ;;  %344 = vrot.lane.b32.xlu1 %v2410_v13, %s2104_s11 }
 0x146   :  { %413 = vrot.lane.b32.xlu1 %v2410_v13, %s2103_s10 }
 0x14a   :  { %583 = vrot.lane.b32.xlu1 %v2410_v13, %s2106_s13 }
 0x14c   :  { %v270_v22 = vpop.permute.xlu0 %269  ;;  %v197_v23 = vpop.permute.xlu1 %196 }
 0x14e   :  { %652 = vrot.lane.b32.xlu1 %v2410_v13, %s2108_s15 }
 0x150   :  { %v408_v24 = vpop.permute.xlu0 %407  ;;  %v339_v25 = vpop.permute.xlu1 %338 }
 0x152   :  { %210 = vrot.lane.b32.xlu1 %v2419_v15, %s2102_s9 }
 0x154   :  { %v2460_v49 = vpop.permute.xlu0 %508  ;;  %v2462_v50 = vpop.permute.xlu1 %577 }
 0x156   :  { %283 = vrot.lane.b32.xlu1 %v2419_v15, %s2101_s8 }
 0x158   :  { %v2468_v53 = vpop.permute.xlu0 %715  ;;  %v2470_v54 = vpop.permute.xlu1 %646 }
 0x15a   :  { %352 = vrot.lane.b32.xlu1 %v2419_v15, %s2104_s11 }
 0x15c   :  { %v205_v17 = vpop.permute.xlu0 %204  ;;  %v2478_v2 = vpop.permute.xlu1 %654 }
 0x15d   :  { %v213_v37 = vsel %vm212_vm4, %v197_v23, %v205_v17  ;;  %v217_v57 = vsel %vm212_vm4, %v205_v17, %v197_v23 }
 0x15e   :  { %421 = vrot.lane.b32.xlu1 %v2419_v15, %s2103_s10 }
 0x160   :  { %v278_v40 = vpop.permute.xlu0 %277  ;;  %v2490_v60 = vpop.permute.xlu1 %198 }
 0x161   :  { %v290_v35 = vsel %vm4003_vm5, %v278_v40, %v270_v22  ;;  %v286_v33 = vsel %vm4003_vm5, %v270_v22, %v278_v40  ;;  %v226_v40 = vsel %vm2496_vm7, %v213_v37, 0.0 }
 0x162   :  { %v298_v43 = vsel %vm4002_vm2, %v290_v35, 0.0  ;;  %591 = vrot.lane.b32.xlu1 %v2419_v15, %s2106_s13  ;;  %v225_v35 = vsel %vm2504_vm8, %v217_v57, 0.0  ;;  %v323_v29 = vmul.f32 %v2235_v26, %v286_v33  ;;  %v254_v33 = vmul.f32 %v2452_v21, %v226_v40 }
 0x163   :  { %v322_v46 = vmul.f32 %v2235_v26, %v298_v43  ;;  %v253_v37 = vmul.f32 %v2452_v21, %v225_v35 }
 0x164   :  { %v347_v22 = vpop.permute.xlu0 %346  ;;  %v2537_v17 = vpop.permute.xlu1 %271  ;;  %v331_v3 = vadd.f32 %v323_v29, %v254_v33  ;;  %v493_v33 = vmul.f32 %v2340_v1, %v2301_v58 }
 0x165   :  { %v355_v16 = vsel %vm3972_vm9, %v339_v25, %v347_v22  ;;  %v359_v12 = vsel %vm3972_vm9, %v347_v22, %v339_v25 }
 0x166   :  { %v367_v10 = vsel %vm2529_vm11, %v359_v12, 0.0  ;;  %v368_v57 = vsel %vm2521_vm10, %v355_v16, 0.0  ;;  %660 = vrot.lane.b32.xlu1 %v2419_v15, %s2108_s15  ;;  %v41_v12 = vld [vmem:[%s3924_s4 + $0x18] sm:$0xff]  ;;  %v330_v16 = vadd.f32 %v322_v46, %v253_v37 }
 0x167   :  { %v391_v43 = vmul.f32 %v2284_v52, %v367_v10  ;;  %v392_v26 = vmul.f32 %v2284_v52, %v368_v57 }
 0x168   :  { %v416_v25 = vpop.permute.xlu0 %415  ;;  %v2559_v22 = vpop.permute.xlu1 %340 }
 0x169   :  { %v424_v0 = vsel %vm3971_vm12, %v408_v24, %v416_v25  ;;  %v428_v35 = vsel %vm3971_vm12, %v416_v25, %v408_v24  ;;  %v399_v57 = vadd.f32 %v391_v43, %v330_v16  ;;  %v400_v46 = vadd.f32 %v392_v26, %v331_v3 }
 0x16a   :  { %v436_v10 = vsel %vm2482_vm3, %v428_v35, 0.0  ;;  %v437_v40 = vsel %vm2496_vm7, %v424_v0, 0.0  ;;  %801 = vperm.xlu1 %2019, %v41_v12   ;;  %v492_v24 = vmul.f32 %v2340_v1, %v2278_v48  ;;  %v667_v48 = vsel %vm3955_vm13, %v2478_v2, %v2470_v54 }
 0x16b   :  { %v460_v29 = vmul.f32 %v2324_v63, %v436_v10  ;;  %v461_v37 = vmul.f32 %v2324_v63, %v437_v40 }
 0x16c   :  { %v517_v25 = vpop.permute.xlu0 %516  ;;  %v2578_v35 = vpop.permute.xlu1 %409 }
 0x16d   :  { %v468_v0 = vadd.f32 %v460_v29, %v399_v57  ;;  %v469_v12 = vadd.f32 %v461_v37, %v400_v46  ;;  %v525_v26 = vsel %vm524_vm14, %v2460_v49, %v517_v25  ;;  %v529_v3 = vsel %vm524_vm14, %v517_v25, %v2460_v49 }
 0x16e   :  { %v537_v58 = vsel %vm2492_vm6, %v525_v26, 0.0  ;;  %v538_v43 = vsel %vm2521_vm10, %v529_v3, 0.0  ;;  %719 = vrot.lane.b32.xlu1 %v2360_v5, %s2107_s14  ;;  %v663_v37 = vsel %vm3955_vm13, %v2470_v54, %v2478_v2  ;;  %vm4012_vm13 = vcmp.lt.s32.totalorder %v2464_v51, 111 }
 0x16f   :  { %v500_v16 = vadd.f32 %v492_v24, %v468_v0  ;;  %v501_v10 = vadd.f32 %v493_v33, %v469_v12  ;;  %v561_v49 = vmul.f32 %v2362_v6, %v537_v58  ;;  %v562_v40 = vmul.f32 %v2362_v6, %v538_v43 }
 0x170   :  { %v586_v46 = vpop.permute.xlu0 %585  ;;  %v2607_v29 = vpop.permute.xlu1 %510  ;;  %v676_v24 = vsel %vm52_vm15, %v667_v48, 0.0  ;;  %v699_v48 = vmul.f32 %v2397_v11, %v663_v37 }
 0x171   :  { %v594_v33 = vsel %vm3956_vm1, %v2462_v50, %v586_v46  ;;  %v598_v25 = vsel %vm3956_vm1, %v586_v46, %v2462_v50  ;;  %v569_v2 = vadd.f32 %v561_v49, %v500_v16  ;;  %v570_v54 = vadd.f32 %v562_v40, %v501_v10  ;;  %vm2634_vm1 = vmand %vm52_vm15, %vm2521_vm10 }
 0x172   :  { %v606_v0 = vsel %vm2482_vm3, %v594_v33, 0.0  ;;  %v607_v12 = vsel %vm2603_vm0, %v598_v25, 0.0  ;;  %727 = vrot.lane.b32.xlu1 %v2381_v9, %s2107_s14  ;;  %v700_v58 = vmul.f32 %v2397_v11, %v676_v24 }
 0x173   :  { %v630_v26 = vmul.f32 %v2378_v8, %v606_v0  ;;  %v631_v3 = vmul.f32 %v2378_v8, %v607_v12 }
 0x174   :  { %v724_v43 = vpop.permute.xlu0 %723  ;;  %v2640_v46 = vpop.permute.xlu1 %579 }
 0x175   :  { %v638_v16 = vadd.f32 %v630_v26, %v569_v2  ;;  %v639_v10 = vadd.f32 %v631_v3, %v570_v54  ;;  %v732_v49 = vsel %vm4012_vm13, %v2468_v53, %v724_v43  ;;  %v736_v40 = vsel %vm4012_vm13, %v724_v43, %v2468_v53 }
 0x176   :  { %v744_v33 = vsel %vm2492_vm6, %v732_v49, 0.0  ;;  %v745_v37 = vsel %vm2634_vm1, %v736_v40, 0.0 }
 0x177   :  { %v707_v24 = vadd.f32 %v699_v48, %v638_v16  ;;  %v708_v25 = vadd.f32 %v700_v58, %v639_v10  ;;  %v768_v0 = vmul.f32 %v2416_v14, %v744_v33  ;;  %v769_v12 = vmul.f32 %v2416_v14, %v745_v37 }
 0x178   :  { %v2654_v2 = vpop.permute.xlu1 %717 }
 0x179   :  { %v776_v54 = vadd.f32 %v768_v0, %v707_v24  ;;  %v777_v26 = vadd.f32 %v769_v12, %v708_v25  ;;  %v649_v25 = vpop.permute.xlu0 %648 }
 0x17b   :  { %v2657_v11 = vadd.f32 %v2442_v19, %v777_v26  ;;  %v2660_v53 = vadd.f32 %v2442_v19, %v776_v54 }
 0x17c   :  { %v207_v3 = vpop.permute.xlu1 %206 }
 0x17d   :  { %v2663_v49 = vmul.f32 0.70710677, %v2657_v11  ;;  %v2666_v48 = vmul.f32 0.70710677, %v2660_v53  ;;  %v214_v58 = vsel %vm212_vm4, %v2490_v60, %v207_v3  ;;  %v218_v16 = vsel %vm212_vm4, %v207_v3, %v2490_v60 }
 0x17e   :  { %v227_v60 = vsel %vm2504_vm8, %v218_v16, 0.0  ;;  %v228_v0 = vsel %vm2496_vm7, %v214_v58, 0.0 }
 0x17f   :  { %v2683_v37 = vand.u32 2147483647, %v2663_v49  ;;  %v2686_v24 = vand.u32 2147483647, %v2666_v48 }
 0x180   :  { %v280_v43 = vpop.permute.xlu1 %279 }
 0x181   :  { %v291_v10 = vsel %vm4003_vm5, %v280_v43, %v2537_v17  ;;  %v287_v40 = vsel %vm4003_vm5, %v2537_v17, %v280_v43  ;;  %v837_v54 = vmul.f32 0.3275911, %v2683_v37  ;;  %v836_v19 = vmul.f32 0.3275911, %v2686_v24 }
 0x182   :  { %v300_v33 = vsel %vm4002_vm2, %v291_v10, 0.0  ;;  %v325_v26 = vmul.f32 %v2275_v47, %v287_v40  ;;  %v256_v40 = vmul.f32 %v2271_v44, %v228_v0 }
 0x183   :  { %v324_v17 = vmul.f32 %v2275_v47, %v300_v33  ;;  %v845_v10 = vadd.f32 1.0, %v837_v54  ;;  %v255_v33 = vmul.f32 %v2271_v44, %v227_v60 }
 0x184   :  { %v349_v12 = vpop.permute.xlu1 %348 }
 0x185   :  { %v356_v3 = vsel %vm3972_vm9, %v2559_v22, %v349_v12  ;;  %v360_v43 = vsel %vm3972_vm9, %v349_v12, %v2559_v22  ;;  %2020 = vrcp.f32 %v845_v10  ;;  %v332_v22 = vadd.f32 %v324_v17, %v255_v33 }
 0x186   :  { %v369_v16 = vsel %vm2529_vm11, %v360_v43, 0.0  ;;  %v370_v58 = vsel %vm2521_vm10, %v356_v3, 0.0  ;;  %v333_v12 = vadd.f32 %v325_v26, %v256_v40  ;;  %v657_v3 = vpop.permute.xlu0 %656 }
 0x187   :  { %v393_v14 = vmul.f32 %v2239_v28, %v369_v16  ;;  %v394_v8 = vmul.f32 %v2239_v28, %v370_v58  ;;  %v844_v16 = vadd.f32 1.0, %v836_v19  ;;  %v494_v19 = vmul.f32 %v2247_v32, %v2312_v61 }
 0x188   :  { %v418_v6 = vpop.permute.xlu1 %417 }
 0x189   :  { %v425_v43 = vsel %vm3971_vm12, %v2578_v35, %v418_v6  ;;  %v429_v54 = vsel %vm3971_vm12, %v418_v6, %v2578_v35  ;;  %v401_v58 = vadd.f32 %v393_v14, %v332_v22  ;;  %v402_v1 = vadd.f32 %v394_v8, %v333_v12 }
 0x18a   :  { %v438_v60 = vsel %vm2482_vm3, %v429_v54, 0.0  ;;  %v439_v0 = vsel %vm2496_vm7, %v425_v43, 0.0  ;;  %v495_v8 = vmul.f32 %v2247_v32, %v2353_v4  ;;  %vm4091_vm12 = vcmp.lt.s32.totalorder %v2464_v51, 112 }
 0x18b   :  { %v462_v17 = vmul.f32 %v2243_v30, %v438_v60  ;;  %v463_v26 = vmul.f32 %v2243_v30, %v439_v0  ;;  %v664_v22 = vsel %vm4091_vm12, %v649_v25, %v657_v3  ;;  %vm4092_vm9 = vmmov %vm4091_vm12  ;;  %2022 = vrcp.f32 %v844_v16 }
 0x18c   :  { %v519_v33 = vpop.permute.xlu1 %518  ;;  %v668_v12 = vsel %vm4092_vm9, %v657_v3, %v649_v25  ;;  %vm4093_vm12 = vcmp.lt.s32.totalorder %v2464_v51, 113  ;;  %v701_v3 = vmul.f32 %v2259_v38, %v664_v22  ;;  %v956_v30 = vmul.f32 %v2686_v24, %v2686_v24 }
 0x18d   :  { %v470_v40 = vadd.f32 %v462_v17, %v401_v58  ;;  %v471_v63 = vadd.f32 %v463_v26, %v402_v1  ;;  %v526_v6 = vsel %vm524_vm14, %v2607_v29, %v519_v33  ;;  %v530_v35 = vsel %vm524_vm14, %v519_v33, %v2607_v29  ;;  %v2740_v29 = vpop.permute.xlu0 %273  ;;  %vm4094_vm9 = vmmov %vm4093_vm12 }
 0x18e   :  { %v539_v14 = vsel %vm2492_vm6, %v526_v6, 0.0  ;;  %v540_v1 = vsel %vm2521_vm10, %v530_v35, 0.0  ;;  %v678_v58 = vsel %vm52_vm15, %v668_v12, 0.0 }
 0x18f   :  { %v502_v43 = vadd.f32 %v494_v19, %v470_v40  ;;  %v503_v61 = vadd.f32 %v495_v8, %v471_v63  ;;  %v563_v54 = vmul.f32 %v2251_v34, %v539_v14  ;;  %v564_v4 = vmul.f32 %v2251_v34, %v540_v1  ;;  %v2021_v0 = vpop.eup %2020 }
 0x190   :  { %v588_v60 = vpop.permute.xlu1 %587  ;;  %v861_v33 = vmul.f32 %v2021_v0, %v845_v10  ;;  %v702_v14 = vmul.f32 %v2259_v38, %v678_v58 }
 0x191   :  { %v595_v17 = vsel %vm4093_vm12, %v2640_v46, %v588_v60  ;;  %v599_v25 = vsel %vm4094_vm9, %v588_v60, %v2640_v46  ;;  %v571_v40 = vadd.f32 %v563_v54, %v502_v43  ;;  %v572_v6 = vadd.f32 %v564_v4, %v503_v61  ;;  %v2766_v12 = vpop.permute.xlu0 %581 }
 0x192   :  { %v608_v63 = vsel %vm2482_vm3, %v595_v17, 0.0  ;;  %v609_v26 = vsel %vm2603_vm0, %v599_v25, 0.0  ;;  %v869_v22 = vsub.f32 2.0, %v861_v33  ;;  %4095 = vst [vmem:[#allocation45_spill] sm:$0xff] %v2766_v12  ;;  %vm1005_vm12 = vcmp.lt.f32.partialorder %v2663_v49, 0.0 }
 0x193   :  { %v632_v35 = vmul.f32 %v2255_v36, %v608_v63  ;;  %v633_v19 = vmul.f32 %v2255_v36, %v609_v26 }
 0x194   :  { %v726_v8 = vpop.permute.xlu1 %725  ;;  %v2773_v60 = vmul.f32 %v2021_v0, %v869_v22 }
 0x195   :  { %v733_v46 = vsel %vm4012_vm13, %v2654_v2, %v726_v8  ;;  %v737_v1 = vsel %vm4012_vm13, %v726_v8, %v2654_v2  ;;  %v640_v10 = vadd.f32 %v632_v35, %v571_v40  ;;  %v641_v43 = vadd.f32 %v633_v19, %v572_v6  ;;  %v2023_v63 = vpop.eup %2022  ;;  %v2779_v40 = vpop.permute.xlu0 %650 }
 0x196   :  { %v746_v61 = vsel %vm2492_vm6, %v733_v46, 0.0  ;;  %v747_v54 = vsel %vm2634_vm1, %v737_v1, 0.0  ;;  %v885_v33 = vmul.f32 1.0614054, %v2773_v60  ;;  %4096 = vst [vmem:[#allocation46_spill] sm:$0xff] %v2779_v40  ;;  %v860_v0 = vmul.f32 %v2023_v63, %v844_v16 }
 0x197   :  { %v771_v4 = vmul.f32 %v2265_v41, %v747_v54  ;;  %v709_v58 = vadd.f32 %v701_v3, %v640_v10  ;;  %v710_v17 = vadd.f32 %v702_v14, %v641_v43  ;;  %v770_v25 = vmul.f32 %v2265_v41, %v746_v61 }
 0x198   :  { %v2776_v2 = vpop.permute.xlu1 %200  ;;  %v893_v8 = vadd.f32 -1.4531521, %v885_v33  ;;  %v868_v1 = vsub.f32 2.0, %v860_v0  ;;  %v957_v33 = vmul.f32 %v2683_v37, %v2683_v37 }
 0x199   :  { %v779_v26 = vadd.f32 %v771_v4, %v710_v17  ;;  %v778_v6 = vadd.f32 %v770_v25, %v709_v58  ;;  %v2794_v22 = vpop.permute.xlu0 %208 }
 0x19a   :  { %v901_v43 = vmul.f32 %v893_v8, %v2773_v60  ;;  %v2803_v54 = vmul.f32 %v2023_v63, %v868_v1  ;;  %v965_v63 = vsub.f32 0.0, %v957_v33 }
 0x19b   :  { %v2784_v19 = vadd.f32 %v2450_v20, %v779_v26  ;;  %v2792_v46 = vadd.f32 %v2450_v20, %v778_v6 }
 0x19c   :  { %v2781_v35 = vpop.permute.xlu1 %342  ;;  %v909_v58 = vadd.f32 1.4214138, %v901_v43  ;;  %v884_v0 = vmul.f32 1.0614054, %v2803_v54  ;;  %v974_v37 = vmul.f32 1.442695, %v965_v63 }
 0x19d   :  { %v2789_v14 = vmul.f32 0.70710677, %v2784_v19  ;;  %v2801_v16 = vmul.f32 0.70710677, %v2792_v46  ;;  %v2805_v17 = vpop.permute.xlu0 %281 }
 0x19e   :  { %v917_v8 = vmul.f32 %v909_v58, %v2773_v60  ;;  %v892_v43 = vadd.f32 -1.4531521, %v884_v0 }
 0x19f   :  { %v831_v10 = vand.u32 2147483647, %v2789_v14  ;;  %v830_v6 = vand.u32 2147483647, %v2801_v16  ;;  %vm1007_vm9 = vcmp.lt.f32.partialorder %v2789_v14, 0.0 }
 0x1a0   :  { %v2786_v3 = vpop.permute.xlu1 %411  ;;  %v925_v36 = vadd.f32 -0.28449672, %v917_v8 }
 0x1a1   :  { %v839_v4 = vmul.f32 0.3275911, %v831_v10  ;;  %v838_v1 = vmul.f32 0.3275911, %v830_v6  ;;  %v2816_v41 = vpop.permute.xlu0 %350  ;;  %v959_v47 = vmul.f32 %v831_v10, %v831_v10 }
 0x1a2   :  { %v933_v58 = vmul.f32 %v925_v36, %v2773_v60 }
 0x1a3   :  { %v847_v26 = vadd.f32 1.0, %v839_v4  ;;  %v846_v38 = vadd.f32 1.0, %v838_v1  ;;  %v900_v4 = vmul.f32 %v892_v43, %v2803_v54  ;;  %v964_v1 = vsub.f32 0.0, %v956_v30 }
 0x1a4   :  { %v2798_v61 = vpop.permute.xlu1 %512  ;;  %v941_v52 = vadd.f32 0.2548296, %v933_v58  ;;  %v967_v9 = vsub.f32 0.0, %v959_v47  ;;  %v958_v58 = vmul.f32 %v830_v6, %v830_v6  ;;  %v2853_v6 = vmul.f32 %v2368_v7, %v2410_v13 }
 0x1a5   :  { %2024 = vrcp.f32 %v847_v26  ;;  %v908_v32 = vadd.f32 1.4214138, %v900_v4  ;;  %v2825_v28 = vpop.permute.xlu0 %419  ;;  %v972_v24 = vmul.f32 1.442695, %v964_v1  ;;  %v288_v13 = vsel %vm4003_vm5, %v2740_v29, %v2805_v17 }
 0x1a6   :  { %2026 = vrcp.f32 %v846_v38  ;;  %v949_v40 = vmul.f32 %v941_v52, %v2773_v60  ;;  %v978_v5 = vmul.f32 1.442695, %v967_v9  ;;  %v966_v60 = vsub.f32 0.0, %v958_v58 }
 0x1a7   :  { %v916_v33 = vmul.f32 %v908_v32, %v2803_v54  ;;  %2028 = vpow2.f32 %v974_v37  ;;  %v219_v9 = vsel %vm212_vm4, %v2794_v22, %v2776_v2 }
 0x1a8   :  { %v2807_v25 = vpop.permute.xlu1 %520  ;;  %2030 = vpow2.f32 %v972_v24  ;;  %v2862_v24 = vmul.f32 %v2368_v7, %v2419_v15  ;;  %v229_v15 = vsel %vm2504_vm8, %v219_v9, 0.0 }
 0x1a9   :  { %v924_v63 = vadd.f32 -0.28449672, %v916_v33  ;;  %v2831_v21 = vpop.permute.xlu0 %589  ;;  %2032 = vpow2.f32 %v978_v5  ;;  %v2876_v5 = vsel %vm212_vm4, %v2776_v2, %v2794_v22  ;;  %v2894_v22 = vmul.f32 %v2237_v27, %v288_v13 }
 0x1aa   :  { %4097 = vst [vmem:[#allocation47_spill] sm:$0xff] %v2831_v21 }
 0x1ab   :  { %v932_v37 = vmul.f32 %v924_v63, %v2803_v54 }
 0x1ac   :  { %v2814_v20 = vpop.permute.xlu1 %202 }
 0x1af   :  { %v2025_v43 = vpop.eup %2024 }
 0x1b0   :  { %v2819_v34 = vpop.permute.xlu1 %275  ;;  %v863_v8 = vmul.f32 %v2025_v43, %v847_v26  ;;  %v2027_v32 = vpop.eup %2026 }
 0x1b1   :  { %v862_v10 = vmul.f32 %v2027_v32, %v846_v38  ;;  %v2029_v33 = vpop.eup %2028  ;;  %v292_v38 = vsel %vm4003_vm5, %v2805_v17, %v2740_v29  ;;  %v976_v29 = vmul.f32 1.442695, %v966_v60  ;;  %v2902_v60 = vmul.f32 %v2294_v56, %v229_v15 }
 0x1b2   :  { %v871_v44 = vsub.f32 2.0, %v863_v8  ;;  %v989_v12 = vmul.f32 %v2029_v33, %v949_v40 }
 0x1b3   :  { %v870_v1 = vsub.f32 2.0, %v862_v10  ;;  %2034 = vpow2.f32 %v976_v29 }
 0x1b4   :  { %v2827_v0 = vpop.permute.xlu1 %344  ;;  %v2833_v36 = vmul.f32 %v2025_v43, %v871_v44  ;;  %v940_v44 = vadd.f32 0.2548296, %v932_v37  ;;  %v2840_v43 = vpop.permute.xlu0 %514 }
 0x1b5   :  { %v2845_v52 = vmul.f32 %v2027_v32, %v870_v1  ;;  %v997_v32 = vsub.f32 1.0, %v989_v12  ;;  %v2881_v12 = vmul.f32 0.5, %v2657_v11  ;;  %v2887_v1 = vmul.f32 0.5, %v2660_v53 }
 0x1b6   :  { %v887_v26 = vmul.f32 1.0614054, %v2833_v36  ;;  %v948_v37 = vmul.f32 %v940_v44, %v2803_v54  ;;  %v2031_v54 = vpop.eup %2030 }
 0x1b7   :  { %v886_v63 = vmul.f32 1.0614054, %v2845_v52  ;;  %v1013_v11 = vsub.f32 0.0, %v997_v32 }
 0x1b8   :  { %v2829_v4 = vpop.permute.xlu1 %413  ;;  %v895_v8 = vadd.f32 -1.4531521, %v887_v26  ;;  %v302_v26 = vsel %vm4002_vm2, %v292_v38, 0.0  ;;  %v2883_v17 = vpop.permute.xlu0 %522  ;;  %v230_v38 = vsel %vm2496_vm7, %v2876_v5, 0.0 }
 0x1b9   :  { %v894_v33 = vadd.f32 -1.4531521, %v886_v63  ;;  %v2891_v2 = vmul.f32 %v2237_v27, %v302_v26 }
 0x1ba   :  { %v903_v47 = vmul.f32 %v895_v8, %v2833_v36 }
 0x1bb   :  { %v902_v44 = vmul.f32 %v894_v33, %v2845_v52 }
 0x1bc   :  { %v2837_v30 = vpop.permute.xlu1 %583  ;;  %v911_v40 = vadd.f32 1.4214138, %v903_v47  ;;  %v2896_v47 = vmul.f32 %v2031_v54, %v948_v37 }
 0x1be   :  { %v919_v58 = vmul.f32 %v911_v40, %v2833_v36  ;;  %v910_v40 = vadd.f32 1.4214138, %v902_v44  ;;  %v996_v15 = vsub.f32 1.0, %v2896_v47 }
 0x1c0   :  { %v2842_v21 = vpop.permute.xlu1 %652  ;;  %v927_v8 = vadd.f32 -0.28449672, %v919_v58  ;;  %v918_v5 = vmul.f32 %v910_v40, %v2845_v52  ;;  %v1012_v7 = vsub.f32 0.0, %v996_v15 }
 0x1c2   :  { %v935_v9 = vmul.f32 %v927_v8, %v2833_v36 }
 0x1c4   :  { %v211_v10 = vpop.permute.xlu1 %210  ;;  %v943_v33 = vadd.f32 0.2548296, %v935_v9  ;;  %v2033_v9 = vpop.eup %2032 }
 0x1c5   :  { %v216_v63 = vsel %vm212_vm4, %v2814_v20, %v211_v10  ;;  %v220_v37 = vsel %vm212_vm4, %v211_v10, %v2814_v20  ;;  %v2924_v20 = vsel %vm524_vm14, %v2840_v43, %v2883_v17  ;;  %v1021_v10 = vsel %vm1005_vm12, %v1013_v11, %v997_v32 }
 0x1c6   :  { %v231_v29 = vsel %vm2504_vm8, %v220_v37, 0.0  ;;  %v232_v54 = vsel %vm2496_vm7, %v216_v63, 0.0  ;;  %v951_v44 = vmul.f32 %v943_v33, %v2833_v36  ;;  %vm4098_vm12 = vcmp.lt.s32.totalorder %v2464_v51, 15 }
 0x1c7   :  { %v1029_v27 = vadd.f32 1.0, %v1021_v10 }
 0x1c8   :  { %v284_v53 = vpop.permute.xlu1 %283  ;;  %v991_v63 = vmul.f32 %v2033_v9, %v951_v44 }
 0x1c9   :  { %v293_v13 = vsel %vm4003_vm5, %v284_v53, %v2819_v34  ;;  %v289_v26 = vsel %vm4003_vm5, %v2819_v34, %v284_v53  ;;  %v2930_v34 = vpop.permute.xlu0 %658  ;;  %v926_v53 = vadd.f32 -0.28449672, %v918_v5  ;;  %vm1004_vm5 = vcmp.lt.f32.partialorder %v2666_v48, 0.0 }
 0x1ca   :  { %v304_v58 = vsel %vm4002_vm2, %v293_v13, 0.0  ;;  %v329_v49 = vmul.f32 %v2318_v62, %v289_v26  ;;  %vm4099_vm2 = vmmov %vm4098_vm12  ;;  %v259_v13 = vmul.f32 %v2303_v59, %v231_v29  ;;  %v260_v26 = vmul.f32 %v2303_v59, %v232_v54 }
 0x1cb   :  { %v328_v40 = vmul.f32 %v2318_v62, %v304_v58  ;;  %v934_v37 = vmul.f32 %v926_v53, %v2845_v52  ;;  %v4100_v58 = vld [vmem:[#allocation27_spill] sm:$0xff]  ;;  %v999_v62 = vsub.f32 1.0, %v991_v63 }
 0x1cc   :  { %v353_v8 = vpop.permute.xlu1 %352 }
 0x1cd   :  { %v358_v32 = vsel %vm4098_vm12, %v2827_v0, %v353_v8  ;;  %v362_v11 = vsel %vm4099_vm2, %v353_v8, %v2827_v0  ;;  %v2955_v0 = vpop.permute.xlu0 %796  ;;  %v336_v39 = vadd.f32 %v328_v40, %v259_v13  ;;  %vm4102_vm2 = vcmp.lt.s32.totalorder %v2464_v51, 1 }
 0x1ce   :  { %v373_v47 = vsel %vm2529_vm11, %v362_v11, 0.0  ;;  %v374_v36 = vsel %vm2521_vm10, %v358_v32, 0.0  ;;  %4101 = vst [vmem:[#allocation27_spill] sm:$0xff] %v2955_v0  ;;  %v942_v11 = vadd.f32 0.2548296, %v934_v37  ;;  %v337_v32 = vadd.f32 %v329_v49, %v260_v26  ;;  %vm4103_vm12 = vmmov %vm4102_vm2 }
 0x1cf   :  { %v397_v33 = vmul.f32 %v4100_v58, %v373_v47  ;;  %v398_v5 = vmul.f32 %v4100_v58, %v374_v36  ;;  %v1015_v9 = vsub.f32 0.0, %v999_v62  ;;  %v2035_v47 = vpop.eup %2034  ;;  %v4104_v36 = vld [vmem:[#allocation29_spill] sm:$0xff]  ;;  %v258_v13 = vmul.f32 %v2294_v56, %v230_v38 }
 0x1d0   :  { %v422_v8 = vpop.permute.xlu1 %421  ;;  %v950_v10 = vmul.f32 %v942_v11, %v2845_v52  ;;  %v543_v38 = vsel %vm2492_vm6, %v2924_v20, 0.0 }
 0x1d1   :  { %v427_v44 = vsel %vm4102_vm2, %v2829_v4, %v422_v8  ;;  %v431_v29 = vsel %vm4103_vm12, %v422_v8, %v2829_v4  ;;  %v405_v40 = vadd.f32 %v397_v33, %v336_v39  ;;  %v406_v49 = vadd.f32 %v398_v5, %v337_v32  ;;  %v722_v11 = vpop.permute.xlu0 %721 }
 0x1d2   :  { %v442_v54 = vsel %vm2482_vm3, %v431_v29, 0.0  ;;  %v443_v53 = vsel %vm2496_vm7, %v427_v44, 0.0  ;;  %v532_v4 = vsel %vm524_vm14, %v2883_v17, %v2840_v43  ;;  %v1023_v8 = vsel %vm1007_vm9, %v1015_v9, %v999_v62  ;;  %v4109_v9 = vld [vmem:[#allocation35_spill] sm:$0xff] }
 0x1d3   :  { %v466_v63 = vmul.f32 %v4104_v36, %v442_v54  ;;  %v467_v37 = vmul.f32 %v4104_v36, %v443_v53  ;;  %v990_v44 = vmul.f32 %v2035_v47, %v950_v10  ;;  %vm4105_vm2 = vcmp.lt.s32.totalorder %v2464_v51, 15 }
 0x1d4   :  { %v592_v26 = vpop.permute.xlu1 %591  ;;  %v357_v39 = vsel %vm4105_vm2, %v2781_v35, %v2816_v41  ;;  %v815_v5 = vmul.f32 0.5, %v2784_v19  ;;  %v1031_v43 = vadd.f32 1.0, %v1023_v8  ;;  %v1020_v62 = vsel %vm1004_vm5, %v1012_v7, %v996_v15  ;;  %vm4108_vm5 = vmmov %vm4105_vm2 }
 0x1d5   :  { %v474_v52 = vadd.f32 %v466_v63, %v405_v40  ;;  %v475_v33 = vadd.f32 %v467_v37, %v406_v49  ;;  %v998_v17 = vsub.f32 1.0, %v990_v44  ;;  %v544_v14 = vsel %vm2521_vm10, %v532_v4, 0.0  ;;  %v730_v63 = vpop.permute.xlu0 %729 }
 0x1d6   :  { %vm4106_vm9 = vcmp.lt.s32.totalorder %v2464_v51, 113  ;;  %v1037_v29 = vmul.f32 %v1029_v27, %v2881_v12  ;;  %v1039_v53 = vmul.f32 %v1031_v43, %v815_v5  ;;  %v361_v15 = vsel %vm4108_vm5, %v2816_v41, %v2781_v35  ;;  %v4114_v5 = vld [vmem:[#allocation37_spill] sm:$0xff] }
 0x1d7   :  { %v597_v32 = vsel %vm4106_vm9, %v2837_v30, %v592_v26  ;;  %vm4107_vm12 = vmmov %vm4106_vm9  ;;  %v506_v20 = vadd.f32 %v2853_v6, %v474_v52  ;;  %v507_v54 = vadd.f32 %v2862_v24, %v475_v33  ;;  %v1014_v48 = vsub.f32 0.0, %v998_v17 }
 0x1d8   :  { %v601_v19 = vsel %vm4107_vm12, %v592_v26, %v2837_v30  ;;  %v661_v7 = vpop.permute.xlu1 %660  ;;  %v567_v10 = vmul.f32 %v4109_v9, %v543_v38  ;;  %vm1006_vm2 = vcmp.lt.f32.partialorder %v2801_v16, 0.0  ;;  %v1028_v47 = vadd.f32 1.0, %v1020_v62 }
 0x1d9   :  { %v568_v30 = vmul.f32 %v4109_v9, %v544_v14  ;;  %v1958_v27 = vpack.c.bf16 %v1039_v53, %v1037_v29  ;;  %v1022_v12 = vsel %vm1006_vm2, %v1014_v48, %v998_v17  ;;  %vm4110_vm9 = vcmp.lt.s32.totalorder %v2464_v51, 112  ;;  %v4117_v48 = vld [vmem:[#allocation7_spill] sm:$0xff] }
 0x1da   :  { %v670_v6 = vsel %vm4110_vm9, %v661_v7, %v2842_v21  ;;  %v612_v24 = vsel %vm2482_vm3, %v597_v32, 0.0  ;;  %v613_v40 = vsel %vm2603_vm0, %v601_v19, 0.0  ;;  %v814_v41 = vmul.f32 0.5, %v2792_v46  ;;  %vm4112_vm5 = vmmov %vm4110_vm9  ;;  %v4115_v32 = vld [vmem:[#allocation39_spill] sm:$0xff] }
 0x1db   :  { %v1030_v35 = vadd.f32 1.0, %v1022_v12  ;;  %v371_v16 = vsel %vm2529_vm11, %v361_v15, 0.0  ;;  %vm4111_vm12 = vcmp.lt.s32.totalorder %v2464_v51, 1  ;;  %v575_v37 = vadd.f32 %v567_v10, %v506_v20  ;;  %1959 = vmatprep.subr.bf16.mxu1 %v1958_v27 }
 0x1dc   :  { %v430_v49 = vsel %vm4111_vm12, %v2825_v28, %v2786_v3  ;;  %v576_v4 = vadd.f32 %v568_v30, %v507_v54  ;;  %v1036_v26 = vmul.f32 %v1028_v47, %v2887_v1  ;;  %v666_v46 = vsel %vm4112_vm5, %v2842_v21, %v661_v7  ;;  %vm4113_vm2 = vmmov %vm4111_vm12 }
 0x1dd   :  { %v1038_v8 = vmul.f32 %v1030_v35, %v814_v41  ;;  %v682_v44 = vsel %vm52_vm15, %v670_v6, 0.0  ;;  %v372_v52 = vsel %vm2521_vm10, %v357_v39, 0.0  ;;  %v426_v33 = vsel %vm4113_vm2, %v2786_v3, %v2825_v28  ;;  %v4116_v3 = vld [vmem:[#allocation5_spill] sm:$0xff]  ;;  %v4118_v6 = vld [vmem:[#allocation19_spill] sm:$0xff]  ;;  %vm4130_vm2 = vmmov %vm4112_vm5 }
 0x1de   :  { %v636_v38 = vmul.f32 %v4114_v5, %v612_v24  ;;  %v637_v1 = vmul.f32 %v4114_v5, %v613_v40  ;;  %v440_v43 = vsel %vm2482_vm3, %v430_v49, 0.0  ;;  %v735_v21 = vsel %vm4012_vm13, %v722_v11, %v730_v63 }
 0x1df   :  { %v739_v17 = vsel %vm4012_vm13, %v730_v63, %v722_v11  ;;  %v1960_v62 = vpack.c.bf16 %v1038_v8, %v1036_v26  ;;  %v705_v19 = vmul.f32 %v4115_v32, %v666_v46  ;;  %v706_v28 = vmul.f32 %v4115_v32, %v682_v44  ;;  %v4123_v26 = vld [vmem:[#allocation9_spill] sm:$0xff]  ;;  %v4124_v46 = vld [vmem:[#allocation34_spill] sm:$0xff] }
 0x1e0   :  { %v644_v39 = vadd.f32 %v636_v38, %v575_v37  ;;  %v645_v14 = vadd.f32 %v637_v1, %v576_v4  ;;  %v395_v29 = vmul.f32 %v4116_v3, %v371_v16  ;;  %v441_v20 = vsel %vm2496_vm7, %v426_v33, 0.0  ;;  %v4119_v37 = vld [vmem:[#allocation47_spill] sm:$0xff]  ;;  %v4122_v4 = vld [vmem:[#allocation30_spill] sm:$0xff] }
 0x1e1   :  { %1961 = vmatpush1.bf16.msra.mxu1 %v1960_v62  ;;  %v334_v54 = vadd.f32 %v2891_v2, %v2902_v60  ;;  %v335_v53 = vadd.f32 %v2894_v22, %v258_v13  ;;  %v396_v11 = vmul.f32 %v4116_v3, %v372_v52  ;;  %v464_v7 = vmul.f32 %v4117_v48, %v440_v43  ;;  %v4125_v52 = vld [vmem:[#allocation11_spill] sm:$0xff] }
 0x1e2   :  { %v527_v15 = vsel %vm524_vm14, %v2798_v61, %v2807_v25  ;;  %v750_v10 = vsel %vm2492_vm6, %v735_v21, 0.0  ;;  %v751_v47 = vsel %vm2634_vm1, %v739_v17, 0.0  ;;  %v465_v30 = vmul.f32 %v4117_v48, %v441_v20 }
 0x1e3   :  { %v531_v2 = vsel %vm524_vm14, %v2807_v25, %v2798_v61  ;;  %v713_v22 = vadd.f32 %v705_v19, %v644_v39  ;;  %v714_v60 = vadd.f32 %v706_v28, %v645_v14  ;;  %v403_v13 = vadd.f32 %v395_v29, %v334_v54  ;;  %v4120_v61 = vld [vmem:[#allocation45_spill] sm:$0xff] }
 0x1e4   :  { %v404_v27 = vadd.f32 %v396_v11, %v335_v53  ;;  %v541_v12 = vsel %vm2492_vm6, %v527_v15, 0.0  ;;  %v774_v24 = vmul.f32 %v4118_v6, %v750_v10  ;;  %v775_v40 = vmul.f32 %v4118_v6, %v751_v47  ;;  %v4128_v53 = vld [vmem:[#allocation46_spill] sm:$0xff]  ;;  %v4129_v47 = vld [vmem:[#allocation13_spill] sm:$0xff] }
 0x1e5   :  { %v472_v41 = vadd.f32 %v464_v7, %v403_v13  ;;  %v542_v35 = vsel %vm2521_vm10, %v531_v2, 0.0  ;;  %vm4121_vm9 = vcmp.lt.s32.totalorder %v2464_v51, 113  ;;  %v496_v8 = vmul.f32 %v4123_v26, %v4122_v4 }
 0x1e6   :  { %v473_v16 = vadd.f32 %v465_v30, %v404_v27  ;;  %v782_v49 = vadd.f32 %v774_v24, %v713_v22  ;;  %v783_v63 = vadd.f32 %v775_v40, %v714_v60  ;;  %v596_v25 = vsel %vm4121_vm9, %v4120_v61, %v4119_v37  ;;  %vm4127_vm12 = vmmov %vm4121_vm9 }
 0x1e7   :  { %v497_v44 = vmul.f32 %v4123_v26, %v4124_v46  ;;  %v565_v33 = vmul.f32 %v4125_v52, %v541_v12  ;;  %v600_v1 = vsel %vm4127_vm12, %v4119_v37, %v4120_v61  ;;  %v566_v43 = vmul.f32 %v4125_v52, %v542_v35 }
 0x1e8   :  { %v504_v62 = vadd.f32 %v496_v8, %v472_v41  ;;  %v610_v39 = vsel %vm2482_vm3, %v596_v25, 0.0  ;;  %v611_v29 = vsel %vm2603_vm0, %v600_v1, 0.0  ;;  %v669_v11 = vsel %vm4112_vm5, %v2930_v34, %v4128_v53  ;;  %v4132_v8 = vld [vmem:[#allocation40_spill] sm:$0xff] }
 0x1e9   :  { %v3077_v38 = vpop.permute.xlu1 %801  ;;  %v505_v14 = vadd.f32 %v497_v44, %v473_v16  ;;  %v634_v30 = vmul.f32 %v4129_v47, %v610_v39  ;;  %v635_v2 = vmul.f32 %v4129_v47, %v611_v29  ;;  %v665_v22 = vsel %vm4130_vm2, %v4128_v53, %v2930_v34  ;;  %v4131_v16 = vld [vmem:[#allocation15_spill] sm:$0xff] }
 0x1ea   :  { %4126 = vst [vmem:[#allocation29_spill] sm:$0xff] %v3077_v38  ;;  %v3085_v21 = vadd.f32 %v3077_v38, %v782_v49  ;;  %v3088_v17 = vadd.f32 %v3077_v38, %v783_v63  ;;  %v573_v20 = vadd.f32 %v565_v33, %v504_v62  ;;  %v680_v27 = vsel %vm52_vm15, %v669_v11, 0.0 }
 0x1eb   :  { %v574_v7 = vadd.f32 %v566_v43, %v505_v14  ;;  %v703_v49 = vmul.f32 %v4131_v16, %v665_v22  ;;  %v704_v34 = vmul.f32 %v4131_v16, %v680_v27 }
 0x1ec   :  { %v3093_v19 = vmul.f32 0.70710677, %v3085_v21  ;;  %v3096_v28 = vmul.f32 0.70710677, %v3088_v17  ;;  %v642_v12 = vadd.f32 %v634_v30, %v573_v20 }
 0x1ed   :  { %v720_v54 = vpop.permute.xlu1 %719  ;;  %v643_v40 = vadd.f32 %v635_v2, %v574_v7 }
 0x1ee   :  { %v834_v15 = vand.u32 2147483647, %v3093_v19  ;;  %v835_v10 = vand.u32 2147483647, %v3096_v28  ;;  %v711_v25 = vadd.f32 %v703_v49, %v642_v12  ;;  %vm1010_vm9 = vcmp.lt.f32.partialorder %v3093_v19, 0.0 }
 0x1ef   :  { %v712_v44 = vadd.f32 %v704_v34, %v643_v40  ;;  %vm1011_vm12 = vcmp.lt.f32.partialorder %v3096_v28, 0.0  ;;  %v819_v28 = vmul.f32 0.5, %v3088_v17 }
 0x1f0   :  { %v842_v60 = vmul.f32 0.3275911, %v834_v15  ;;  %v843_v13 = vmul.f32 0.3275911, %v835_v10  ;;  %v962_v49 = vmul.f32 %v834_v15, %v834_v15 }
 0x1f1   :  { %v728_v24 = vpop.permute.xlu1 %727 }
 0x1f2   :  { %v850_v41 = vadd.f32 1.0, %v842_v60  ;;  %v851_v35 = vadd.f32 1.0, %v843_v13  ;;  %v734_v63 = vsel %vm4012_vm13, %v720_v54, %v728_v24  ;;  %v738_v37 = vsel %vm4012_vm13, %v728_v24, %v720_v54 }
 0x1f3   :  { %v748_v61 = vsel %vm2492_vm6, %v734_v63, 0.0  ;;  %v749_v4 = vsel %vm2634_vm1, %v738_v37, 0.0  ;;  %v963_v37 = vmul.f32 %v835_v10, %v835_v10 }
 0x1f4   :  { %2036 = vrcp.f32 %v850_v41  ;;  %v772_v46 = vmul.f32 %v4132_v8, %v748_v61  ;;  %v773_v33 = vmul.f32 %v4132_v8, %v749_v4  ;;  %v970_v4 = vsub.f32 0.0, %v962_v49 }
 0x1f5   :  { %2038 = vrcp.f32 %v851_v35 }
 0x1f6   :  { %v780_v1 = vadd.f32 %v772_v46, %v711_v25  ;;  %v781_v43 = vadd.f32 %v773_v33, %v712_v44 }
 0x1f8   :  { %v3127_v62 = vadd.f32 %v2955_v0, %v780_v1  ;;  %v3130_v39 = vadd.f32 %v2955_v0, %v781_v43  ;;  %v984_v43 = vmul.f32 1.442695, %v970_v4  ;;  %v4152_v0 = vld [vmem:[#allocation20_spill] sm:$0xff] }
 0x1fa   :  { %v3133_v14 = vmul.f32 0.70710677, %v3127_v62  ;;  %v3136_v29 = vmul.f32 0.70710677, %v3130_v39  ;;  %v816_v19 = vmul.f32 0.5, %v3127_v62  ;;  %v2085_v62 = vld [vmem:[%s3920_s0] sm:$0xff] }
 0x1fb   :  { %v1124_v17 = vrot.slane %v2085_v62, 4 }
 0x1fc   :  { %v832_v20 = vand.u32 2147483647, %v3133_v14  ;;  %v833_v53 = vand.u32 2147483647, %v3136_v29  ;;  %vm1008_vm5 = vcmp.lt.f32.partialorder %v3133_v14, 0.0  ;;  %vm1009_vm2 = vcmp.lt.f32.partialorder %v3136_v29, 0.0 }
 0x1fd   :  { %v2084_v29 = vld [vmem:[%s3920_s0 + $0x8] sm:$0xff] }
 0x1fe   :  { %v2037_v54 = vpop.eup %2036  ;;  %v840_v30 = vmul.f32 0.3275911, %v832_v20  ;;  %v841_v22 = vmul.f32 0.3275911, %v833_v53  ;;  %v960_v15 = vmul.f32 %v832_v20, %v832_v20 }
 0x1ff   :  { %v2039_v11 = vpop.eup %2038  ;;  %v866_v7 = vmul.f32 %v2037_v54, %v850_v41  ;;  %v971_v41 = vsub.f32 0.0, %v963_v37 }
 0x200   :  { %v867_v2 = vmul.f32 %v2039_v11, %v851_v35  ;;  %v848_v13 = vadd.f32 1.0, %v840_v30  ;;  %v849_v12 = vadd.f32 1.0, %v841_v22 }
 0x201   :  { %v874_v60 = vsub.f32 2.0, %v866_v7 }
 0x202   :  { %v875_v27 = vsub.f32 2.0, %v867_v2  ;;  %2040 = vrcp.f32 %v848_v13 }
 0x203   :  { %v882_v24 = vmul.f32 %v2037_v54, %v874_v60  ;;  %2042 = vrcp.f32 %v849_v12  ;;  %v986_v54 = vmul.f32 1.442695, %v971_v41 }
 0x204   :  { %v883_v40 = vmul.f32 %v2039_v11, %v875_v27  ;;  %v961_v27 = vmul.f32 %v833_v53, %v833_v53  ;;  %2044 = vpow2.f32 %v984_v43 }
 0x205   :  { %v890_v63 = vmul.f32 1.0614054, %v882_v24  ;;  %2046 = vpow2.f32 %v986_v54 }
 0x206   :  { %v891_v34 = vmul.f32 1.0614054, %v883_v40  ;;  %v969_v4 = vsub.f32 0.0, %v961_v27 }
 0x207   :  { %v898_v61 = vadd.f32 -1.4531521, %v890_v63 }
 0x208   :  { %v899_v25 = vadd.f32 -1.4531521, %v891_v34 }
 0x209   :  { %v906_v46 = vmul.f32 %v898_v61, %v882_v24 }
 0x20a   :  { %v907_v44 = vmul.f32 %v899_v25, %v883_v40 }
 0x20b   :  { %v914_v35 = vadd.f32 1.4214138, %v906_v46  ;;  %v968_v46 = vsub.f32 0.0, %v960_v15 }
 0x20c   :  { %v915_v33 = vadd.f32 1.4214138, %v907_v44  ;;  %v2041_v1 = vpop.eup %2040 }
 0x20d   :  { %v922_v7 = vmul.f32 %v914_v35, %v882_v24  ;;  %v2043_v30 = vpop.eup %2042  ;;  %v864_v2 = vmul.f32 %v2041_v1, %v848_v13 }
 0x20e   :  { %v923_v11 = vmul.f32 %v915_v33, %v883_v40  ;;  %v865_v22 = vmul.f32 %v2043_v30, %v849_v12  ;;  %v980_v12 = vmul.f32 1.442695, %v968_v46 }
 0x20f   :  { %v930_v60 = vadd.f32 -0.28449672, %v922_v7  ;;  %v872_v10 = vsub.f32 2.0, %v864_v2  ;;  %v982_v7 = vmul.f32 1.442695, %v969_v4 }
 0x210   :  { %v931_v63 = vadd.f32 -0.28449672, %v923_v11  ;;  %v873_v49 = vsub.f32 2.0, %v865_v22  ;;  %2048 = vpow2.f32 %v980_v12 }
 0x211   :  { %v938_v34 = vmul.f32 %v930_v60, %v882_v24  ;;  %v880_v37 = vmul.f32 %v2041_v1, %v872_v10  ;;  %v2045_v60 = vpop.eup %2044  ;;  %2050 = vpow2.f32 %v982_v7 }
 0x212   :  { %v939_v61 = vmul.f32 %v931_v63, %v883_v40  ;;  %v881_v25 = vmul.f32 %v2043_v30, %v873_v49  ;;  %v2047_v54 = vpop.eup %2046 }
 0x213   :  { %v888_v44 = vmul.f32 1.0614054, %v880_v37  ;;  %v946_v35 = vadd.f32 0.2548296, %v938_v34 }
 0x214   :  { %v889_v41 = vmul.f32 1.0614054, %v881_v25  ;;  %v947_v13 = vadd.f32 0.2548296, %v939_v61 }
 0x215   :  { %v896_v33 = vadd.f32 -1.4531521, %v888_v44  ;;  %v954_v53 = vmul.f32 %v946_v35, %v882_v24 }
 0x216   :  { %v897_v20 = vadd.f32 -1.4531521, %v889_v41  ;;  %v955_v43 = vmul.f32 %v947_v13, %v883_v40 }
 0x217   :  { %v904_v2 = vmul.f32 %v896_v33, %v880_v37  ;;  %v994_v15 = vmul.f32 %v2045_v60, %v954_v53 }
 0x218   :  { %v905_v11 = vmul.f32 %v897_v20, %v881_v25  ;;  %v995_v27 = vmul.f32 %v2047_v54, %v955_v43  ;;  %v818_v54 = vmul.f32 0.5, %v3085_v21 }
 0x219   :  { %v912_v22 = vadd.f32 1.4214138, %v904_v2  ;;  %v1002_v61 = vsub.f32 1.0, %v994_v15 }
 0x21a   :  { %v913_v1 = vadd.f32 1.4214138, %v905_v11  ;;  %v1003_v4 = vsub.f32 1.0, %v995_v27  ;;  %v2049_v41 = vpop.eup %2048 }
 0x21b   :  { %v920_v30 = vmul.f32 %v912_v22, %v880_v37  ;;  %v1018_v40 = vsub.f32 0.0, %v1002_v61  ;;  %v2051_v12 = vpop.eup %2050 }
 0x21c   :  { %v921_v10 = vmul.f32 %v913_v1, %v881_v25  ;;  %v1019_v33 = vsub.f32 0.0, %v1003_v4 }
 0x21d   :  { %v928_v63 = vadd.f32 -0.28449672, %v920_v30  ;;  %v1026_v53 = vsel %vm1010_vm9, %v1018_v40, %v1002_v61  ;;  %vm4019_vm9 = vcmask 261120   ;;  %v2089_v40 = vld [vmem:[%s3921_s1 + $0x18] sm:$0xff] }
 0x21e   :  { %v929_v49 = vadd.f32 -0.28449672, %v921_v10  ;;  %v1027_v43 = vsel %vm1011_vm12, %v1019_v33, %v1003_v4  ;;  %v817_v10 = vmul.f32 0.5, %v3130_v39  ;;  %v42_v39 = vld [vmem:[%s3925_s5] sm:$0xf]  ;;  %vm4133_vm12 = vcmask 1043456  }
 0x21f   :  { %v936_v34 = vmul.f32 %v928_v63, %v880_v37  ;;  %v4135_v4 = vmov 0.0  }
 0x220   :  { %v937_v46 = vmul.f32 %v929_v49, %v881_v25 }
 0x221   :  { %v944_v44 = vadd.f32 0.2548296, %v936_v34 }
 0x222   :  { %v945_v24 = vadd.f32 0.2548296, %v937_v46  ;;  %v1125_v46 = vrot.slane %v2084_v29, 4  ;;  %v43_v29 = vld [vmem:[%s3926_s6] sm:$0xf] }
 0x223   :  { %v952_v35 = vmul.f32 %v944_v44, %v880_v37  ;;  %v1034_v37 = vadd.f32 1.0, %v1026_v53  ;;  %v2086_v44 = vld [vmem:[%s3921_s1] sm:$0xff]  ;;  %v4143_v53 = vld [vmem:[#allocation24_spill] sm:$0xff] }
 0x224   :  { %v953_v13 = vmul.f32 %v945_v24, %v881_v25  ;;  %v1035_v25 = vadd.f32 1.0, %v1027_v43  ;;  %v2087_v24 = vld [vmem:[%s3921_s1 + $0x8] sm:$0xff] }
 0x225   :  { %v992_v20 = vmul.f32 %v2049_v41, %v952_v35  ;;  %v1042_v49 = vmul.f32 %v1034_v37, %v818_v54  ;;  %v2088_v35 = vld [vmem:[%s3921_s1 + $0x10] sm:$0xff] }
 0x226   :  { %v993_v7 = vmul.f32 %v2051_v12, %v953_v13  ;;  %v1043_v14 = vmul.f32 %v1035_v25, %v819_v28  ;;  %v4142_v12 = vld [vmem:[#allocation21_spill] sm:$0xff] }
 0x227   :  { %v1000_v2 = vsub.f32 1.0, %v992_v20 }
 0x228   :  { %v1001_v11 = vsub.f32 1.0, %v993_v7 }
 0x229   :  { %v1016_v22 = vsub.f32 0.0, %v1000_v2 }
 0x22a   :  { %v1017_v60 = vsub.f32 0.0, %v1001_v11 }
 0x22b   :  { %v1024_v1 = vsel %vm1008_vm5, %v1016_v22, %v1000_v2  ;;  %vm4134_vm5 = vmmov %vm4133_vm12 }
 0x22c   :  { %v1025_v30 = vsel %vm1009_vm2, %v1017_v60, %v1001_v11  ;;  %v1032_v15 = vadd.f32 1.0, %v1024_v1  ;;  %vm4136_vm2 = vcmask 31744  }
 0x22d   :  { %v1033_v27 = vadd.f32 1.0, %v1025_v30  ;;  %vm4137_vm13 = vmmov %vm4136_vm2  ;;  %v4144_v30 = vld [vmem:[#allocation16_spill] sm:$0xff] }
 0x22e   :  { %v1040_v63 = vmul.f32 %v1032_v15, %v816_v19  ;;  %v4145_v15 = vld [vmem:[#allocation18_spill] sm:$0xff] }
 0x22f   :  { %v1041_v34 = vmul.f32 %v1033_v27, %v817_v10 }
 0x230   :  { %v1964_v61 = vpack.c.bf16 %v1042_v49, %v1040_v63 }
 0x231   :  { %v1962_v21 = vpack.c.bf16 %v1043_v14, %v1041_v34 }
 0x233   :  { %1963 = vmatprep.subr.bf16.mxu1 %v1962_v21 }
 0x234   :  { %1965 = vmatpush1.bf16.msra.mxu1 %v1964_v61 }
 0x235   :  { %1951 = vmatprep.subr.msk.mxu1 %vm4133_vm12, %v1125_v46  ;;  %vm4138_vm12 = vmmov %vm4136_vm2 }
 0x237   :  { %1950 = vmatmul.mubr.msk.f32.vlgmr.msra.gmra.mrb[0].mxu1 %vm4019_vm9, %v42_v39 }
 0x238   :  { %1952 = vmatpush1.msk.msra.mxu1 %vm4134_vm5, %v1124_v17  ;;  %1194 = vmatprep.mubr.f32.mxu1 %v4135_v4  ;;  %vm4139_vm5 = vmmov %vm4136_vm2 }
 0x23b   :  { %1953 = vmatmul.mubr.msk.f32.vlgmr.msra.gmra.mrb[2].mxu1 %vm4136_vm2, %v2086_v44 }
 0x23c   :  { %1200 = vmatprep.mubr.f32.mxu1 %v4135_v4 }
 0x23f   :  { %1954 = vmatmul.mubr.msk.f32.gmra.mrb[4].mxu1 %vm4137_vm13, %v2087_v24  ;;  %vm4147_vm13 = vcmp.lt.s32.totalorder %v2464_v51, 16 }
 0x240   :  { %1206 = vmatprep.mubr.f32.mxu1 %v4135_v4  ;;  %vm4148_vm2 = vmmov %vm4147_vm13 }
 0x243   :  { %1955 = vmatmul.mubr.msk.f32.gmra.mrb[6].mxu1 %vm4138_vm12, %v2088_v35  ;;  %vm4150_vm12 = vcmp.ge.s32.totalorder %v2464_v51, 16 }
 0x244   :  { %1212 = vmatprep.mubr.f32.mxu1 %v4135_v4 }
 0x247   :  { %1956 = vmatmul.mubr.msk.f32.gmra.mrb[8].mxu1 %vm4139_vm5, %v2089_v40  ;;  %vm4153_vm5 = vmmov %vm4148_vm2 }
 0x30a   :  { %v3180_v41 = vpop.f32.mrb[0].mxu1 }
 0x30b   :  { %4140 = vst [vmem:[#allocation35_spill] sm:$0xff] %v3180_v41  ;;  %v3182_v13 = vpop.f32.mrb[1].mxu1 }
 0x30c   :  { %4141 = vst [vmem:[#allocation37_spill] sm:$0xff] %v3182_v13  ;;  %v4151_v13 = vld [vmem:[#allocation2_spill] sm:$0xff] }
 0x30e   :  { %v1196_v33 = vpop.f32.mrb[2].mxu1 }
 0x30f   :  { %v3185_v20 = vadd.f32 %v1196_v33, %v4142_v12  ;;  %v1198_v7 = vpop.f32.mrb[3].mxu1 }
 0x310   :  { %v3221_v1 = vadd.f32 %v1198_v7, %v4142_v12 }
 0x311   :  { %1219 = vrot.lane.b32.xlu1 %v3185_v20, %s2102_s9 }
 0x312   :  { %v1202_v2 = vpop.f32.mrb[4].mxu1 }
 0x313   :  { %v3190_v11 = vadd.f32 %v1202_v2, %v4143_v53  ;;  %v1204_v43 = vpop.f32.mrb[5].mxu1 }
 0x314   :  { %v3228_v54 = vadd.f32 %v1204_v43, %v4143_v53 }
 0x315   :  { %1221 = vrot.lane.b32.xlu0 %v3190_v11, %s2102_s9  ;;  %1267 = vrot.lane.b32.xlu1 %v3185_v20, %s2101_s8 }
 0x316   :  { %v1208_v22 = vpop.f32.mrb[6].mxu1 }
 0x317   :  { %v1210_v60 = vpop.f32.mrb[7].mxu1  ;;  %v3259_v19 = vadd.f32 %v1208_v22, %v4144_v30 }
 0x318   :  { %v3297_v10 = vadd.f32 %v1210_v60, %v4144_v30 }
 0x319   :  { %1269 = vrot.lane.b32.xlu0 %v3190_v11, %s2101_s8  ;;  %1315 = vrot.lane.b32.xlu1 %v3185_v20, %s2104_s11 }
 0x31a   :  { %v1214_v37 = vpop.f32.mrb[8].mxu1 }
 0x31b   :  { %v1216_v25 = vpop.f32.mrb[9].mxu1  ;;  %v3266_v28 = vadd.f32 %v1214_v37, %v4145_v15 }
 0x31c   :  { %v3304_v27 = vadd.f32 %v1216_v25, %v4145_v15 }
 0x31d   :  { %1317 = vrot.lane.b32.xlu0 %v3190_v11, %s2104_s11  ;;  %1363 = vrot.lane.b32.xlu1 %v3185_v20, %s2103_s10 }
 0x321   :  { %1365 = vrot.lane.b32.xlu0 %v3190_v11, %s2103_s10  ;;  %1427 = vrot.lane.b32.xlu1 %v3185_v20, %s2105_s12 }
 0x325   :  { %1429 = vrot.lane.b32.xlu0 %v3190_v11, %s2105_s12  ;;  %1475 = vrot.lane.b32.xlu1 %v3185_v20, %s2106_s13 }
 0x329   :  { %1477 = vrot.lane.b32.xlu0 %v3190_v11, %s2106_s13  ;;  %1523 = vrot.lane.b32.xlu1 %v3185_v20, %s2108_s15 }
 0x32d   :  { %1525 = vrot.lane.b32.xlu0 %v3190_v11, %s2108_s15  ;;  %1571 = vrot.lane.b32.xlu1 %v3185_v20, %s2107_s14 }
 0x331   :  { %1573 = vrot.lane.b32.xlu0 %v3190_v11, %s2107_s14  ;;  %1227 = vrot.lane.b32.xlu1 %v3221_v1, %s2102_s9 }
 0x335   :  { %1229 = vrot.lane.b32.xlu0 %v3228_v54, %s2102_s9  ;;  %1275 = vrot.lane.b32.xlu1 %v3221_v1, %s2101_s8 }
 0x339   :  { %1277 = vrot.lane.b32.xlu0 %v3228_v54, %s2101_s8  ;;  %1323 = vrot.lane.b32.xlu1 %v3221_v1, %s2104_s11 }
 0x33d   :  { %1325 = vrot.lane.b32.xlu0 %v3228_v54, %s2104_s11  ;;  %1371 = vrot.lane.b32.xlu1 %v3221_v1, %s2103_s10 }
 0x341   :  { %1373 = vrot.lane.b32.xlu0 %v3228_v54, %s2103_s10  ;;  %1435 = vrot.lane.b32.xlu1 %v3221_v1, %s2105_s12 }
 0x345   :  { %1437 = vrot.lane.b32.xlu0 %v3228_v54, %s2105_s12  ;;  %1483 = vrot.lane.b32.xlu1 %v3221_v1, %s2106_s13 }
 0x349   :  { %1485 = vrot.lane.b32.xlu0 %v3228_v54, %s2106_s13  ;;  %1531 = vrot.lane.b32.xlu1 %v3221_v1, %s2108_s15 }
 0x34d   :  { %1533 = vrot.lane.b32.xlu0 %v3228_v54, %s2108_s15  ;;  %1579 = vrot.lane.b32.xlu1 %v3221_v1, %s2107_s14 }
 0x351   :  { %1581 = vrot.lane.b32.xlu0 %v3228_v54, %s2107_s14  ;;  %1223 = vrot.lane.b32.xlu1 %v3259_v19, %s2102_s9 }
 0x355   :  { %1225 = vrot.lane.b32.xlu0 %v3266_v28, %s2102_s9  ;;  %1271 = vrot.lane.b32.xlu1 %v3259_v19, %s2101_s8 }
 0x359   :  { %1273 = vrot.lane.b32.xlu0 %v3266_v28, %s2101_s8  ;;  %1319 = vrot.lane.b32.xlu1 %v3259_v19, %s2104_s11 }
 0x35d   :  { %1321 = vrot.lane.b32.xlu0 %v3266_v28, %s2104_s11  ;;  %1367 = vrot.lane.b32.xlu1 %v3259_v19, %s2103_s10 }
 0x361   :  { %1369 = vrot.lane.b32.xlu0 %v3266_v28, %s2103_s10  ;;  %1431 = vrot.lane.b32.xlu1 %v3259_v19, %s2105_s12 }
 0x365   :  { %1433 = vrot.lane.b32.xlu0 %v3266_v28, %s2105_s12  ;;  %1479 = vrot.lane.b32.xlu1 %v3259_v19, %s2106_s13 }
 0x369   :  { %1481 = vrot.lane.b32.xlu0 %v3266_v28, %s2106_s13  ;;  %1527 = vrot.lane.b32.xlu1 %v3259_v19, %s2108_s15 }
 0x36d   :  { %1529 = vrot.lane.b32.xlu0 %v3266_v28, %s2108_s15  ;;  %1575 = vrot.lane.b32.xlu1 %v3259_v19, %s2107_s14 }
 0x371   :  { %1577 = vrot.lane.b32.xlu0 %v3266_v28, %s2107_s14  ;;  %1231 = vrot.lane.b32.xlu1 %v3297_v10, %s2102_s9 }
 0x375   :  { %1233 = vrot.lane.b32.xlu0 %v3304_v27, %s2102_s9  ;;  %1279 = vrot.lane.b32.xlu1 %v3297_v10, %s2101_s8 }
 0x379   :  { %1281 = vrot.lane.b32.xlu0 %v3304_v27, %s2101_s8  ;;  %1327 = vrot.lane.b32.xlu1 %v3297_v10, %s2104_s11 }
 0x37d   :  { %1329 = vrot.lane.b32.xlu0 %v3304_v27, %s2104_s11  ;;  %1375 = vrot.lane.b32.xlu1 %v3297_v10, %s2103_s10 }
 0x381   :  { %1377 = vrot.lane.b32.xlu0 %v3304_v27, %s2103_s10  ;;  %1439 = vrot.lane.b32.xlu1 %v3297_v10, %s2105_s12 }
 0x383   :  { %v1220_v63 = vpop.permute.xlu1 %1219 }
 0x385   :  { %1441 = vrot.lane.b32.xlu0 %v3304_v27, %s2105_s12  ;;  %1487 = vrot.lane.b32.xlu1 %v3297_v10, %s2106_s13 }
 0x387   :  { %v1222_v49 = vpop.permute.xlu0 %1221  ;;  %v1268_v34 = vpop.permute.xlu1 %1267 }
 0x389   :  { %1489 = vrot.lane.b32.xlu0 %v3304_v27, %s2106_s13  ;;  %1535 = vrot.lane.b32.xlu1 %v3297_v10, %s2108_s15 }
 0x38b   :  { %v1270_v14 = vpop.permute.xlu0 %1269  ;;  %v1316_v61 = vpop.permute.xlu1 %1315 }
 0x38d   :  { %1537 = vrot.lane.b32.xlu0 %v3304_v27, %s2108_s15  ;;  %1583 = vrot.lane.b32.xlu1 %v3297_v10, %s2107_s14 }
 0x38f   :  { %v1318_v46 = vpop.permute.xlu0 %1317  ;;  %v1364_v21 = vpop.permute.xlu1 %1363 }
 0x391   :  { %1585 = vrot.lane.b32.xlu0 %v3304_v27, %s2107_s14  ;;  %1046 = vperm.xlu1 %2019, %v43_v29   ;;  %v4149_v29 = vld [vmem:[#allocation43_spill] sm:$0xff] }
 0x393   :  { %v3339_v62 = vpop.permute.xlu0 %1365  ;;  %v3341_v17 = vpop.permute.xlu1 %1427 }
 0x397   :  { %v3343_v39 = vpop.permute.xlu0 %1429  ;;  %v3345_v4 = vpop.permute.xlu1 %1475 }
 0x39b   :  { %v3347_v44 = vpop.permute.xlu0 %1477  ;;  %v3349_v24 = vpop.permute.xlu1 %1523 }
 0x39f   :  { %v3351_v35 = vpop.permute.xlu0 %1525  ;;  %v3353_v40 = vpop.permute.xlu1 %1571 }
 0x3a3   :  { %v3355_v33 = vpop.permute.xlu0 %1573  ;;  %v1228_v12 = vpop.permute.xlu1 %1227 }
 0x3a4   :  { %v1235_v7 = vsel %vm212_vm4, %v1220_v63, %v1228_v12  ;;  %v1239_v2 = vsel %vm212_vm4, %v1228_v12, %v1220_v63 }
 0x3a5   :  { %v1244_v53 = vsel %vm2496_vm7, %v1235_v7, 0.0  ;;  %v1243_v22 = vsel %vm2504_vm8, %v1239_v2, 0.0 }
 0x3a6   :  { %v1252_v12 = vmul.f32 %v1244_v53, %v4149_v29  ;;  %v1251_v38 = vmul.f32 %v1243_v22, %v4149_v29 }
 0x3a7   :  { %v1230_v60 = vpop.permute.xlu0 %1229  ;;  %v1276_v37 = vpop.permute.xlu1 %1275 }
 0x3a8   :  { %v1236_v25 = vsel %vm212_vm4, %v1222_v49, %v1230_v60  ;;  %v1240_v30 = vsel %vm212_vm4, %v1230_v60, %v1222_v49  ;;  %v1283_v15 = vsel %vm4147_vm13, %v1268_v34, %v1276_v37  ;;  %v1287_v63 = vsel %vm4148_vm2, %v1276_v37, %v1268_v34  ;;  %vm4154_vm13 = vmmov %vm4148_vm2 }
 0x3a9   :  { %v1246_v7 = vsel %vm2496_vm7, %v1236_v25, 0.0  ;;  %v1291_v2 = vsel %vm4150_vm12, %v1287_v63, 0.0  ;;  %v1300_v41 = vmul.f32 %v1283_v15, %v4151_v13  ;;  %v1245_v60 = vsel %vm2504_vm8, %v1240_v30, 0.0  ;;  %v4156_v15 = vld [vmem:[#allocation22_spill] sm:$0xff] }
 0x3aa   :  { %v1299_v49 = vmul.f32 %v1291_v2, %v4151_v13  ;;  %v1254_v6 = vmul.f32 %v1246_v7, %v4152_v0  ;;  %vm4155_vm2 = vcmp.lt.s32.totalorder %v2464_v51, 15  ;;  %v1253_v29 = vmul.f32 %v1245_v60, %v4152_v0  ;;  %v4158_v7 = vld [vmem:[#allocation23_spill] sm:$0xff] }
 0x3ab   :  { %v1308_v34 = vadd.f32 %v1300_v41, %v1252_v12  ;;  %v1278_v37 = vpop.permute.xlu0 %1277  ;;  %v1324_v53 = vpop.permute.xlu1 %1323  ;;  %vm4157_vm9 = vmmov %vm4155_vm2 }
 0x3ac   :  { %v1307_v8 = vadd.f32 %v1299_v49, %v1251_v38  ;;  %v1284_v25 = vsel %vm4153_vm5, %v1270_v14, %v1278_v37  ;;  %v1288_v63 = vsel %vm4154_vm13, %v1278_v37, %v1270_v14  ;;  %v1331_v22 = vsel %vm4155_vm2, %v1316_v61, %v1324_v53  ;;  %vm4160_vm5 = vmmov %vm4155_vm2 }
 0x3ad   :  { %v1293_v13 = vsel %vm4150_vm12, %v1288_v63, 0.0  ;;  %v1302_v30 = vmul.f32 %v1284_v25, %v4156_v15  ;;  %v1335_v41 = vsel %vm4157_vm9, %v1324_v53, %v1316_v61  ;;  %v1340_v38 = vsel %vm2521_vm10, %v1331_v22, 0.0  ;;  %vm4159_vm9 = vmmov %vm4155_vm2 }
 0x3ae   :  { %v1301_v12 = vmul.f32 %v1293_v13, %v4156_v15  ;;  %v1339_v14 = vsel %vm2529_vm11, %v1335_v41, 0.0  ;;  %v1348_v2 = vmul.f32 %v1340_v38, %v4158_v7  ;;  %vm4161_vm13 = vcmp.lt.s32.totalorder %v2464_v51, 1  ;;  %v4162_v13 = vld [vmem:[#allocation4_spill] sm:$0xff]  ;;  %v4164_v41 = vld [vmem:[#allocation26_spill] sm:$0xff] }
 0x3af   :  { %v1310_v49 = vadd.f32 %v1302_v30, %v1254_v6  ;;  %v1347_v37 = vmul.f32 %v1339_v14, %v4158_v7  ;;  %v1326_v63 = vpop.permute.xlu0 %1325  ;;  %v1372_v25 = vpop.permute.xlu1 %1371  ;;  %vm4163_vm2 = vmmov %vm4161_vm13 }
 0x3b0   :  { %v1309_v32 = vadd.f32 %v1301_v12, %v1253_v29  ;;  %v1356_v16 = vadd.f32 %v1348_v2, %v1308_v34  ;;  %v1332_v61 = vsel %vm4159_vm9, %v1318_v46, %v1326_v63  ;;  %v1336_v0 = vsel %vm4160_vm5, %v1326_v63, %v1318_v46  ;;  %v4165_v12 = vld [vmem:[#allocation28_spill] sm:$0xff]  ;;  %vm4166_vm12 = vmmov %vm4163_vm2 }
 0x3b1   :  { %v1355_v60 = vadd.f32 %v1347_v37, %v1307_v8  ;;  %v1341_v53 = vsel %vm2529_vm11, %v1336_v0, 0.0  ;;  %v1342_v22 = vsel %vm2521_vm10, %v1332_v61, 0.0  ;;  %v1379_v6 = vsel %vm4161_vm13, %v1364_v21, %v1372_v25  ;;  %vm4167_vm9 = vmmov %vm4163_vm2 }
 0x3b2   :  { %v1349_v15 = vmul.f32 %v1341_v53, %v4162_v13  ;;  %v1350_v34 = vmul.f32 %v1342_v22, %v4162_v13  ;;  %v1383_v30 = vsel %vm4163_vm2, %v1372_v25, %v1364_v21  ;;  %v1388_v46 = vsel %vm2496_vm7, %v1379_v6, 0.0  ;;  %v4168_v53 = vld [vmem:[#allocation6_spill] sm:$0xff]  ;;  %v4169_v6 = vld [vmem:[#allocation8_spill] sm:$0xff] }
 0x3b3   :  { %v1387_v8 = vsel %vm2482_vm3, %v1383_v30, 0.0  ;;  %v1396_v38 = vmul.f32 %v1388_v46, %v4164_v41  ;;  %v1374_v29 = vpop.permute.xlu0 %1373  ;;  %v1412_v14 = vmul.f32 %v3221_v1, %v4165_v12  ;;  %v1436_v7 = vpop.permute.xlu1 %1435  ;;  %v1411_v2 = vmul.f32 %v3185_v20, %v4165_v12 }
 0x3b4   :  { %v1357_v37 = vadd.f32 %v1349_v15, %v1309_v32  ;;  %v1358_v63 = vadd.f32 %v1350_v34, %v1310_v49  ;;  %v1395_v21 = vmul.f32 %v1387_v8, %v4164_v41  ;;  %v1380_v25 = vsel %vm4166_vm12, %v3339_v62, %v1374_v29  ;;  %v4170_v41 = vld [vmem:[#allocation31_spill] sm:$0xff] }
 0x3b5   :  { %v1404_v61 = vadd.f32 %v1396_v38, %v1356_v16  ;;  %v1384_v0 = vsel %vm4167_vm9, %v1374_v29, %v3339_v62  ;;  %v1390_v1 = vsel %vm2496_vm7, %v1380_v25, 0.0  ;;  %v1443_v20 = vsel %vm524_vm14, %v3341_v17, %v1436_v7  ;;  %v4172_v25 = vld [vmem:[#allocation10_spill] sm:$0xff] }
 0x3b6   :  { %v1403_v32 = vadd.f32 %v1395_v21, %v1355_v60  ;;  %v1389_v49 = vsel %vm2482_vm3, %v1384_v0, 0.0  ;;  %v1398_v22 = vmul.f32 %v1390_v1, %v4168_v53  ;;  %v1413_v16 = vmul.f32 %v3190_v11, %v4169_v6 }
 0x3b7   :  { %v1397_v13 = vmul.f32 %v1389_v49, %v4168_v53  ;;  %v1420_v15 = vadd.f32 %v1412_v14, %v1404_v61  ;;  %v1447_v62 = vsel %vm524_vm14, %v1436_v7, %v3341_v17  ;;  %v1451_v34 = vsel %vm2492_vm6, %v1443_v20, 0.0  ;;  %v1438_v30 = vpop.permute.xlu0 %1437  ;;  %v1484_v60 = vpop.permute.xlu1 %1483 }
 0x3b8   :  { %v1406_v46 = vadd.f32 %v1398_v22, %v1358_v63  ;;  %v1419_v8 = vadd.f32 %v1411_v2, %v1403_v32  ;;  %v1459_v38 = vmul.f32 %v1451_v34, %v4170_v41  ;;  %v1414_v29 = vmul.f32 %v3228_v54, %v4169_v6  ;;  %v4175_v6 = vld [vmem:[#allocation33_spill] sm:$0xff] }
 0x3b9   :  { %v1405_v11 = vadd.f32 %v1397_v13, %v1357_v37  ;;  %v1444_v12 = vsel %vm524_vm14, %v3343_v39, %v1438_v30  ;;  %v1448_v17 = vsel %vm524_vm14, %v1438_v30, %v3343_v39  ;;  %vm4171_vm5 = vcmp.lt.s32.totalorder %v2464_v51, 113 }
 0x3ba   :  { %v1491_v14 = vsel %vm4171_vm5, %v3345_v4, %v1484_v60  ;;  %v1452_v7 = vsel %vm2521_vm10, %v1447_v62, 0.0  ;;  %v1467_v2 = vadd.f32 %v1459_v38, %v1419_v8  ;;  %v1422_v63 = vadd.f32 %v1414_v29, %v1406_v46  ;;  %vm4173_vm13 = vmmov %vm4171_vm5  ;;  %v4178_v8 = vld [vmem:[#allocation12_spill] sm:$0xff] }
 0x3bb   :  { %v1453_v54 = vsel %vm2492_vm6, %v1444_v12, 0.0  ;;  %v1421_v37 = vadd.f32 %v1413_v16, %v1405_v11  ;;  %v1454_v21 = vsel %vm2521_vm10, %v1448_v17, 0.0  ;;  %v1495_v39 = vsel %vm4173_vm13, %v1484_v60, %v3345_v4  ;;  %v1486_v0 = vpop.permute.xlu0 %1485  ;;  %v1532_v1 = vpop.permute.xlu1 %1531  ;;  %vm4174_vm2 = vmmov %vm4171_vm5  ;;  %v4180_v12 = vld [vmem:[#allocation36_spill] sm:$0xff] }
 0x3bc   :  { %v1461_v61 = vmul.f32 %v1453_v54, %v4172_v25  ;;  %v1499_v20 = vsel %vm2482_vm3, %v1491_v14, 0.0  ;;  %v1500_v32 = vsel %vm2603_vm0, %v1495_v39, 0.0  ;;  %v1492_v49 = vsel %vm4174_vm2, %v3347_v44, %v1486_v0  ;;  %vm4176_vm12 = vmmov %vm4174_vm2  ;;  %v4183_v39 = vld [vmem:[#allocation14_spill] sm:$0xff] }
 0x3bd   :  { %v1460_v53 = vmul.f32 %v1452_v7, %v4170_v41  ;;  %v1507_v16 = vmul.f32 %v1499_v20, %v4175_v6  ;;  %v1496_v4 = vsel %vm4176_vm12, %v1486_v0, %v3347_v44  ;;  %v1462_v13 = vmul.f32 %v1454_v21, %v4172_v25 }
 0x3be   :  { %v1469_v22 = vadd.f32 %v1461_v61, %v1421_v37  ;;  %v1501_v62 = vsel %vm2482_vm3, %v1492_v49, 0.0  ;;  %v1502_v34 = vsel %vm2603_vm0, %v1496_v4, 0.0  ;;  %vm4177_vm9 = vcmp.lt.s32.totalorder %v2464_v51, 112 }
 0x3bf   :  { %v1539_v30 = vsel %vm4177_vm9, %v3349_v24, %v1532_v1  ;;  %v1508_v60 = vmul.f32 %v1500_v32, %v4175_v6  ;;  %v1515_v46 = vadd.f32 %v1507_v16, %v1467_v2  ;;  %v1509_v41 = vmul.f32 %v1501_v62, %v4178_v8  ;;  %v1534_v44 = vpop.permute.xlu0 %1533  ;;  %v1580_v29 = vpop.permute.xlu1 %1579  ;;  %vm4179_vm5 = vmmov %vm4177_vm9  ;;  %v4186_v16 = vld [vmem:[#allocation38_spill] sm:$0xff] }
 0x3c0   :  { %v1510_v38 = vmul.f32 %v1502_v34, %v4178_v8  ;;  %v1543_v11 = vsel %vm4179_vm5, %v1532_v1, %v3349_v24  ;;  %v1555_v17 = vmul.f32 %v1539_v30, %v4180_v12  ;;  %vm4181_vm13 = vmmov %vm4179_vm5  ;;  %v1468_v2 = vadd.f32 %v1460_v53, %v1420_v15 }
 0x3c1   :  { %v1540_v14 = vsel %vm4181_vm13, %v3351_v35, %v1534_v44  ;;  %vm4182_vm2 = vmmov %vm4179_vm5  ;;  %v1517_v54 = vadd.f32 %v1509_v41, %v1469_v22  ;;  %v1548_v37 = vsel %vm52_vm15, %v1543_v11, 0.0  ;;  %v1470_v25 = vadd.f32 %v1462_v13, %v1422_v63  ;;  %v4189_v41 = vld [vmem:[#allocation17_spill] sm:$0xff] }
 0x3c2   :  { %v1544_v7 = vsel %vm4182_vm2, %v1534_v44, %v3351_v35  ;;  %v1556_v24 = vmul.f32 %v1548_v37, %v4180_v12  ;;  %v1563_v61 = vadd.f32 %v1555_v17, %v1515_v46  ;;  %v1557_v0 = vmul.f32 %v1540_v14, %v4183_v39  ;;  %v4190_v12 = vld [vmem:[#allocation41_spill] sm:$0xff]  ;;  %v4194_v37 = vld [vmem:[#allocation42_spill] sm:$0xff] }
 0x3c3   :  { %v1550_v21 = vsel %vm52_vm15, %v1544_v7, 0.0  ;;  %vm4184_vm12 = vcmp.lt.s32.totalorder %v2464_v51, 111  ;;  %v1582_v20 = vpop.permute.xlu0 %1581  ;;  %v3517_v32 = vpop.permute.xlu1 %1223  ;;  %v1516_v49 = vadd.f32 %v1508_v60, %v1468_v2  ;;  %v1518_v63 = vadd.f32 %v1510_v38, %v1470_v25 }
 0x3c4   :  { %v1558_v1 = vmul.f32 %v1550_v21, %v4183_v39  ;;  %v1587_v35 = vsel %vm4184_vm12, %v3353_v40, %v1580_v29  ;;  %vm4185_vm9 = vmmov %vm4184_vm12  ;;  %v1565_v53 = vadd.f32 %v1557_v0, %v1517_v54  ;;  %vm4201_vm2 = vcmp.lt.s32.totalorder %v2464_v51, 16 }
 0x3c5   :  { %v1591_v15 = vsel %vm4185_vm9, %v1580_v29, %v3353_v40  ;;  %v1595_v22 = vsel %vm2492_vm6, %v1587_v35, 0.0  ;;  %vm4187_vm5 = vmmov %vm4185_vm9  ;;  %v1564_v62 = vadd.f32 %v1556_v24, %v1516_v49  ;;  %vm4203_vm9 = vcmp.ge.s32.totalorder %v2464_v51, 16 }
 0x3c6   :  { %v1596_v6 = vsel %vm2634_vm1, %v1591_v15, 0.0  ;;  %v1603_v4 = vmul.f32 %v1595_v22, %v4186_v16  ;;  %v1588_v13 = vsel %vm4187_vm5, %v3355_v33, %v1582_v20  ;;  %vm4188_vm13 = vmmov %vm4187_vm5  ;;  %v1566_v46 = vadd.f32 %v1558_v1, %v1518_v63 }
 0x3c7   :  { %v1592_v40 = vsel %vm4188_vm13, %v1582_v20, %v3355_v33  ;;  %v1604_v34 = vmul.f32 %v1596_v6, %v4186_v16  ;;  %v1597_v30 = vsel %vm2492_vm6, %v1588_v13, 0.0  ;;  %v3537_v29 = vpop.permute.xlu0 %1225  ;;  %v3539_v11 = vpop.permute.xlu1 %1271  ;;  %vm4202_vm12 = vmmov %vm4201_vm2  ;;  %vm4207_vm5 = vcmp.lt.s32.totalorder %v2464_v51, 15 }
 0x3c8   :  { %v1598_v60 = vsel %vm2634_vm1, %v1592_v40, 0.0  ;;  %v1611_v8 = vadd.f32 %v1603_v4, %v1563_v61  ;;  %v1605_v38 = vmul.f32 %v1597_v30, %v4189_v41  ;;  %vm4208_vm13 = vmmov %vm4203_vm9 }
 0x3c9   :  { %v1606_v44 = vmul.f32 %v1598_v60, %v4189_v41  ;;  %v1612_v33 = vadd.f32 %v1604_v34, %v1564_v62 }
 0x3ca   :  { %v3542_v17 = vadd.f32 %v1611_v8, %v4190_v12  ;;  %v1613_v14 = vadd.f32 %v1605_v38, %v1565_v53 }
 0x3cb   :  { %v1614_v7 = vadd.f32 %v1606_v44, %v1566_v46  ;;  %v3545_v2 = vadd.f32 %v1612_v33, %v4190_v12  ;;  %v3556_v24 = vpop.permute.xlu0 %1273  ;;  %v3558_v61 = vpop.permute.xlu1 %1319 }
 0x3cc   :  { %4191 = vst [vmem:[#allocation5_spill] sm:$0xff] %v3542_v17  ;;  %v3548_v54 = vmul.f32 0.70710677, %v3542_v17  ;;  %v3551_v21 = vadd.f32 %v1613_v14, %v4194_v37  ;;  %v3597_v17 = vmul.f32 %v3259_v19, %v4123_v26 }
 0x3cd   :  { %4192 = vst [vmem:[#allocation7_spill] sm:$0xff] %v3545_v2  ;;  %v3554_v25 = vadd.f32 %v1614_v7, %v4194_v37  ;;  %v3561_v39 = vmul.f32 0.70710677, %v3545_v2 }
 0x3ce   :  { %4193 = vst [vmem:[#allocation47_spill] sm:$0xff] %v3548_v54  ;;  %4195 = vst [vmem:[#allocation45_spill] sm:$0xff] %v3551_v21  ;;  %v1643_v0 = vand.u32 2147483647, %v3548_v54  ;;  %v3565_v1 = vmul.f32 0.70710677, %v3551_v21 }
 0x3cf   :  { %4196 = vst [vmem:[#allocation30_spill] sm:$0xff] %v3554_v25  ;;  %4197 = vst [vmem:[#allocation9_spill] sm:$0xff] %v3561_v39  ;;  %v1644_v35 = vand.u32 2147483647, %v3561_v39  ;;  %v3569_v15 = vmul.f32 0.70710677, %v3554_v25  ;;  %v3572_v63 = vpop.permute.xlu0 %1321  ;;  %v3574_v53 = vpop.permute.xlu1 %1367 }
 0x3d0   :  { %4198 = vst [vmem:[#allocation34_spill] sm:$0xff] %v3565_v1  ;;  %v1651_v20 = vmul.f32 0.3275911, %v1643_v0  ;;  %v1645_v49 = vand.u32 2147483647, %v3565_v1  ;;  %v4200_v25 = vld [vmem:[#allocation32_spill] sm:$0xff] }
 0x3d1   :  { %4199 = vst [vmem:[#allocation11_spill] sm:$0xff] %v3569_v15  ;;  %v1652_v22 = vmul.f32 0.3275911, %v1644_v35  ;;  %v1646_v6 = vand.u32 2147483647, %v3569_v15  ;;  %v1772_v41 = vmul.f32 %v1644_v35, %v1644_v35  ;;  %v3607_v2 = vmul.f32 %v3266_v28, %v4200_v25 }
 0x3d2   :  { %v1659_v16 = vadd.f32 1.0, %v1651_v20  ;;  %v1653_v4 = vmul.f32 0.3275911, %v1645_v49 }
 0x3d3   :  { %v1660_v13 = vadd.f32 1.0, %v1652_v22  ;;  %v1654_v40 = vmul.f32 0.3275911, %v1646_v6  ;;  %v3577_v34 = vpop.permute.xlu0 %1369  ;;  %v3579_v30 = vpop.permute.xlu1 %1431  ;;  %v1774_v38 = vmul.f32 %v1646_v6, %v1646_v6  ;;  %v1780_v12 = vsub.f32 0.0, %v1772_v41 }
 0x3d4   :  { %2052 = vrcp.f32 %v1659_v16  ;;  %v1661_v62 = vadd.f32 1.0, %v1653_v4  ;;  %v3589_v4 = vmul.f32 %v1643_v0, %v1643_v0  ;;  %v3601_v41 = vmul.f32 %v3297_v10, %v4123_v26 }
 0x3d5   :  { %2054 = vrcp.f32 %v1660_v13  ;;  %v1662_v60 = vadd.f32 1.0, %v1654_v40  ;;  %v1782_v20 = vsub.f32 0.0, %v1774_v38  ;;  %v1789_v35 = vmul.f32 1.442695, %v1780_v12 }
 0x3d6   :  { %2056 = vrcp.f32 %v1661_v62  ;;  %v3616_v26 = vmul.f32 %v3304_v27, %v4200_v25 }
 0x3d7   :  { %v3581_v46 = vpop.permute.xlu0 %1433  ;;  %v3583_v8 = vpop.permute.xlu1 %1479  ;;  %2058 = vrcp.f32 %v1662_v60  ;;  %v1793_v38 = vmul.f32 1.442695, %v1782_v20 }
 0x3d8   :  { %2060 = vpow2.f32 %v1789_v35 }
 0x3d9   :  { %2062 = vpow2.f32 %v1793_v38 }
 0x3db   :  { %v3585_v44 = vpop.permute.xlu0 %1481  ;;  %v3587_v33 = vpop.permute.xlu1 %1527 }
 0x3de   :  { %v2053_v14 = vpop.eup %2052 }
 0x3df   :  { %v2055_v7 = vpop.eup %2054  ;;  %v1675_v37 = vmul.f32 %v2053_v14, %v1659_v16  ;;  %v3591_v40 = vpop.permute.xlu0 %1529 }
 0x3e0   :  { %v1676_v22 = vmul.f32 %v2055_v7, %v1660_v13  ;;  %v3593_v1 = vpop.permute.xlu1 %1575  ;;  %v2057_v54 = vpop.eup %2056 }
 0x3e1   :  { %v1683_v21 = vsub.f32 2.0, %v1675_v37  ;;  %v2059_v16 = vpop.eup %2058  ;;  %v1677_v0 = vmul.f32 %v2057_v54, %v1661_v62 }
 0x3e2   :  { %v1684_v6 = vsub.f32 2.0, %v1676_v22  ;;  %v1678_v22 = vmul.f32 %v2059_v16, %v1662_v60 }
 0x3e3   :  { %v3603_v13 = vmul.f32 %v2053_v14, %v1683_v21  ;;  %v3612_v19 = vpop.permute.xlu0 %1577  ;;  %v1685_v10 = vsub.f32 2.0, %v1677_v0 }
 0x3e4   :  { %v3609_v12 = vmul.f32 %v2055_v7, %v1684_v6  ;;  %v1232_v15 = vpop.permute.xlu1 %1231  ;;  %v1686_v62 = vsub.f32 2.0, %v1678_v22  ;;  %v3631_v7 = vmul.f32 %v1645_v49, %v1645_v49 }
 0x3e5   :  { %v1237_v21 = vsel %vm212_vm4, %v3517_v32, %v1232_v15  ;;  %v1241_v28 = vsel %vm212_vm4, %v1232_v15, %v3517_v32  ;;  %v3629_v25 = vmul.f32 %v2057_v54, %v1685_v10  ;;  %v1699_v20 = vmul.f32 1.0614054, %v3603_v13 }
 0x3e6   :  { %v1247_v60 = vsel %vm2504_vm8, %v1241_v28, 0.0  ;;  %v1248_v14 = vsel %vm2496_vm7, %v1237_v21, 0.0  ;;  %v1700_v27 = vmul.f32 1.0614054, %v3609_v12  ;;  %v3634_v35 = vmul.f32 %v2059_v16, %v1686_v62  ;;  %v4204_v28 = vld [vmem:[#allocation3_spill] sm:$0xff] }
 0x3e7   :  { %v1255_v32 = vmul.f32 %v1247_v60, %v2294_v56  ;;  %v1256_v15 = vmul.f32 %v1248_v14, %v2294_v56  ;;  %v1234_v6 = vpop.permute.xlu0 %1233 }
 0x3e8   :  { %v1280_v0 = vpop.permute.xlu1 %1279  ;;  %v1708_v22 = vadd.f32 -1.4531521, %v1700_v27  ;;  %v1238_v21 = vsel %vm212_vm4, %v3537_v29, %v1234_v6  ;;  %v1242_v54 = vsel %vm212_vm4, %v1234_v6, %v3537_v29  ;;  %v1702_v14 = vmul.f32 1.0614054, %v3634_v35  ;;  %vm4205_vm4 = vmmov %vm4201_vm2 }
 0x3e9   :  { %v1285_v49 = vsel %vm4201_vm2, %v3539_v11, %v1280_v0  ;;  %v1289_v16 = vsel %vm4202_vm12, %v1280_v0, %v3539_v11  ;;  %v1249_v56 = vsel %vm2504_vm8, %v1242_v54, 0.0  ;;  %v1250_v38 = vsel %vm2496_vm7, %v1238_v21, 0.0  ;;  %vm4206_vm8 = vmmov %vm4201_vm2 }
 0x3ea   :  { %v1295_v10 = vsel %vm4203_vm9, %v1289_v16, 0.0  ;;  %v1304_v62 = vmul.f32 %v1285_v49, %v4204_v28  ;;  %v1257_v29 = vmul.f32 %v1249_v56, %v2303_v59  ;;  %v3660_v27 = vadd.f32 -1.4531521, %v1699_v20  ;;  %vm4210_vm2 = vmmov %vm4207_vm5 }
 0x3eb   :  { %v1303_v60 = vmul.f32 %v1295_v10, %v4204_v28  ;;  %v1258_v11 = vmul.f32 %v1250_v38, %v2303_v59  ;;  %v1282_v6 = vpop.permute.xlu0 %1281  ;;  %v1716_v21 = vmul.f32 %v1708_v22, %v3609_v12  ;;  %v1701_v54 = vmul.f32 1.0614054, %v3629_v25  ;;  %v3682_v10 = vpop.eup %2060  ;;  %vm4212_vm12 = vmmov %vm4210_vm2 }
 0x3ec   :  { %v1312_v43 = vadd.f32 %v1304_v62, %v1256_v15  ;;  %v1328_v0 = vpop.permute.xlu1 %1327  ;;  %v1286_v49 = vsel %vm4205_vm4, %v3556_v24, %v1282_v6  ;;  %v1290_v56 = vsel %vm4206_vm8, %v1282_v6, %v3556_v24  ;;  %v4209_v15 = vld [vmem:[#allocation25_spill] sm:$0xff]  ;;  %4211 = vst [vmem:[#allocation46_spill] sm:$0xff] %v3682_v10  ;;  %vm4213_vm9 = vmmov %vm4210_vm2  ;;  %vm4214_vm4 = vcmp.lt.s32.totalorder %v2464_v51, 1 }
 0x3ed   :  { %v1311_v16 = vadd.f32 %v1303_v60, %v1255_v32  ;;  %v1333_v59 = vsel %vm4207_vm5, %v3558_v61, %v1328_v0  ;;  %v1297_v20 = vsel %vm4208_vm13, %v1290_v56, 0.0  ;;  %v1306_v22 = vmul.f32 %v1286_v49, %v4209_v15  ;;  %vm4215_vm8 = vmmov %vm4214_vm4 }
 0x3ee   :  { %v1337_v32 = vsel %vm4210_vm2, %v1328_v0, %v3558_v61  ;;  %v1344_v38 = vsel %vm2521_vm10, %v1333_v59, 0.0  ;;  %v1305_v24 = vmul.f32 %v1297_v20, %v4209_v15  ;;  %v1710_v60 = vadd.f32 -1.4531521, %v1702_v14  ;;  %v3691_v0 = vpop.eup %2062  ;;  %vm4217_vm5 = vmmov %vm4214_vm4 }
 0x3ef   :  { %v1343_v28 = vsel %vm2529_vm11, %v1337_v32, 0.0  ;;  %v1352_v62 = vmul.f32 %v1344_v38, %v4116_v3  ;;  %v1314_v6 = vadd.f32 %v1306_v22, %v1258_v11  ;;  %v1330_v56 = vpop.permute.xlu0 %1329  ;;  %v1724_v39 = vadd.f32 1.4214138, %v1716_v21 }
 0x3f0   :  { %v1351_v49 = vmul.f32 %v1343_v28, %v4116_v3  ;;  %v1376_v37 = vpop.permute.xlu1 %1375  ;;  %v3689_v61 = vadd.f32 -1.4531521, %v1701_v54  ;;  %v1313_v59 = vadd.f32 %v1305_v24, %v1257_v29  ;;  %v1334_v20 = vsel %vm4212_vm12, %v3572_v63, %v1330_v56 }
 0x3f1   :  { %v1360_v10 = vadd.f32 %v1352_v62, %v1312_v43  ;;  %v1338_v14 = vsel %vm4213_vm9, %v1330_v56, %v3572_v63  ;;  %v1346_v21 = vsel %vm2521_vm10, %v1334_v20, 0.0  ;;  %v1381_v29 = vsel %vm4214_vm4, %v3574_v53, %v1376_v37 }
 0x3f2   :  { %v1359_v11 = vadd.f32 %v1351_v49, %v1311_v16  ;;  %v1345_v3 = vsel %vm2529_vm11, %v1338_v14, 0.0  ;;  %v1354_v54 = vmul.f32 %v1346_v21, %v4100_v58  ;;  %v1385_v15 = vsel %vm4215_vm8, %v1376_v37, %v3574_v53  ;;  %vm4216_vm11 = vmmov %vm4214_vm4 }
 0x3f3   :  { %v1353_v43 = vmul.f32 %v1345_v3, %v4100_v58  ;;  %v1392_v63 = vsel %vm2496_vm7, %v1381_v29, 0.0  ;;  %v1391_v23 = vsel %vm2482_vm3, %v1385_v15, 0.0  ;;  %v1378_v22 = vpop.permute.xlu0 %1377  ;;  %v3717_v38 = vmul.f32 %v1710_v60, %v3634_v35 }
 0x3f4   :  { %v1400_v16 = vmul.f32 %v1392_v63, %v4117_v48  ;;  %v1440_v32 = vpop.permute.xlu1 %1439  ;;  %v3720_v24 = vmul.f32 %v1724_v39, %v3609_v12  ;;  %v1362_v28 = vadd.f32 %v1354_v54, %v1314_v6  ;;  %v1399_v53 = vmul.f32 %v1391_v23, %v4117_v48 }
 0x3f5   :  { %v1361_v58 = vadd.f32 %v1353_v43, %v1313_v59  ;;  %v1382_v37 = vsel %vm4216_vm11, %v3577_v34, %v1378_v22  ;;  %v1386_v49 = vsel %vm4217_vm5, %v1378_v22, %v3577_v34  ;;  %v1445_v39 = vsel %vm524_vm14, %v3579_v30, %v1440_v32 }
 0x3f6   :  { %v1408_v62 = vadd.f32 %v1400_v16, %v1360_v10  ;;  %v1394_v60 = vsel %vm2496_vm7, %v1382_v37, 0.0  ;;  %v1407_v56 = vadd.f32 %v1399_v53, %v1359_v11  ;;  %v1393_v48 = vsel %vm2482_vm3, %v1386_v49, 0.0 }
 0x3f7   :  { %v1402_v6 = vmul.f32 %v1394_v60, %v4104_v36  ;;  %v1449_v10 = vsel %vm524_vm14, %v1440_v32, %v3579_v30  ;;  %v1401_v59 = vmul.f32 %v1393_v48, %v4104_v36  ;;  %v1455_v18 = vsel %vm2492_vm6, %v1445_v39, 0.0  ;;  %v1442_v14 = vpop.permute.xlu0 %1441 }
 0x3f8   :  { %v1424_v34 = vadd.f32 %v3601_v41, %v1408_v62  ;;  %v1456_v20 = vsel %vm2521_vm10, %v1449_v10, 0.0  ;;  %v1488_v11 = vpop.permute.xlu1 %1487  ;;  %v1423_v21 = vadd.f32 %v3597_v17, %v1407_v56  ;;  %v1463_v29 = vmul.f32 %v1455_v18, %v4125_v52 }
 0x3f9   :  { %v1410_v3 = vadd.f32 %v1402_v6, %v1362_v28  ;;  %v1464_v43 = vmul.f32 %v1456_v20, %v4125_v52  ;;  %v1409_v30 = vadd.f32 %v1401_v59, %v1361_v58  ;;  %v1446_v36 = vsel %vm524_vm14, %v3581_v46, %v1442_v14 }
 0x3fa   :  { %v1450_v41 = vsel %vm524_vm14, %v1442_v14, %v3581_v46  ;;  %vm4218_vm7 = vcmp.lt.s32.totalorder %v2464_v51, 113  ;;  %v1471_v15 = vadd.f32 %v1463_v29, %v1423_v21  ;;  %v1457_v52 = vsel %vm2492_vm6, %v1446_v36, 0.0  ;;  %v4227_v21 = vld [vmem:[#allocation39_spill] sm:$0xff] }
 0x3fb   :  { %v1493_v54 = vsel %vm4218_vm7, %v3583_v8, %v1488_v11  ;;  %v1472_v63 = vadd.f32 %v1464_v43, %v1424_v34  ;;  %v1426_v17 = vadd.f32 %v3616_v26, %v1410_v3  ;;  %v1425_v23 = vadd.f32 %v3607_v2, %v1409_v30  ;;  %vm4219_vm14 = vmmov %vm4218_vm7  ;;  %v1490_v32 = vpop.permute.xlu0 %1489 }
 0x3fc   :  { %v1458_v16 = vsel %vm2521_vm10, %v1450_v41, 0.0  ;;  %v1465_v22 = vmul.f32 %v1457_v52, %v4109_v9  ;;  %v1497_v46 = vsel %vm4219_vm14, %v1488_v11, %v3583_v8  ;;  %v1536_v58 = vpop.permute.xlu1 %1535  ;;  %v1503_v26 = vsel %vm2482_vm3, %v1493_v54, 0.0  ;;  %vm4220_vm13 = vmmov %vm4218_vm7 }
 0x3fd   :  { %v1466_v28 = vmul.f32 %v1458_v16, %v4109_v9  ;;  %v1504_v53 = vsel %vm2603_vm0, %v1497_v46, 0.0  ;;  %v1494_v31 = vsel %vm4220_vm13, %v3585_v44, %v1490_v32  ;;  %v1511_v37 = vmul.f32 %v1503_v26, %v4129_v47  ;;  %vm4221_vm10 = vmmov %vm4218_vm7 }
 0x3fe   :  { %v1473_v2 = vadd.f32 %v1465_v22, %v1425_v23  ;;  %v1512_v62 = vmul.f32 %v1504_v53, %v4129_v47  ;;  %v1498_v8 = vsel %vm4221_vm10, %v1490_v32, %v3585_v44  ;;  %v1505_v49 = vsel %vm2482_vm3, %v1494_v31, 0.0  ;;  %v4230_v23 = vld [vmem:[#allocation40_spill] sm:$0xff] }
 0x3ff   :  { %v1474_v9 = vadd.f32 %v1466_v28, %v1426_v17  ;;  %v1506_v60 = vsel %vm2603_vm0, %v1498_v8, 0.0  ;;  %vm4222_vm2 = vcmp.lt.s32.totalorder %v2464_v51, 112  ;;  %v1519_v56 = vadd.f32 %v1511_v37, %v1471_v15  ;;  %v1538_v10 = vpop.permute.xlu0 %1537  ;;  %v4233_v28 = vld [vmem:[#allocation19_spill] sm:$0xff] }
 0x400   :  { %v1541_v39 = vsel %vm4222_vm2, %v3587_v33, %v1536_v58  ;;  %v1520_v48 = vadd.f32 %v1512_v62, %v1472_v63  ;;  %v1513_v6 = vmul.f32 %v1505_v49, %v4114_v5  ;;  %v1514_v47 = vmul.f32 %v1506_v60, %v4114_v5  ;;  %vm4223_vm12 = vmmov %vm4222_vm2  ;;  %v1584_v18 = vpop.permute.xlu1 %1583  ;;  %v4234_v37 = vld [vmem:[#allocation27_spill] sm:$0xff] }
 0x401   :  { %v1545_v44 = vsel %vm4223_vm12, %v1536_v58, %v3587_v33  ;;  %v1559_v59 = vmul.f32 %v1541_v39, %v4224_v42  ;;  %vm4225_vm0 = vmmov %vm4222_vm2  ;;  %vm4228_vm9 = vcmp.lt.s32.totalorder %v2464_v51, 111  ;;  %v1726_v41 = vadd.f32 1.4214138, %v3717_v38 }
 0x402   :  { %v1542_v57 = vsel %vm4225_vm0, %v3591_v40, %v1538_v10  ;;  %vm4226_vm3 = vmmov %vm4225_vm0  ;;  %v1521_v20 = vadd.f32 %v1513_v6, %v1473_v2  ;;  %v1522_v14 = vadd.f32 %v1514_v47, %v1474_v9  ;;  %v1552_v5 = vsel %vm52_vm15, %v1545_v44, 0.0 }
 0x403   :  { %v1546_v34 = vsel %vm4226_vm3, %v1538_v10, %v3591_v40  ;;  %v1560_v33 = vmul.f32 %v1552_v5, %v4224_v42  ;;  %v1567_v3 = vadd.f32 %v1559_v59, %v1519_v56  ;;  %v1561_v29 = vmul.f32 %v1542_v57, %v4227_v21  ;;  %vm4229_vm4 = vmmov %vm4228_vm9  ;;  %v1586_v36 = vpop.permute.xlu0 %1585 }
 0x404   :  { %v1554_v11 = vsel %vm52_vm15, %v1546_v34, 0.0  ;;  %v1589_v40 = vsel %vm4228_vm9, %v3593_v1, %v1584_v18  ;;  %v1593_v30 = vsel %vm4229_vm4, %v1584_v18, %v3593_v1  ;;  %v1740_v55 = vadd.f32 -0.28449672, %v3720_v24  ;;  %vm4231_vm15 = vmmov %vm4229_vm4 }
 0x405   :  { %v1562_v43 = vmul.f32 %v1554_v11, %v4227_v21  ;;  %v1568_v54 = vadd.f32 %v1560_v33, %v1520_v48  ;;  %v1569_v15 = vadd.f32 %v1561_v29, %v1521_v20  ;;  %v1599_v17 = vsel %vm2492_vm6, %v1589_v40, 0.0  ;;  %vm4232_vm8 = vmmov %vm4229_vm4  ;;  %v4237_v29 = vld [vmem:[#allocation46_spill] sm:$0xff] }
 0x406   :  { %v1600_v52 = vsel %vm2634_vm1, %v1593_v30, 0.0  ;;  %v1607_v16 = vmul.f32 %v1599_v17, %v4230_v23  ;;  %v1590_v1 = vsel %vm4231_vm15, %v3612_v19, %v1586_v36  ;;  %v1594_v38 = vsel %vm4232_vm8, %v1586_v36, %v3612_v19 }
 0x407   :  { %v1570_v63 = vadd.f32 %v1562_v43, %v1522_v14  ;;  %v1608_v24 = vmul.f32 %v1600_v52, %v4230_v23  ;;  %v1601_v22 = vsel %vm2492_vm6, %v1590_v1, 0.0  ;;  %v1602_v46 = vsel %vm2634_vm1, %v1594_v38, 0.0  ;;  %v4238_v23 = vld [vmem:[#allocation9_spill] sm:$0xff]  ;;  %v4239_v1 = vld [vmem:[#allocation11_spill] sm:$0xff] }
 0x408   :  { %v1734_v32 = vmul.f32 %v1726_v41, %v3634_v35  ;;  %v1615_v58 = vadd.f32 %v1607_v16, %v1567_v3  ;;  %v1609_v26 = vmul.f32 %v1601_v22, %v4233_v28  ;;  %v1610_v53 = vmul.f32 %v1602_v46, %v4233_v28  ;;  %v4240_v46 = vld [vmem:[#allocation7_spill] sm:$0xff] }
 0x409   :  { %v1748_v31 = vmul.f32 %v1740_v55, %v3609_v12  ;;  %v1781_v51 = vsub.f32 0.0, %v3631_v7  ;;  %v1616_v19 = vadd.f32 %v1608_v24, %v1568_v54  ;;  %v1715_v45 = vmul.f32 %v3660_v27, %v3603_v13  ;;  %v4236_v27 = vld [vmem:[#allocation29_spill] sm:$0xff] }
 0x40a   :  { %v1742_v2 = vadd.f32 -0.28449672, %v1734_v32  ;;  %v3839_v62 = vadd.f32 %v1615_v58, %v4234_v37  ;;  %v1617_v50 = vadd.f32 %v1609_v26, %v1569_v15  ;;  %v1618_v8 = vadd.f32 %v1610_v53, %v1570_v63  ;;  %v4241_v53 = vld [vmem:[#allocation30_spill] sm:$0xff] }
 0x40b   :  { %v1756_v9 = vadd.f32 0.2548296, %v1748_v31  ;;  %v3842_v49 = vadd.f32 %v1616_v19, %v4234_v37  ;;  %v1717_v39 = vmul.f32 %v3689_v61, %v3629_v25  ;;  %v4235_v7 = vsub.f32 0.0, %v3589_v4 }
 0x40c   :  { %v1750_v60 = vmul.f32 %v1742_v2, %v3634_v35  ;;  %v3850_v48 = vmul.f32 0.70710677, %v3839_v62  ;;  %v3853_v6 = vadd.f32 %v1617_v50, %v4236_v27  ;;  %v3856_v47 = vadd.f32 %v1618_v8, %v4236_v27 }
 0x40d   :  { %v1787_v56 = vmul.f32 1.442695, %v4235_v7  ;;  %v1791_v10 = vmul.f32 1.442695, %v1781_v51  ;;  %v3859_v44 = vmul.f32 0.70710677, %v3842_v49  ;;  %v1764_v4 = vmul.f32 %v1756_v9, %v3609_v12 }
 0x40e   :  { %v1758_v42 = vadd.f32 0.2548296, %v1750_v60  ;;  %v1647_v59 = vand.u32 2147483647, %v3850_v48  ;;  %v3863_v61 = vmul.f32 0.70710677, %v3853_v6 }
 0x40f   :  { %v1723_v57 = vadd.f32 1.4214138, %v1715_v45  ;;  %v1648_v34 = vand.u32 2147483647, %v3859_v44  ;;  %v3868_v18 = vmul.f32 0.70710677, %v3856_v47  ;;  %2064 = vpow2.f32 %v1787_v56 }
 0x410   :  { %v1766_v20 = vmul.f32 %v1758_v42, %v3634_v35  ;;  %v1725_v14 = vadd.f32 1.4214138, %v1717_v39  ;;  %v1655_v5 = vmul.f32 0.3275911, %v1647_v59  ;;  %v1649_v11 = vand.u32 2147483647, %v3863_v61 }
 0x411   :  { %2066 = vpow2.f32 %v1791_v10  ;;  %v1656_v33 = vmul.f32 0.3275911, %v1648_v34  ;;  %v3873_v3 = vand.u32 2147483647, %v3868_v18  ;;  %v1804_v43 = vmul.f32 %v4237_v29, %v1764_v4  ;;  %v4242_v4 = vld [vmem:[#allocation5_spill] sm:$0xff] }
 0x412   :  { %v1663_v21 = vadd.f32 1.0, %v1655_v5  ;;  %v1657_v12 = vmul.f32 0.3275911, %v1649_v11  ;;  %v1806_v40 = vmul.f32 %v3691_v0, %v1766_v20  ;;  %v1731_v35 = vmul.f32 %v1723_v57, %v3603_v13  ;;  %v4243_v20 = vld [vmem:[#allocation47_spill] sm:$0xff] }
 0x413   :  { %v1664_v30 = vadd.f32 1.0, %v1656_v33  ;;  %v1658_v36 = vmul.f32 0.3275911, %v3873_v3  ;;  %v1733_v41 = vmul.f32 %v1725_v14, %v3629_v25  ;;  %v1812_v15 = vsub.f32 1.0, %v1804_v43  ;;  %v4244_v33 = vld [vmem:[#allocation45_spill] sm:$0xff] }
 0x414   :  { %2068 = vrcp.f32 %v1663_v21  ;;  %v1665_v55 = vadd.f32 1.0, %v1657_v12  ;;  %v1814_v63 = vsub.f32 1.0, %v1806_v40  ;;  %v1739_v17 = vadd.f32 -0.28449672, %v1731_v35  ;;  %v4245_v40 = vld [vmem:[#allocation34_spill] sm:$0xff] }
 0x415   :  { %2070 = vrcp.f32 %v1664_v30  ;;  %v1666_v54 = vadd.f32 1.0, %v1658_v36  ;;  %v1741_v52 = vadd.f32 -0.28449672, %v1733_v41  ;;  %vm1820_vm1 = vcmp.lt.f32.partialorder %v4238_v23, 0.0 }
 0x416   :  { %2072 = vrcp.f32 %v1665_v55  ;;  %v1828_v16 = vsub.f32 0.0, %v1812_v15  ;;  %v1830_v0 = vsub.f32 0.0, %v1814_v63  ;;  %vm1822_vm6 = vcmp.lt.f32.partialorder %v4239_v1, 0.0 }
 0x417   :  { %2074 = vrcp.f32 %v1666_v54  ;;  %v1747_v38 = vmul.f32 %v1739_v17, %v3603_v13  ;;  %v1749_v24 = vmul.f32 %v1741_v52, %v3629_v25  ;;  %v1628_v32 = vmul.f32 0.5, %v4240_v46 }
 0x418   :  { %v1836_v58 = vsel %vm1820_vm1, %v1828_v16, %v1812_v15  ;;  %v1838_v28 = vsel %vm1822_vm6, %v1830_v0, %v1814_v63  ;;  %v1630_v31 = vmul.f32 0.5, %v4241_v53  ;;  %v1775_v37 = vmul.f32 %v1647_v59, %v1647_v59 }
 0x419   :  { %v2065_v22 = vpop.eup %2064  ;;  %v1844_v51 = vadd.f32 1.0, %v1836_v58  ;;  %v1846_v19 = vadd.f32 1.0, %v1838_v28  ;;  %v1755_v2 = vadd.f32 0.2548296, %v1747_v38  ;;  %v1757_v45 = vadd.f32 0.2548296, %v1749_v24 }
 0x41a   :  { %v1776_v27 = vmul.f32 %v1648_v34, %v1648_v34  ;;  %v1627_v57 = vmul.f32 0.5, %v4242_v4  ;;  %vm1819_vm11 = vcmp.lt.f32.partialorder %v4243_v20, 0.0  ;;  %v1629_v59 = vmul.f32 0.5, %v4244_v33 }
 0x41b   :  { %v2067_v26 = vpop.eup %2066  ;;  %v1852_v50 = vmul.f32 %v1844_v51, %v1628_v32  ;;  %v1854_v8 = vmul.f32 %v1846_v19, %v1630_v31  ;;  %v1763_v9 = vmul.f32 %v1755_v2, %v3603_v13  ;;  %v1765_v39 = vmul.f32 %v1757_v45, %v3629_v25 }
 0x41c   :  { %v1783_v29 = vsub.f32 0.0, %v1775_v37  ;;  %vm1821_vm5 = vcmp.lt.f32.partialorder %v4245_v40, 0.0  ;;  %v1784_v41 = vsub.f32 0.0, %v1776_v27  ;;  %v1778_v52 = vmul.f32 %v3873_v3, %v3873_v3 }
 0x41d   :  { %v1966_v10 = vpack.c.bf16 %v1854_v8, %v1852_v50  ;;  %v1803_v42 = vmul.f32 %v2065_v22, %v1763_v9  ;;  %v1805_v5 = vmul.f32 %v2067_v26, %v1765_v39  ;;  %vm1823_vm7 = vcmp.lt.f32.partialorder %v3850_v48, 0.0 }
 0x41e   :  { %v2069_v60 = vpop.eup %2068  ;;  %v1795_v16 = vmul.f32 1.442695, %v1783_v29  ;;  %v1797_v28 = vmul.f32 1.442695, %v1784_v41  ;;  %v1786_v3 = vsub.f32 0.0, %v1778_v52  ;;  %vm1824_vm14 = vcmp.lt.f32.partialorder %v3859_v44, 0.0 }
 0x41f   :  { %v2071_v7 = vpop.eup %2070  ;;  %v1679_v56 = vmul.f32 %v2069_v60, %v1663_v21  ;;  %1967 = vmatprep.subr.bf16.mxu0 %v1966_v10  ;;  %v1811_v13 = vsub.f32 1.0, %v1803_v42  ;;  %v1777_v21 = vmul.f32 %v1649_v11, %v1649_v11  ;;  %v1813_v34 = vsub.f32 1.0, %v1805_v5 }
 0x420   :  { %v1680_v14 = vmul.f32 %v2071_v7, %v1664_v30  ;;  %v2073_v43 = vpop.eup %2072  ;;  %2076 = vpow2.f32 %v1795_v16  ;;  %vm1825_vm13 = vcmp.lt.f32.partialorder %v3863_v61, 0.0  ;;  %vm1826_vm10 = vcmp.lt.f32.partialorder %v3868_v18, 0.0 }
 0x421   :  { %v1687_v12 = vsub.f32 2.0, %v1679_v56  ;;  %v2075_v36 = vpop.eup %2074  ;;  %v1681_v15 = vmul.f32 %v2073_v43, %v1665_v55  ;;  %v1827_v63 = vsub.f32 0.0, %v1811_v13  ;;  %v1829_v23 = vsub.f32 0.0, %v1813_v34 }
 0x422   :  { %v1688_v25 = vsub.f32 2.0, %v1680_v14  ;;  %v1682_v30 = vmul.f32 %v2075_v36, %v1666_v54  ;;  %v1785_v32 = vsub.f32 0.0, %v1777_v21  ;;  %2078 = vpow2.f32 %v1797_v28 }
 0x423   :  { %v1695_v35 = vmul.f32 %v2069_v60, %v1687_v12  ;;  %v1689_v0 = vsub.f32 2.0, %v1681_v15  ;;  %v1835_v1 = vsel %vm1819_vm11, %v1827_v63, %v1811_v13  ;;  %v1837_v11 = vsel %vm1821_vm5, %v1829_v23, %v1813_v34 }
 0x424   :  { %v1696_v17 = vmul.f32 %v2071_v7, %v1688_v25  ;;  %v1690_v24 = vsub.f32 2.0, %v1682_v30  ;;  %v1843_v22 = vadd.f32 1.0, %v1835_v1  ;;  %v1845_v58 = vadd.f32 1.0, %v1837_v11 }
 0x425   :  { %v1703_v38 = vmul.f32 1.0614054, %v1695_v35  ;;  %v1697_v55 = vmul.f32 %v2073_v43, %v1689_v0  ;;  %v1799_v60 = vmul.f32 1.442695, %v1785_v32  ;;  %v1801_v56 = vmul.f32 1.442695, %v1786_v3 }
 0x426   :  { %v1704_v46 = vmul.f32 1.0614054, %v1696_v17  ;;  %v1698_v26 = vmul.f32 %v2075_v36, %v1690_v24  ;;  %v1851_v31 = vmul.f32 %v1843_v22, %v1627_v57  ;;  %v1853_v51 = vmul.f32 %v1845_v58, %v1629_v59 }
 0x427   :  { %v1711_v54 = vadd.f32 -1.4531521, %v1703_v38  ;;  %v1705_v19 = vmul.f32 1.0614054, %v1697_v55  ;;  %2080 = vpow2.f32 %v1799_v60  ;;  %v1633_v48 = vmul.f32 0.5, %v3853_v6  ;;  %v1047_v6 = vpop.permute.xlu1 %1046 }
 0x428   :  { %v1712_v53 = vadd.f32 -1.4531521, %v1704_v46  ;;  %v1706_v45 = vmul.f32 1.0614054, %v1698_v26  ;;  %v1968_v50 = vpack.c.bf16 %v1853_v51, %v1851_v31  ;;  %2082 = vpow2.f32 %v1801_v56 }
 0x429   :  { %v1719_v2 = vmul.f32 %v1711_v54, %v1695_v35  ;;  %v1713_v8 = vadd.f32 -1.4531521, %v1705_v19  ;;  %v1631_v19 = vmul.f32 0.5, %v3839_v62  ;;  %v1632_v44 = vmul.f32 0.5, %v3842_v49  ;;  %v2090_v62 = vld [vmem:[%s3925_s5] sm:$0xf] }
 0x42a   :  { %v1720_v37 = vmul.f32 %v1712_v53, %v1696_v17  ;;  %v1714_v39 = vadd.f32 -1.4531521, %v1706_v45  ;;  %1969 = vmatpush1.bf16.msra.mxu0 %v1968_v50  ;;  %v2077_v36 = vpop.eup %2076  ;;  %vm4246_vm2 = vcmask 261120   ;;  %vm4249_vm12 = vcmask 1043456  }
 0x42b   :  { %v1727_v9 = vadd.f32 1.4214138, %v1719_v2  ;;  %v1721_v27 = vmul.f32 %v1713_v8, %v1697_v55  ;;  %vm4250_vm0 = vmmov %vm4249_vm12 }
 0x42c   :  { %v1728_v7 = vadd.f32 1.4214138, %v1720_v37  ;;  %v1722_v42 = vmul.f32 %v1714_v39, %v1698_v26  ;;  %v2079_v63 = vpop.eup %2078  ;;  %v1634_v37 = vmul.f32 0.5, %v3856_v47 }
 0x42d   :  { %v1735_v10 = vmul.f32 %v1727_v9, %v1695_v35  ;;  %v1729_v57 = vadd.f32 1.4214138, %v1721_v27  ;;  %v4247_v27 = vld [vmem:[#allocation35_spill] sm:$0xff] }
 0x42e   :  { %v1736_v4 = vmul.f32 %v1728_v7, %v1696_v17  ;;  %v1730_v14 = vadd.f32 1.4214138, %v1722_v42 }
 0x42f   :  { %v1743_v20 = vadd.f32 -0.28449672, %v1735_v10  ;;  %v1737_v33 = vmul.f32 %v1729_v57, %v1697_v55  ;;  %v1120_v10 = vadd.f32 %v4247_v27, %v1047_v6 }
 0x430   :  { %v1744_v5 = vadd.f32 -0.28449672, %v1736_v4  ;;  %v1738_v12 = vmul.f32 %v1730_v14, %v1698_v26  ;;  %v4248_v4 = vld [vmem:[#allocation37_spill] sm:$0xff] }
 0x431   :  { %v1751_v59 = vmul.f32 %v1743_v20, %v1695_v35  ;;  %v1745_v13 = vadd.f32 -0.28449672, %v1737_v33  ;;  %v2081_v38 = vpop.eup %2080  ;;  %v1122_v57 = vadd.f32 %v4248_v4, %v1047_v6 }
 0x432   :  { %v1752_v29 = vmul.f32 %v1744_v5, %v1696_v17  ;;  %v1746_v40 = vadd.f32 -0.28449672, %v1738_v12  ;;  %v2083_v22 = vpop.eup %2082 }
 0x433   :  { %v1759_v43 = vadd.f32 0.2548296, %v1751_v59  ;;  %v1753_v21 = vmul.f32 %v1745_v13, %v1697_v55 }
 0x434   :  { %v1760_v25 = vadd.f32 0.2548296, %v1752_v29  ;;  %v1754_v41 = vmul.f32 %v1746_v40, %v1698_v26 }
 0x435   :  { %v1767_v34 = vmul.f32 %v1759_v43, %v1695_v35  ;;  %v1761_v30 = vadd.f32 0.2548296, %v1753_v21 }
 0x436   :  { %v1768_v15 = vmul.f32 %v1760_v25, %v1696_v17  ;;  %v1762_v23 = vadd.f32 0.2548296, %v1754_v41 }
 0x437   :  { %v1807_v52 = vmul.f32 %v2077_v36, %v1767_v34  ;;  %v1769_v0 = vmul.f32 %v1761_v30, %v1697_v55 }
 0x438   :  { %v1808_v16 = vmul.f32 %v2079_v63, %v1768_v15  ;;  %v1770_v24 = vmul.f32 %v1762_v23, %v1698_v26 }
 0x439   :  { %v1815_v1 = vsub.f32 1.0, %v1807_v52  ;;  %v1809_v46 = vmul.f32 %v2081_v38, %v1769_v0 }
 0x43a   :  { %v1816_v11 = vsub.f32 1.0, %v1808_v16  ;;  %v1810_v58 = vmul.f32 %v2083_v22, %v1770_v24 }
 0x43b   :  { %v1831_v32 = vsub.f32 0.0, %v1815_v1  ;;  %v1817_v17 = vsub.f32 1.0, %v1809_v46 }
 0x43c   :  { %v1832_v35 = vsub.f32 0.0, %v1816_v11  ;;  %v1818_v28 = vsub.f32 1.0, %v1810_v58 }
 0x43d   :  { %v1839_v54 = vsel %vm1823_vm7, %v1831_v32, %v1815_v1  ;;  %v1833_v53 = vsub.f32 0.0, %v1817_v17 }
 0x43e   :  { %v1840_v3 = vsel %vm1824_vm14, %v1832_v35, %v1816_v11  ;;  %v1834_v55 = vsub.f32 0.0, %v1818_v28  ;;  %v1847_v31 = vadd.f32 1.0, %v1839_v54 }
 0x43f   :  { %v1848_v26 = vadd.f32 1.0, %v1840_v3  ;;  %v1841_v51 = vsel %vm1825_vm13, %v1833_v53, %v1817_v17 }
 0x440   :  { %v1842_v2 = vsel %vm1826_vm10, %v1834_v55, %v1818_v28  ;;  %v1849_v45 = vadd.f32 1.0, %v1841_v51  ;;  %v1855_v8 = vmul.f32 %v1847_v31, %v1631_v19 }
 0x441   :  { %v1850_v50 = vadd.f32 1.0, %v1842_v2  ;;  %v1856_v61 = vmul.f32 %v1848_v26, %v1632_v44 }
 0x442   :  { %v1857_v9 = vmul.f32 %v1849_v45, %v1633_v48 }
 0x443   :  { %v1858_v60 = vmul.f32 %v1850_v50, %v1634_v37 }
 0x444   :  { %v1972_v39 = vpack.c.bf16 %v1857_v9, %v1855_v8 }
 0x445   :  { %v1970_v7 = vpack.c.bf16 %v1858_v60, %v1856_v61 }
 0x447   :  { %1971 = vmatprep.subr.bf16.mxu0 %v1970_v7 }
 0x448   :  { %1973 = vmatpush1.bf16.msra.mxu0 %v1972_v39 }
 0x44b   :  { %1957 = vmatmul.mubr.msk.f32.vlgmr.msra.gmra.mrb[8].mxu0 %vm4246_vm2, %v2090_v62 }
 0x51e   :  { %v1925_v18 = vpop.f32.mrb[8].mxu0 }
 0x51f   :  { %v1926_v49 = vadd.f32 %v1925_v18, %v1047_v6  ;;  %v1927_v56 = vpop.f32.mrb[9].mxu0 }
 0x520   :  { %v1928_v47 = vadd.f32 %v1927_v56, %v1047_v6 }
 0x521   :  { %v1932_v42 = vrot.slane %v1926_v49, 4 }
 0x522   :  { %v1933_v20 = vrot.slane %v1928_v47, 4 }
 0x523   :  { %v1936_v14 = vsel %vm4249_vm12, %v1120_v10, %v1932_v42 }
 0x524   :  { %1938 = vst [vmem:[%s3927_s7] sm:$0xff] %v1936_v14  ;;  %v1937_v5 = vsel %vm4250_vm0, %v1122_v57, %v1933_v20 }
 0x525   :  { %1939 = vst [vmem:[%s3927_s7 + $0x8] sm:$0xff] %v1937_v5 }

</bundles_post_ra>
